<compile_context>
chip_gen: v6e
topology: v6e:2x2x1
jax: 0.10.0
libtpu: 0.0.40
codegen_flags: <defaults>
</compile_context>

<pallas_src>
import jax
import jax.numpy as jnp
from jax import lax
from jax.experimental import pallas as pl
from jax.experimental.pallas import tpu as pltpu
import numpy as np

LANE = 128


def _round_up(x, m):
    return (x + m - 1) // m * m


def _pick_tile_h(H, target):
    """Largest divisor of H that is <= target (keeps blocks exact)."""
    th = max(1, min(int(target), H))
    while H % th:
        th -= 1
    return th


def _default_vmem_limit_bytes():
    """~75% of physical VMEM (96 MiB on v5e/v6e, 48 MiB on v7x); safe fallback."""
    try:
        info = pltpu.get_tpu_info()
        cap = getattr(info, "vmem_capacity_bytes", None)
        if cap:
            return int(cap) * 3 // 4
    except Exception:
        pass
    return 48 * 1024 * 1024


def bottleneck_kernel(x_ref, xt_ref, xb_ref,
                      w1_ref, b1_ref, w2_ref, b2_ref, w3_ref, b3_ref,
                      o_ref, pad_ref, patch_ref):
    # x_ref  : (1, TH, W, Cp)  current row-tile (bf16, channels padded to 128)
    # xt_ref : (1, 1,  W, Cp)  row just above the tile (clamped index)
    # xb_ref : (1, 1,  W, Cp)  row just below the tile (clamped index)
    # pad_ref   : VMEM (TH+2, W+2, Pa) bf16  zero-padded h1 image
    # patch_ref : VMEM (TH*W, 9*Pa)    bf16  im2col matrix for conv2
    TH, W, Cp = x_ref.shape[1], x_ref.shape[2], x_ref.shape[3]
    Pa = w1_ref.shape[1]

    h_idx = pl.program_id(1)
    last_h = pl.num_programs(1) - 1

    # ---- conv1 (1x1) + BN1 + ReLU, fused over tile rows + both halo rows ----
    x_all = jnp.concatenate([xt_ref[0], x_ref[0], xb_ref[0]], axis=0)  # (TH+2, W, Cp)
    m = x_all.reshape((TH + 2) * W, Cp).astype(jnp.bfloat16)
    h1 = jnp.dot(m, w1_ref[...], preferred_element_type=jnp.float32)
    h1 = jnp.maximum(h1 + b1_ref[...], 0.0)
    h1 = h1.reshape(TH + 2, W, Pa).astype(jnp.bfloat16)

    # ---- zero-padded h1 image in VMEM scratch ----
    # Every element read later is rewritten each grid step, so the scratch is
    # safe under any parallel split of the grid across TensorCores.
    zcol = jnp.zeros((TH + 2, 1, Pa), jnp.bfloat16)
    pad_ref[:, 0:1, :] = zcol                    # left pad column
    pad_ref[:, W + 1:W + 2, :] = zcol            # right pad column
    pad_ref[:, 1:W + 1, :] = h1                  # all TH+2 rows

    zrow = jnp.zeros((1, W, Pa), jnp.bfloat16)

    @pl.when(h_idx == 0)                         # conv2 zero-pad at image top
    def _():
        pad_ref[0:1, 1:W + 1, :] = zrow

    @pl.when(h_idx == last_h)                    # conv2 zero-pad at image bottom
    def _():
        pad_ref[TH + 1:TH + 2, 1:W + 1, :] = zrow

    # ---- build im2col patch: (TH*W, 9*Pa) ----
    for dy in range(3):
        for dx in range(3):
            t = dy * 3 + dx
            patch_ref[:, t * Pa:(t + 1) * Pa] = (
                pad_ref[dy:dy + TH, dx:dx + W, :].reshape(TH * W, Pa))

    # ---- conv2 (3x3, stride 1, pad 1) + BN2 + ReLU: one MXU dot ----
    h2 = jnp.dot(patch_ref[...], w2_ref[...], preferred_element_type=jnp.float32)
    h2 = jnp.maximum(h2 + b2_ref[...], 0.0).astype(jnp.bfloat16)   # (TH*W, Pp)

    # ---- conv3 (1x1) + BN3 ----
    h3 = jnp.dot(h2, w3_ref[...], preferred_element_type=jnp.float32)
    h3 = h3 + b3_ref[...]                                          # (TH*W, Cp)

    # ---- residual add + ReLU (re-read x tile: short f32 live range) ----
    res = x_ref[0].reshape(TH * W, Cp).astype(jnp.float32)
    out = jnp.maximum(res + h3, 0.0)
    o_ref[0] = out.reshape(TH, W, Cp).astype(o_ref.dtype)


def bottleneck_pallas(x_nhwc, kparams, *, tile_h=32, vmem_limit_bytes=None):
    """x_nhwc: (N, H, W, Cin) NHWC (bf16 preferred). Returns (N, H, W, Cin)."""
    w1, b1, w2, b2, w3, b3 = kparams
    N, H, W, Cin = x_nhwc.shape
    Cp, Pa = w1.shape
    K2, Pp = w2.shape
    assert K2 == 9 * Pa
    assert w3.shape == (Pp, Cp)
    assert Cin <= Cp, "packed params were built for a smaller channel count"

    # Lane-dense I/O: pad channels to a multiple of 128, slice back afterwards.
    # (In production, carry 128-multiple channel counts through the network.)
    x_p = x_nhwc if Cin == Cp else jnp.pad(
        x_nhwc, ((0, 0), (0, 0), (0, 0), (0, Cp - Cin)))

    TH = _pick_tile_h(H, tile_h)
    if vmem_limit_bytes is None:
        vmem_limit_bytes = _default_vmem_limit_bytes()

    def const_spec(arr):
        nd = arr.ndim
        return pl.BlockSpec(arr.shape, lambda n, h, nd=nd: (0,) * nd)

    grid_spec = pltpu.PrefetchScalarGridSpec(
        num_scalar_prefetch=0,
        grid=(N, H // TH),
        in_specs=[
            # current row-tile
            pl.BlockSpec((1, TH, W, Cp), lambda n, h: (n, h, 0, 0)),
            # halo row above (block size 1 along H -> index is a row index)
            pl.BlockSpec((1, 1, W, Cp),
                         lambda n, h: (n, jnp.maximum(h * TH - 1, 0), 0, 0)),
            # halo row below
            pl.BlockSpec((1, 1, W, Cp),
                         lambda n, h: (n, jnp.minimum(h * TH + TH, H - 1), 0, 0)),
            const_spec(w1), const_spec(b1),
            const_spec(w2), const_spec(b2),
            const_spec(w3), const_spec(b3),
        ],
        out_specs=pl.BlockSpec((1, TH, W, Cp), lambda n, h: (n, h, 0, 0)),
        scratch_shapes=[
            pltpu.VMEM((TH + 2, W + 2, Pa), jnp.bfloat16),   # padded h1 image
            pltpu.VMEM((TH * W, K2), jnp.bfloat16),          # im2col patch
        ],
    )

    out_p = pl.pallas_call(
        bottleneck_kernel,
        out_shape=jax.ShapeDtypeStruct((N, H, W, Cp), x_p.dtype),
        grid_spec=grid_spec,
        compiler_params=pltpu.CompilerParams(
            dimension_semantics=("parallel", "parallel"),
            vmem_limit_bytes=vmem_limit_bytes,
        ),
    )(x_p, x_p, x_p, w1, b1, w2, b2, w3, b3)

    return out_p if Cin == Cp else out_p[..., :Cin]


def bottleneck_pallas_nchw(x_nchw, kparams, **kw):
    """Drop-in NCHW (PyTorch layout) wrapper.  Prefer NHWC end-to-end: these
    transposes are full HBM round trips."""
    y = bottleneck_pallas(jnp.transpose(x_nchw, (0, 2, 3, 1)), kparams, **kw)
    return jnp.transpose(y, (0, 3, 1, 2))


# ---------------------------------------------------------------------------
# Parameter construction (raw "PyTorch-like" params) and kernel param packing.
# ---------------------------------------------------------------------------
def make_raw_params(key, in_planes, planes, expansion=4):
    ks = jax.random.split(key, 6)
    P, Cout = planes, expansion * planes

    def bn_params(k, c):
        kg, kb, km, kv = jax.random.split(k, 4)
        gamma = jax.random.uniform(kg, (c,), jnp.float32, 0.5, 1.5)
        beta = jax.random.normal(kb, (c,), jnp.float32) * 0.1
        mean = jax.random.normal(km, (c,), jnp.float32) * 0.1
        var = jax.random.uniform(kv, (c,), jnp.float32, 0.5, 1.5)
        return (gamma, beta, mean, var)

    return dict(
        w1=jax.random.normal(ks[0], (1, 1, in_planes, P), jnp.float32) * 0.1,
        bn1=bn_params(ks[1], P),
        w2=jax.random.normal(ks[2], (3, 3, P, P), jnp.float32) * 0.1,
        bn2=bn_params(ks[3], P),
        w3=jax.random.normal(ks[4], (1, 1, P, Cout), jnp.float32) * 0.1,
        bn3=bn_params(ks[5], Cout),
    )


def fold_and_pack(raw, eps=1e-5):
    """Fold eval-mode BN scale into conv weights (in f32), pad channels for the
    kernel layout, pack conv2 weights as an im2col matrix, cast matmul weights
    to bf16.  Biases stay f32."""
    def fold(gamma, beta, mean, var):
        s = gamma / jnp.sqrt(var + eps)
        return s, beta - mean * s

    s1, b1 = fold(*raw['bn1'])
    s2, b2 = fold(*raw['bn2'])
    s3, b3 = fold(*raw['bn3'])

    w1 = raw['w1'][0, 0] * s1[None, :]              # (Cin, P)
    w2 = raw['w2'] * s2[None, None, None, :]        # (3, 3, P, P)
    w3 = raw['w3'][0, 0] * s3[None, :]              # (P, Cout)

    Cin, P = w1.shape
    Cout = w3.shape[1]
    assert Cout == Cin, "residual add requires in_planes == expansion*planes"

    Cp = _round_up(Cin, LANE)    # residual / in / out channels (lane-dense)
    Pa = _round_up(P, 8)         # conv1-out / conv2-in channels (im2col block)
    Pp = _round_up(P, LANE)      # conv2-out / conv3-in channels

    w1p = jnp.pad(w1, ((0, Cp - Cin), (0, Pa - P)))
    b1p = jnp.pad(b1, ((0, Pa - P),)).reshape(1, Pa)
    # im2col weight: row index = (dy*3 + dx)*Pa + cin
    w2p = jnp.pad(w2, ((0, 0), (0, 0), (0, Pa - P), (0, Pp - P))).reshape(9 * Pa, Pp)
    b2p = jnp.pad(b2, ((0, Pp - P),)).reshape(1, Pp)
    w3p = jnp.pad(w3, ((0, Pp - P), (0, Cp - Cout)))
    b3p = jnp.pad(b3, ((0, Cp - Cout),)).reshape(1, Cp)

    return (w1p.astype(jnp.bfloat16), b1p.astype(jnp.float32),
            w2p.astype(jnp.bfloat16), b2p.astype(jnp.float32),
            w3p.astype(jnp.bfloat16), b3p.astype(jnp.float32))


def bottleneck_ref(x_nhwc, raw, eps=1e-5):
    """Pure-JAX f32 reference (NHWC) matching the PyTorch module in eval mode."""
    dn = ('NHWC', 'HWIO', 'NHWC')

    def bn(h, gamma, beta, mean, var):
        return (h - mean) / jnp.sqrt(var + eps) * gamma + beta

    h = lax.conv_general_dilated(x_nhwc, raw['w1'], (1, 1), 'VALID',
                                 dimension_numbers=dn)
    h = jax.nn.relu(bn(h, *raw['bn1']))
    h = lax.conv_general_dilated(h, raw['w2'], (1, 1), [(1, 1), (1, 1)],
                                 dimension_numbers=dn)
    h = jax.nn.relu(bn(h, *raw['bn2']))
    h = lax.conv_general_dilated(h, raw['w3'], (1, 1), 'VALID',
                                 dimension_numbers=dn)
    h = bn(h, *raw['bn3'])
    return jax.nn.relu(x_nhwc + h)


if __name__ == "__main__":
    key = jax.random.PRNGKey(0)
    kx, kp = jax.random.split(key)

    # small shapes: batch=2, in_planes=16, planes=4 (in_planes == 4*planes), 16x16
    N, in_planes, planes, H, W = 2, 16, 4, 16, 16
    x_f32 = jax.random.normal(kx, (N, H, W, in_planes), jnp.float32)   # NHWC
    x = x_f32.astype(jnp.bfloat16)          # bf16 activations in HBM

    raw = make_raw_params(kp, in_planes, planes)
    kparams = fold_and_pack(raw)

    out = bottleneck_pallas(x, kparams)     # tile_h auto-picked (16 here)
    out = jax.block_until_ready(out)

    ref = bottleneck_ref(x.astype(jnp.float32), raw)
    # Tolerance accounts for bf16 matmul operands / bf16 I/O vs. f32 reference.
    np.testing.assert_allclose(np.asarray(out.astype(jnp.float32)),
                               np.asarray(ref), rtol=5e-2, atol=5e-2)

    # also exercise the PyTorch-layout (NCHW) convenience wrapper
    out_nchw = bottleneck_pallas_nchw(jnp.transpose(x, (0, 3, 1, 2)), kparams)
    out_nchw = jax.block_until_ready(out_nchw)
    np.testing.assert_allclose(np.asarray(out_nchw.astype(jnp.float32)),
                               np.asarray(jnp.transpose(ref, (0, 3, 1, 2))),
                               rtol=5e-2, atol=5e-2)

    print("KERNEL_OK")
</pallas_src>

<mosaic_0001>
module attributes {stable_mosaic.version = 11 : i64} {
  func.func @bottleneck_kernel(%arg0: i32, %arg1: i32, %arg2: memref<1x16x16x128xbf16, #tpu.memory_space<vmem>>, %arg3: memref<1x1x16x128xbf16, #tpu.memory_space<vmem>>, %arg4: memref<1x1x16x128xbf16, #tpu.memory_space<vmem>>, %arg5: memref<128x8xbf16, #tpu.memory_space<vmem>>, %arg6: memref<1x8xf32, #tpu.memory_space<vmem>>, %arg7: memref<72x128xbf16, #tpu.memory_space<vmem>>, %arg8: memref<1x128xf32, #tpu.memory_space<vmem>>, %arg9: memref<128x128xbf16, #tpu.memory_space<vmem>>, %arg10: memref<1x128xf32, #tpu.memory_space<vmem>>, %arg11: memref<1x16x16x128xbf16, #tpu.memory_space<vmem>>, %arg12: memref<18x18x8xbf16, #tpu.memory_space<vmem>>, %arg13: memref<256x72xbf16, #tpu.memory_space<vmem>>) attributes {dimension_semantics = [#tpu.dimension_semantics<parallel>, #tpu.dimension_semantics<parallel>], iteration_bounds = array<i64: 2, 1>, scalar_prefetch = 0 : i64, scratch_operands = 2 : i64, tpu.core_type = #tpu.core_type<tc>, window_params = [{transform_indices = @transform_0, window_bounds = array<i64: 1, 16, 16, 128>}, {transform_indices = @transform_1, window_bounds = array<i64: 1, 1, 16, 128>}, {transform_indices = @transform_2, window_bounds = array<i64: 1, 1, 16, 128>}, {pipeline_mode = #tpu.pipeline_mode<synchronous>, transform_indices = @transform_3, window_bounds = array<i64: 128, 8>}, {pipeline_mode = #tpu.pipeline_mode<synchronous>, transform_indices = @transform_4, window_bounds = array<i64: 1, 8>}, {pipeline_mode = #tpu.pipeline_mode<synchronous>, transform_indices = @transform_5, window_bounds = array<i64: 72, 128>}, {pipeline_mode = #tpu.pipeline_mode<synchronous>, transform_indices = @transform_6, window_bounds = array<i64: 1, 128>}, {pipeline_mode = #tpu.pipeline_mode<synchronous>, transform_indices = @transform_7, window_bounds = array<i64: 128, 128>}, {pipeline_mode = #tpu.pipeline_mode<synchronous>, transform_indices = @transform_8, window_bounds = array<i64: 1, 128>}, {transform_indices = @transform_9, window_bounds = array<i64: 1, 16, 16, 128>}]} {
    %c0 = arith.constant 0 : index
    %c0_0 = arith.constant 0 : index
    %c0_1 = arith.constant 0 : index
    %c0_2 = arith.constant 0 : index
    %0 = vector.load %arg3[%c0, %c0_0, %c0_1, %c0_2] : memref<1x1x16x128xbf16, #tpu.memory_space<vmem>>, vector<1x1x16x128xbf16>
    %1 = vector.shape_cast %0 : vector<1x1x16x128xbf16> to vector<1x16x128xbf16>
    %c0_3 = arith.constant 0 : index
    %c0_4 = arith.constant 0 : index
    %c0_5 = arith.constant 0 : index
    %c0_6 = arith.constant 0 : index
    %2 = vector.load %arg2[%c0_3, %c0_4, %c0_5, %c0_6] : memref<1x16x16x128xbf16, #tpu.memory_space<vmem>>, vector<1x16x16x128xbf16>
    %3 = vector.shape_cast %2 : vector<1x16x16x128xbf16> to vector<16x16x128xbf16>
    %c0_7 = arith.constant 0 : index
    %c0_8 = arith.constant 0 : index
    %c0_9 = arith.constant 0 : index
    %c0_10 = arith.constant 0 : index
    %4 = vector.load %arg4[%c0_7, %c0_8, %c0_9, %c0_10] : memref<1x1x16x128xbf16, #tpu.memory_space<vmem>>, vector<1x1x16x128xbf16>
    %5 = vector.shape_cast %4 : vector<1x1x16x128xbf16> to vector<1x16x128xbf16>
    %6 = tpu.concatenate %1, %3, %5 in 0 : vector<1x16x128xbf16>, vector<16x16x128xbf16>, vector<1x16x128xbf16> -> vector<18x16x128xbf16>
    %7 = vector.shape_cast %6 : vector<18x16x128xbf16> to vector<288x128xbf16>
    %c0_11 = arith.constant 0 : index
    %c0_12 = arith.constant 0 : index
    %8 = vector.load %arg5[%c0_11, %c0_12] : memref<128x8xbf16, #tpu.memory_space<vmem>>, vector<128x8xbf16>
    %cst = arith.constant dense<0.000000e+00> : vector<288x8xf32>
    %9 = tpu.matmul %7, %8, %cst {dimension_numbers = #tpu.dot_dimension_numbers<[1], [0], [0], [1], [0, 0, 1, 1], [], []>} : vector<288x128xbf16>, vector<128x8xbf16>, vector<288x8xf32> -> vector<288x8xf32>
    %c0_13 = arith.constant 0 : index
    %c0_14 = arith.constant 0 : index
    %10 = vector.load %arg6[%c0_13, %c0_14] : memref<1x8xf32, #tpu.memory_space<vmem>>, vector<1x8xf32>
    %11 = vector.broadcast %10 : vector<1x8xf32> to vector<288x8xf32>
    %12 = arith.addf %9, %11 : vector<288x8xf32>
    %cst_15 = arith.constant 0.000000e+00 : f32
    %13 = vector.broadcast %cst_15 : f32 to vector<288x8xf32>
    %14 = arith.maximumf %12, %13 : vector<288x8xf32>
    %15 = vector.shape_cast %14 : vector<288x8xf32> to vector<18x16x8xf32>
    %16 = arith.truncf %15 : vector<18x16x8xf32> to vector<18x16x8xbf16>
    %cst_16 = arith.constant 0.000000e+00 : bf16
    %17 = vector.broadcast %cst_16 : bf16 to vector<18x1x8xbf16>
    %c0_17 = arith.constant 0 : index
    %c0_18 = arith.constant 0 : index
    %c0_19 = arith.constant 0 : index
    %18 = vector.load %arg12[%c0_17, %c0_18, %c0_19] : memref<18x18x8xbf16, #tpu.memory_space<vmem>>, vector<18x1x8xbf16>
    tpu.vector_store %arg12[%c0_17, %c0_18, %c0_19], %17 {strides = array<i32>} : memref<18x18x8xbf16, #tpu.memory_space<vmem>>, vector<18x1x8xbf16>,
    %c0_20 = arith.constant 0 : index
    %c17 = arith.constant 17 : index
    %c0_21 = arith.constant 0 : index
    %19 = vector.load %arg12[%c0_20, %c17, %c0_21] : memref<18x18x8xbf16, #tpu.memory_space<vmem>>, vector<18x1x8xbf16>
    tpu.vector_store %arg12[%c0_20, %c17, %c0_21], %17 {strides = array<i32>} : memref<18x18x8xbf16, #tpu.memory_space<vmem>>, vector<18x1x8xbf16>,
    %c0_22 = arith.constant 0 : index
    %c1 = arith.constant 1 : index
    %c0_23 = arith.constant 0 : index
    %20 = vector.load %arg12[%c0_22, %c1, %c0_23] : memref<18x18x8xbf16, #tpu.memory_space<vmem>>, vector<18x16x8xbf16>
    tpu.vector_store %arg12[%c0_22, %c1, %c0_23], %16 {strides = array<i32>} : memref<18x18x8xbf16, #tpu.memory_space<vmem>>, vector<18x16x8xbf16>,
    %cst_24 = arith.constant 0.000000e+00 : bf16
    %21 = vector.broadcast %cst_24 : bf16 to vector<1x16x8xbf16>
    %c0_i32 = arith.constant 0 : i32
    %22 = arith.cmpi eq, %arg1, %c0_i32 : i32
    %23 = arith.extui %22 : i1 to i32
    %c0_i32_25 = arith.constant 0 : i32
    %24 = arith.cmpi ne, %23, %c0_i32_25 : i32
    scf.if %24 {
      %c0_86 = arith.constant 0 : index
      %c1_87 = arith.constant 1 : index
      %c0_88 = arith.constant 0 : index
      %81 = vector.load %arg12[%c0_86, %c1_87, %c0_88] : memref<18x18x8xbf16, #tpu.memory_space<vmem>>, vector<1x16x8xbf16>
      tpu.vector_store %arg12[%c0_86, %c1_87, %c0_88], %21 {strides = array<i32>} : memref<18x18x8xbf16, #tpu.memory_space<vmem>>, vector<1x16x8xbf16>,
    } else {
    }
    %c0_i32_26 = arith.constant 0 : i32
    %25 = arith.cmpi eq, %arg1, %c0_i32_26 : i32
    %26 = arith.extui %25 : i1 to i32
    %c0_i32_27 = arith.constant 0 : i32
    %27 = arith.cmpi ne, %26, %c0_i32_27 : i32
    scf.if %27 {
      %c17_86 = arith.constant 17 : index
      %c1_87 = arith.constant 1 : index
      %c0_88 = arith.constant 0 : index
      %81 = vector.load %arg12[%c17_86, %c1_87, %c0_88] : memref<18x18x8xbf16, #tpu.memory_space<vmem>>, vector<1x16x8xbf16>
      tpu.vector_store %arg12[%c17_86, %c1_87, %c0_88], %21 {strides = array<i32>} : memref<18x18x8xbf16, #tpu.memory_space<vmem>>, vector<1x16x8xbf16>,
    } else {
    }
    %c0_28 = arith.constant 0 : index
    %c0_29 = arith.constant 0 : index
    %c0_30 = arith.constant 0 : index
    %28 = vector.load %arg12[%c0_28, %c0_29, %c0_30] : memref<18x18x8xbf16, #tpu.memory_space<vmem>>, vector<16x16x8xbf16>
    %29 = vector.shape_cast %28 : vector<16x16x8xbf16> to vector<256x8xbf16>
    %c0_31 = arith.constant 0 : index
    %c0_32 = arith.constant 0 : index
    %30 = vector.load %arg13[%c0_31, %c0_32] : memref<256x72xbf16, #tpu.memory_space<vmem>>, vector<256x8xbf16>
    tpu.vector_store %arg13[%c0_31, %c0_32], %29 {strides = array<i32>} : memref<256x72xbf16, #tpu.memory_space<vmem>>, vector<256x8xbf16>,
    %c0_33 = arith.constant 0 : index
    %c1_34 = arith.constant 1 : index
    %c0_35 = arith.constant 0 : index
    %31 = vector.load %arg12[%c0_33, %c1_34, %c0_35] : memref<18x18x8xbf16, #tpu.memory_space<vmem>>, vector<16x16x8xbf16>
    %32 = vector.shape_cast %31 : vector<16x16x8xbf16> to vector<256x8xbf16>
    %c0_36 = arith.constant 0 : index
    %c8 = arith.constant 8 : index
    %33 = vector.load %arg13[%c0_36, %c8] : memref<256x72xbf16, #tpu.memory_space<vmem>>, vector<256x8xbf16>
    tpu.vector_store %arg13[%c0_36, %c8], %32 {strides = array<i32>} : memref<256x72xbf16, #tpu.memory_space<vmem>>, vector<256x8xbf16>,
    %c0_37 = arith.constant 0 : index
    %c2 = arith.constant 2 : index
    %c0_38 = arith.constant 0 : index
    %34 = vector.load %arg12[%c0_37, %c2, %c0_38] : memref<18x18x8xbf16, #tpu.memory_space<vmem>>, vector<16x16x8xbf16>
    %35 = vector.shape_cast %34 : vector<16x16x8xbf16> to vector<256x8xbf16>
    %c0_39 = arith.constant 0 : index
    %c16 = arith.constant 16 : index
    %36 = vector.load %arg13[%c0_39, %c16] : memref<256x72xbf16, #tpu.memory_space<vmem>>, vector<256x8xbf16>
    tpu.vector_store %arg13[%c0_39, %c16], %35 {strides = array<i32>} : memref<256x72xbf16, #tpu.memory_space<vmem>>, vector<256x8xbf16>,
    %c1_40 = arith.constant 1 : index
    %c0_41 = arith.constant 0 : index
    %c0_42 = arith.constant 0 : index
    %37 = vector.load %arg12[%c1_40, %c0_41, %c0_42] : memref<18x18x8xbf16, #tpu.memory_space<vmem>>, vector<16x16x8xbf16>
    %38 = vector.shape_cast %37 : vector<16x16x8xbf16> to vector<256x8xbf16>
    %c0_43 = arith.constant 0 : index
    %c24 = arith.constant 24 : index
    %39 = vector.load %arg13[%c0_43, %c24] : memref<256x72xbf16, #tpu.memory_space<vmem>>, vector<256x8xbf16>
    tpu.vector_store %arg13[%c0_43, %c24], %38 {strides = array<i32>} : memref<256x72xbf16, #tpu.memory_space<vmem>>, vector<256x8xbf16>,
    %c1_44 = arith.constant 1 : index
    %c1_45 = arith.constant 1 : index
    %c0_46 = arith.constant 0 : index
    %40 = vector.load %arg12[%c1_44, %c1_45, %c0_46] : memref<18x18x8xbf16, #tpu.memory_space<vmem>>, vector<16x16x8xbf16>
    %41 = vector.shape_cast %40 : vector<16x16x8xbf16> to vector<256x8xbf16>
    %c0_47 = arith.constant 0 : index
    %c32 = arith.constant 32 : index
    %42 = vector.load %arg13[%c0_47, %c32] : memref<256x72xbf16, #tpu.memory_space<vmem>>, vector<256x8xbf16>
    tpu.vector_store %arg13[%c0_47, %c32], %41 {strides = array<i32>} : memref<256x72xbf16, #tpu.memory_space<vmem>>, vector<256x8xbf16>,
    %c1_48 = arith.constant 1 : index
    %c2_49 = arith.constant 2 : index
    %c0_50 = arith.constant 0 : index
    %43 = vector.load %arg12[%c1_48, %c2_49, %c0_50] : memref<18x18x8xbf16, #tpu.memory_space<vmem>>, vector<16x16x8xbf16>
    %44 = vector.shape_cast %43 : vector<16x16x8xbf16> to vector<256x8xbf16>
    %c0_51 = arith.constant 0 : index
    %c40 = arith.constant 40 : index
    %45 = vector.load %arg13[%c0_51, %c40] : memref<256x72xbf16, #tpu.memory_space<vmem>>, vector<256x8xbf16>
    tpu.vector_store %arg13[%c0_51, %c40], %44 {strides = array<i32>} : memref<256x72xbf16, #tpu.memory_space<vmem>>, vector<256x8xbf16>,
    %c2_52 = arith.constant 2 : index
    %c0_53 = arith.constant 0 : index
    %c0_54 = arith.constant 0 : index
    %46 = vector.load %arg12[%c2_52, %c0_53, %c0_54] : memref<18x18x8xbf16, #tpu.memory_space<vmem>>, vector<16x16x8xbf16>
    %47 = vector.shape_cast %46 : vector<16x16x8xbf16> to vector<256x8xbf16>
    %c0_55 = arith.constant 0 : index
    %c48 = arith.constant 48 : index
    %48 = vector.load %arg13[%c0_55, %c48] : memref<256x72xbf16, #tpu.memory_space<vmem>>, vector<256x8xbf16>
    tpu.vector_store %arg13[%c0_55, %c48], %47 {strides = array<i32>} : memref<256x72xbf16, #tpu.memory_space<vmem>>, vector<256x8xbf16>,
    %c2_56 = arith.constant 2 : index
    %c1_57 = arith.constant 1 : index
    %c0_58 = arith.constant 0 : index
    %49 = vector.load %arg12[%c2_56, %c1_57, %c0_58] : memref<18x18x8xbf16, #tpu.memory_space<vmem>>, vector<16x16x8xbf16>
    %50 = vector.shape_cast %49 : vector<16x16x8xbf16> to vector<256x8xbf16>
    %c0_59 = arith.constant 0 : index
    %c56 = arith.constant 56 : index
    %51 = vector.load %arg13[%c0_59, %c56] : memref<256x72xbf16, #tpu.memory_space<vmem>>, vector<256x8xbf16>
    tpu.vector_store %arg13[%c0_59, %c56], %50 {strides = array<i32>} : memref<256x72xbf16, #tpu.memory_space<vmem>>, vector<256x8xbf16>,
    %c2_60 = arith.constant 2 : index
    %c2_61 = arith.constant 2 : index
    %c0_62 = arith.constant 0 : index
    %52 = vector.load %arg12[%c2_60, %c2_61, %c0_62] : memref<18x18x8xbf16, #tpu.memory_space<vmem>>, vector<16x16x8xbf16>
    %53 = vector.shape_cast %52 : vector<16x16x8xbf16> to vector<256x8xbf16>
    %c0_63 = arith.constant 0 : index
    %c64 = arith.constant 64 : index
    %54 = vector.load %arg13[%c0_63, %c64] : memref<256x72xbf16, #tpu.memory_space<vmem>>, vector<256x8xbf16>
    tpu.vector_store %arg13[%c0_63, %c64], %53 {strides = array<i32>} : memref<256x72xbf16, #tpu.memory_space<vmem>>, vector<256x8xbf16>,
    %c0_64 = arith.constant 0 : index
    %c0_65 = arith.constant 0 : index
    %55 = vector.load %arg13[%c0_64, %c0_65] : memref<256x72xbf16, #tpu.memory_space<vmem>>, vector<256x72xbf16>
    %c0_66 = arith.constant 0 : index
    %c0_67 = arith.constant 0 : index
    %56 = vector.load %arg7[%c0_66, %c0_67] : memref<72x128xbf16, #tpu.memory_space<vmem>>, vector<72x128xbf16>
    %cst_68 = arith.constant dense<0.000000e+00> : vector<256x128xf32>
    %57 = tpu.matmul %55, %56, %cst_68 {dimension_numbers = #tpu.dot_dimension_numbers<[1], [0], [0], [1], [0, 0, 1, 1], [], []>} : vector<256x72xbf16>, vector<72x128xbf16>, vector<256x128xf32> -> vector<256x128xf32>
    %c0_69 = arith.constant 0 : index
    %c0_70 = arith.constant 0 : index
    %58 = vector.load %arg8[%c0_69, %c0_70] : memref<1x128xf32, #tpu.memory_space<vmem>>, vector<1x128xf32>
    %59 = vector.broadcast %58 : vector<1x128xf32> to vector<256x128xf32>
    %60 = arith.addf %57, %59 : vector<256x128xf32>
    %cst_71 = arith.constant 0.000000e+00 : f32
    %61 = vector.broadcast %cst_71 : f32 to vector<256x128xf32>
    %62 = arith.maximumf %60, %61 : vector<256x128xf32>
    %63 = arith.truncf %62 : vector<256x128xf32> to vector<256x128xbf16>
    %c0_72 = arith.constant 0 : index
    %c0_73 = arith.constant 0 : index
    %64 = vector.load %arg9[%c0_72, %c0_73] : memref<128x128xbf16, #tpu.memory_space<vmem>>, vector<128x128xbf16>
    %cst_74 = arith.constant dense<0.000000e+00> : vector<256x128xf32>
    %65 = tpu.matmul %63, %64, %cst_74 {dimension_numbers = #tpu.dot_dimension_numbers<[1], [0], [0], [1], [0, 0, 1, 1], [], []>} : vector<256x128xbf16>, vector<128x128xbf16>, vector<256x128xf32> -> vector<256x128xf32>
    %c0_75 = arith.constant 0 : index
    %c0_76 = arith.constant 0 : index
    %66 = vector.load %arg10[%c0_75, %c0_76] : memref<1x128xf32, #tpu.memory_space<vmem>>, vector<1x128xf32>
    %67 = vector.broadcast %66 : vector<1x128xf32> to vector<256x128xf32>
    %68 = arith.addf %65, %67 : vector<256x128xf32>
    %c0_77 = arith.constant 0 : index
    %c0_78 = arith.constant 0 : index
    %c0_79 = arith.constant 0 : index
    %c0_80 = arith.constant 0 : index
    %69 = vector.load %arg2[%c0_77, %c0_78, %c0_79, %c0_80] : memref<1x16x16x128xbf16, #tpu.memory_space<vmem>>, vector<1x16x16x128xbf16>
    %70 = vector.shape_cast %69 : vector<1x16x16x128xbf16> to vector<16x16x128xbf16>
    %71 = vector.shape_cast %70 : vector<16x16x128xbf16> to vector<256x128xbf16>
    %72 = arith.extf %71 : vector<256x128xbf16> to vector<256x128xf32>
    %73 = arith.addf %72, %68 : vector<256x128xf32>
    %cst_81 = arith.constant 0.000000e+00 : f32
    %74 = vector.broadcast %cst_81 : f32 to vector<256x128xf32>
    %75 = arith.maximumf %73, %74 : vector<256x128xf32>
    %76 = vector.shape_cast %75 : vector<256x128xf32> to vector<16x16x128xf32>
    %77 = arith.truncf %76 : vector<16x16x128xf32> to vector<16x16x128xbf16>
    %c0_82 = arith.constant 0 : index
    %c0_83 = arith.constant 0 : index
    %c0_84 = arith.constant 0 : index
    %c0_85 = arith.constant 0 : index
    %78 = vector.load %arg11[%c0_82, %c0_83, %c0_84, %c0_85] : memref<1x16x16x128xbf16, #tpu.memory_space<vmem>>, vector<1x16x16x128xbf16>
    %79 = vector.shape_cast %78 : vector<1x16x16x128xbf16> to vector<16x16x128xbf16>
    %80 = vector.shape_cast %77 : vector<16x16x128xbf16> to vector<1x16x16x128xbf16>
    tpu.vector_store %arg11[%c0_82, %c0_83, %c0_84, %c0_85], %80 {strides = array<i32>} : memref<1x16x16x128xbf16, #tpu.memory_space<vmem>>, vector<1x16x16x128xbf16>,
    return
  }
  func.func @transform_0(%arg0: i32, %arg1: i32) -> (i32, i32, i32, i32) {
    %c0_i32 = arith.constant 0 : i32
    %c0_i32_0 = arith.constant 0 : i32
    %c0_i32_1 = arith.constant 0 : i32
    return %arg0, %arg1, %c0_i32, %c0_i32_0 : i32, i32, i32, i32
  }
  func.func @transform_1(%arg0: i32, %arg1: i32) -> (i32, i32, i32, i32) {
    %c16_i32 = arith.constant 16 : i32
    %0 = arith.muli %arg1, %c16_i32 : i32
    %c1_i32 = arith.constant 1 : i32
    %1 = arith.subi %0, %c1_i32 : i32
    %c0_i32 = arith.constant 0 : i32
    %2 = arith.maxsi %1, %c0_i32 : i32
    %c0_i32_0 = arith.constant 0 : i32
    %c0_i32_1 = arith.constant 0 : i32
    %c0_i32_2 = arith.constant 0 : i32
    return %arg0, %2, %c0_i32_0, %c0_i32_1 : i32, i32, i32, i32
  }
  func.func @transform_2(%arg0: i32, %arg1: i32) -> (i32, i32, i32, i32) {
    %c16_i32 = arith.constant 16 : i32
    %0 = arith.muli %arg1, %c16_i32 : i32
    %c16_i32_0 = arith.constant 16 : i32
    %1 = arith.addi %0, %c16_i32_0 : i32
    %c15_i32 = arith.constant 15 : i32
    %2 = arith.minsi %1, %c15_i32 : i32
    %c0_i32 = arith.constant 0 : i32
    %c0_i32_1 = arith.constant 0 : i32
    %c0_i32_2 = arith.constant 0 : i32
    return %arg0, %2, %c0_i32, %c0_i32_1 : i32, i32, i32, i32
  }
  func.func @transform_3(%arg0: i32, %arg1: i32) -> (i32, i32) {
    %c0_i32 = arith.constant 0 : i32
    %c0_i32_0 = arith.constant 0 : i32
    %c0_i32_1 = arith.constant 0 : i32
    return %c0_i32, %c0_i32_0 : i32, i32
  }
  func.func @transform_4(%arg0: i32, %arg1: i32) -> (i32, i32) {
    %c0_i32 = arith.constant 0 : i32
    %c0_i32_0 = arith.constant 0 : i32
    %c0_i32_1 = arith.constant 0 : i32
    return %c0_i32, %c0_i32_0 : i32, i32
  }
  func.func @transform_5(%arg0: i32, %arg1: i32) -> (i32, i32) {
    %c0_i32 = arith.constant 0 : i32
    %c0_i32_0 = arith.constant 0 : i32
    %c0_i32_1 = arith.constant 0 : i32
    return %c0_i32, %c0_i32_0 : i32, i32
  }
  func.func @transform_6(%arg0: i32, %arg1: i32) -> (i32, i32) {
    %c0_i32 = arith.constant 0 : i32
    %c0_i32_0 = arith.constant 0 : i32
    %c0_i32_1 = arith.constant 0 : i32
    return %c0_i32, %c0_i32_0 : i32, i32
  }
  func.func @transform_7(%arg0: i32, %arg1: i32) -> (i32, i32) {
    %c0_i32 = arith.constant 0 : i32
    %c0_i32_0 = arith.constant 0 : i32
    %c0_i32_1 = arith.constant 0 : i32
    return %c0_i32, %c0_i32_0 : i32, i32
  }
  func.func @transform_8(%arg0: i32, %arg1: i32) -> (i32, i32) {
    %c0_i32 = arith.constant 0 : i32
    %c0_i32_0 = arith.constant 0 : i32
    %c0_i32_1 = arith.constant 0 : i32
    return %c0_i32, %c0_i32_0 : i32, i32
  }
  func.func @transform_9(%arg0: i32, %arg1: i32) -> (i32, i32, i32, i32) {
    %c0_i32 = arith.constant 0 : i32
    %c0_i32_0 = arith.constant 0 : i32
    %c0_i32_1 = arith.constant 0 : i32
    return %arg0, %arg1, %c0_i32, %c0_i32_0 : i32, i32, i32, i32
  }
}

</mosaic_0001>

<bundles_post_ra>
// kernel: tpu_custom_call.1
= control target key start
LH: loop header
LB: loop body
LE: loop exit
PB: predicated region body
PF: predicated region fallthrough
CT: control target
= control target key end

     0   :  { %s9310_s0 = inlined_call_operand.hbm [shape: bf16[2,16,16,128], index: 0, kind: input, shape index: {}]   ;;  %s9311_s1 = inlined_call_operand.hbm [shape: bf16[2,16,16,128], index: 1, kind: input, shape index: {}]   ;;  %s9312_s2 = inlined_call_operand.hbm [shape: bf16[2,16,16,128], index: 2, kind: input, shape index: {}]   ;;  %s9313_s3 = inlined_call_operand.vmem [shape: bf16[128,8], index: 3, kind: input, shape index: {}]   ;;  %s9314_s4 = inlined_call_operand.vmem [shape: f32[1,8], index: 4, kind: input, shape index: {}]   ;;  %s9315_s5 = inlined_call_operand.hbm [shape: bf16[72,128], index: 5, kind: input, shape index: {}]   ;;  %s9316_s6 = inlined_call_operand.vmem [shape: f32[1,128], index: 6, kind: input, shape index: {}]   ;;  %s9317_s7 = inlined_call_operand.vmem [shape: bf16[128,128], index: 7, kind: input, shape index: {}]   ;;  %s9318_s8 = inlined_call_operand.vmem [shape: f32[1,128], index: 8, kind: input, shape index: {}]   ;;  %s9319_s9 = inlined_call_operand.hbm [shape: bf16[2,16,16,128], index: 9, kind: output, shape index: {}]  }
   0x1   :  { %9335 = sst [smem:[#allocation29_spill]] %s9311_s1 }
   0x2   :  { %9336 = sst [smem:[#allocation30_spill]] %s9319_s9 }
   0x3   :  { %14 = vsyncpa [#allocation5], 0 }
   0x4   :  { %16 = vsyncpa [#allocation5 + $0x1], 0 }
   0x5   :  { %17 = vsyncpa [#allocation8], 0 }
   0x6   :  { %19 = vsyncpa [#allocation8 + $0x1], 0 }
   0x7   :  { %20 = vsyncpa [#allocation11], 0 }
   0x8   :  { %21 = vsyncpa [#allocation6], 0 }
   0x9   :  { %23 = vsyncpa [#allocation6 + $0x1], 0  ;;  %s7024_s30 = smov 0   ;;  %s7026_s10 = smov 0  }
   0xa   :  { %s7028_s11 = smov 0   ;;  %s7030_s12 = smov 0  }
   0xb   :  { %s7032_s13 = smov 0   ;;  %s7034_s14 = smov 0  }
   0xc LB: > { %9337 = sst [smem:[#allocation17_spill]] %s6935_s30  ;;  %s41_s15 = sadd.s32 1, %s6951_s13  ;;  %s6955_s14 = sphi %s7034_s14, %s29_s14   ;;  %s6951_s13 = sphi %s7032_s13, %s9388_s13   ;;  %s6947_s12 = sphi %s7030_s12, %s9387_s12   ;;  %s6943_s11 = sphi %s7028_s11, %s9386_s11   ;;  %s6939_s10 = sphi %s7026_s10, %s9390_s10   ;;  %s6935_s30 = sphi %s7024_s30, %s9389_s30  }
   0xd   : > { %9338 = sst [smem:[#allocation18_spill]] %s6943_s11  ;;  %s50_s16 = sadd.s32 1, %s6943_s11 }
   0xe   : > { %9339 = sst [smem:[#allocation19_spill]] %s6951_s13  ;;  %p43_p0 = scmp.ge.s32.totalorder %s41_s15, 2 }
   0xf   : > { %9340 = sst [smem:[#allocation20_spill]] %s6955_s14  ;;  %p57_p1 = scmp.ne.s32.totalorder %s6943_s11, %s6939_s10 }
  0x10   : > { %p58_p2 = scmp.eq.s32.totalorder %s6955_s14, 0  ;;  %s9392_s15 = smov (%p43_p0, %s41_s15), 0 }
  0x11   : > { %9341 = sst [smem:[#allocation21_spill]] %s9392_s15  ;;  %s45_s17 = ssub.s32 %s6951_s13, %s9392_s15 }
  0x12   : > { %p59_p3 = por %p58_p2, %p57_p1  ;;  %p48_p5 = scmp.eq.s32.totalorder %s45_s17, 0 }
  0x13   : > { %p6635_p6 = scmp.lt.s32.totalorder %s6955_s14, 2  ;;  %s7069_s18 = sand.u32 1, %s6943_s11  }
  0x14   : > { %s7072_s19 = sshll.u32 %s6951_s13, 11  ;;  %s365_s22 = sand.u32 1, %s6955_s14  }
  0x15   : > { %s7075_s20 = scalar_select %p48_p5, %s6943_s11, %s50_s16  }
  0x16   : > { %p7077_p7 = pnand %p6635_p6, %p59_p3  ;;  %s5924_s23 = sshll.u32 %s7069_s18, 3 }
  0x17   : > { %9342 = sst [smem:[#allocation22_spill]] %s7075_s20  ;;  %s369_s27 = scalar_lea.vmem [#allocation7], %s5924_s23 }
  0x18   : > { %s9344_s1 = sld [smem:[#allocation29_spill]]  ;;  %s382_s28 = sshll.u32 %s369_s27, 4  ;;  %s383_s28 = int_to_ptr.vmem [resolvable:$true] %s382_s28 }
  0x19   : > { %s7087_s29 = scalar_lea.sflag [#allocation8], %s365_s22  ;;  %p6759_p8 = pneg %p7077_p7 }
  0x1a   : > { %s6770_s16 = scalar_lea.vmem %s383_s28, 128  ;;  %s6957_s17 = smov [#allocation7]  }
  0x1b   : > { %p6771_p9 = scmp.ne.s32.totalorder %s383_s28, %s6770_s16  ;;  %s6775_s15 = sshll.u32 %s6957_s17, 4  ;;  %s6776_s15 = int_to_ptr.vmem [resolvable:$false] %s6775_s15 }
  0x1c   : > { %s6777_s13 = scalar_lea.vmem %s6776_s15, 256  ;;  %p6778_p12 = scmp.lt.s32.totalorder %s383_s28, %s6776_s15 }
  0x1d   : > { %p6773_p10 = pnand %p6771_p9, %p6759_p8  ;;  %p6779_p13 = scmp.lt.s32.totalorder %s6777_s13, %s6770_s16 }
  0x1e   : > { %s381_s26 = scalar_lea.hbm %s9344_s1, %s7072_s19 }
  0x1f   : > { %p6774_p11 = pneg %p6773_p10  ;;  %p6780_p0 = por %p6779_p13, %p6778_p12 }
  0x21   : > { %p6781_p2 = pnand %p6780_p0, %p6774_p11 }
  0x23   : > { %6784 = shalt.err (!%p6781_p2)
}
  0x24   : > { %s9322_s24 = smov 64   ;;  %s9324_s22 = smov 4  }
  0x25   : > { %6626 = dma.hbm_to_vmem [thread:$0]  (!%p7077_p7), %s381_s26, 128, %s383_s28, %s7087_s29, %s9322_s24, %s9322_s24, %s9324_s22  }
  0x26   : > { %s396_s13 = scalar_lea.vmem [#allocation9], %s5924_s23  ;;  %s7103_s25 = sadd.s32 4294967295, %s6955_s14  }
  0x27   : > { %s409_s15 = sshll.u32 %s396_s13, 4  ;;  %s5917_s27 = sadd.s32 4294967294, %s6955_s14   ;;  %s7100_s15 = int_to_ptr.vmem [resolvable:$true] %s409_s15 }
  0x28   : > { %p63_p3 = scmp.ne.s32.totalorder %s6939_s10, %s6935_s30  ;;  %p64_p5 = scmp.eq.s32.totalorder %s7103_s25, 0 }
  0x29   : > { %p287_p6 = scmp.eq.s32.totalorder %s7103_s25, 1  ;;  %p293_p9 = scmp.eq.s32.totalorder %s5917_s27, 1 }
  0x2a   : > { %p7112_p10 = por %p64_p5, %p63_p3  ;;  %p5918_p11 = scmp.ge.s32.totalorder %s6955_s14, 1 }
  0x2b   : > { %p7120_p12 = por %p287_p6, %p57_p1  ;;  %p7124_p13 = por %p293_p9, %p63_p3 }
  0x2c   : > { %p300_p0 = scmp.lt.s32.totalorder %s6955_s14, 3  ;;  %s6960_s17 = smov [#allocation10]  }
  0x2d   : > { %s9346_s23 = scalar_select %p7120_p12, 1, 0 }
  0x2e   : > { %s9347_s28 = scalar_select %p7124_p13, 1, 0 }
  0x2f   : > { %p7129_p2 = pnand %p5918_p11, %p300_p0  ;;  %s318_s13 = sshll.u32 %s6960_s17, 4  ;;  %s7133_s13 = int_to_ptr.vmem [resolvable:$true] %s318_s13 }
  0x30   : > { %9348 = sst [smem:[#allocation23_spill]] %s9347_s28  ;;  %s5921_s27 = sshll.u32 %s7069_s18, 7 }
  0x31   : > { %p6616_p1 = pneg %p7129_p2  ;;  %s354_s1 = scalar_lea.hbm %s9310_s0, %s7072_s19 }
  0x32   : > { %s345_s20 = scalar_lea.vmem [#allocation4], %s5921_s27  ;;  %s342_s28 = scalar_lea.sflag [#allocation5], %s7069_s18 }
  0x33   : > { %s355_s11 = sshll.u32 %s345_s20, 4  ;;  %p7144_p3 = pnand %p6616_p1, %p64_p5  ;;  %s356_s11 = int_to_ptr.vmem [resolvable:$true] %s355_s11 }
  0x34   : > { %s6798_s30 = scalar_lea.vmem %s356_s11, 2048  ;;  %s6961_s17 = smov [#allocation4]  }
  0x35   : > { %p6799_p6 = scmp.ne.s32.totalorder %s356_s11, %s6798_s30  ;;  %s6803_s9 = sshll.u32 %s6961_s17, 4  ;;  %s6804_s9 = int_to_ptr.vmem [resolvable:$false] %s6803_s9 }
  0x36   : > { %s6805_s24 = scalar_lea.vmem %s6804_s9, 4096  ;;  %p6806_p0 = scmp.lt.s32.totalorder %s356_s11, %s6804_s9 }
  0x37   : > { %p6801_p9 = pnand %p6799_p6, %p6759_p8  ;;  %p6807_p4 = scmp.lt.s32.totalorder %s6805_s24, %s6798_s30 }
  0x39   : > { %p6802_p11 = pneg %p6801_p9  ;;  %p6808_p13 = por %p6807_p4, %p6806_p0 }
  0x3b   : > { %p6809_p12 = pnand %p6808_p13, %p6802_p11 }
  0x3d   : > { %6812 = shalt.err (!%p6809_p12)
}
  0x3e   : > { %s9351_s20 = smov 4   ;;  %s9352_s22 = smov 64  }
  0x3f   : > { %6623 = dma.hbm_to_vmem [thread:$0]  (!%p7077_p7), %s354_s1, 2048, %s356_s11, %s342_s28, %s9352_s22, %s9352_s22, %s9351_s20  }
  0x40   : > { %s6134_s18 = sadd.s32 1920, %s7072_s19  ;;  %p6815_p1 = pneg %p7144_p3 }
  0x41   : > { %s6824_s27 = scalar_lea.vmem %s7133_s13, 576  ;;  %p6832_p12 = scmp.lt.s32.totalorder %s7133_s13, %s7133_s13 }
  0x42   : > { %p6825_p6 = scmp.ne.s32.totalorder %s7133_s13, %s6824_s27  ;;  %p6833_p13 = scmp.lt.s32.totalorder %s6824_s27, %s6824_s27 }
  0x44   : > { %p6827_p9 = pnand %p6825_p6, %p6815_p1  ;;  %p6834_p11 = por %p6833_p13, %p6832_p12 }
  0x46   : > { %p6828_p4 = pneg %p6827_p9 }
  0x48   : > { %p6835_p0 = pnand %p6834_p11, %p6828_p4 }
  0x4a   : > { %6838 = shalt.err (!%p6835_p0)
}
  0x4b   : > { %6619 = dma.hbm_to_vmem [thread:$0]  (!%p7144_p3), %s9315_s5, 576, %s7133_s13, [#allocation11], %s9352_s22, %s9352_s22, %s9351_s20  }
  0x4c   : > { %s408_s19 = scalar_lea.hbm %s9312_s2, %s6134_s18  ;;  %s6852_s28 = scalar_lea.vmem %s7100_s15, 128 }
  0x4d   : > { %p6853_p1 = scmp.ne.s32.totalorder %s7100_s15, %s6852_s28  ;;  %s6962_s14 = smov [#allocation9]  }
  0x4e   : > { %s6857_s17 = sshll.u32 %s6962_s14, 4  ;;  %s6858_s17 = int_to_ptr.vmem [resolvable:$false] %s6857_s17 }
  0x4f   : > { %p6855_p6 = pnand %p6853_p1, %p6759_p8  ;;  %s6859_s24 = scalar_lea.vmem %s6858_s17, 256 }
  0x50   : > { %p6860_p4 = scmp.lt.s32.totalorder %s7100_s15, %s6858_s17  ;;  %p6861_p12 = scmp.lt.s32.totalorder %s6859_s24, %s6852_s28 }
  0x51   : > { %p6856_p9 = pneg %p6855_p6 }
  0x52   : > { %p6862_p13 = por %p6861_p12, %p6860_p4 }
  0x54   : > { %p6863_p11 = pnand %p6862_p13, %p6856_p9 }
  0x56   : > { %6866 = shalt.err (!%p6863_p11)
}
  0x57   : > { %6629 = dma.hbm_to_vmem [thread:$0]  (!%p7077_p7), %s408_s19, 128, %s7100_s15, %s7087_s29, %s9352_s22, %s9352_s22, %s9351_s20  }
  0x58   : > { %421 = sbr.rel (%p7129_p2) target bundleno = 1436 (0x59c), region = 56 }
  0x5d   : > { %s7192_s13 = sand.u32 1, %s6939_s10  }
  0x5e   : > { %s5931_s18 = sshll.u32 %s7192_s13, 7  ;;  %s424_s27 = scalar_lea.sflag [#allocation5], %s7192_s13 }
  0x5f   : > { %s7198_s21 = scalar_lea.vmem [#allocation4], %s5931_s18 }
  0x60   : > { %6918 = dma.done.wait (%p7112_p10), %s424_s27, 2048  }
  0x61   : > { %6920 = vsyncadd (%p7112_p10), %s424_s27, 4294965248  ;;  %s432_s29 = sand.u32 1, %s7103_s25   ;;  %s5932_s15 = sshll.u32 %s7192_s13, 3 }
  0x62   : > { %s433_s16 = scalar_lea.sflag [#allocation8], %s432_s29  ;;  %s436_s20 = scalar_lea.vmem [#allocation7], %s5932_s15 }
  0x63   : > { %6922 = dma.done.wait (%p7112_p10), %s433_s16, 256  }
  0x64   : > { %6924 = vsyncadd (%p7112_p10), %s433_s16, 4294967040  ;;  %s7210_s22 = scalar_lea.vmem [#allocation9], %s5932_s15 }
  0x65   : > { %6926 = dma.done.wait (%p64_p5), [#allocation11], 576  }
  0x66   : > { %6928 = vsyncadd (%p64_p5), [#allocation11], 4294966720  ;;  %v6699_v0 = vld [vmem:[%s9313_s3 + $0x38] sm:$0xff]   ;;  %v6700_v1 = vld [vmem:[%s9313_s3 + $0x30] sm:$0xff]   ;;  %vm951_vm0 = vcmask 57344   ;;  %vm1516_vm5 = vcmask 60416  }
  0x67   : > { %6450 = vmatprep.subr.bf16.mxu0 %v6699_v0  ;;  %v6701_v2 = vld [vmem:[%s9313_s3 + $0x28] sm:$0xff]   ;;  %v6702_v3 = vld [vmem:[%s9313_s3 + $0x20] sm:$0xff]   ;;  %v6703_v5 = vld [vmem:[%s9313_s3 + $0x18] sm:$0xff]   ;;  %vm952_vm1 = vsmask.f32 256  ;;  %vm2388_vm9 = vcmask 1042432  }
  0x68   : > { %6451 = vmatpush3.bf16.msra.mxu0 %v6699_v0  ;;  %v6707_v4 = vld [vmem:[%s436_s20] sm:$0xff]   ;;  %v6704_v6 = vld [vmem:[%s9313_s3 + $0x10] sm:$0xff]   ;;  %v6705_v7 = vld [vmem:[%s9313_s3 + $0x8] sm:$0xff]   ;;  %vm1008_vm3 = vsmask.f32 7938  ;;  %vm2389_vm10 = vcmask 1046532  }
  0x69   : > { %6452 = vmatprep.subr.bf16.mxu0 %v6700_v1  ;;  %6466 = vmatprep.mubr.bf16.mxu0 %v6707_v4  ;;  %v6706_v8 = vld [vmem:[%s9313_s3] sm:$0xff]   ;;  %v6708_v9 = vld [vmem:[%s7198_s21] sm:$0xff]   ;;  %v6710_v11 = vld [vmem:[%s7198_s21 + $0x10] sm:$0xff]   ;;  %vm1154_vm6 = vsmask.f32 4368  ;;  %s6964_s30 = smov 24  }
  0x6a   : > { %v6709_v10 = vld [vmem:[%s7198_s21 + $0x8] sm:$0xff]   ;;  %v6711_v12 = vld [vmem:[%s7198_s21 + $0x18] sm:$0xff]   ;;  %v6712_v13 = vld [vmem:[%s7198_s21 + $0x20] sm:$0xff]   ;;  %vm1776_vm11 = vsmask.f32 3328  ;;  %s6965_s11 = smov 16  }
  0x6b   : > { %v6713_v14 = vld [vmem:[%s7198_s21 + $0x28] sm:$0xff]   ;;  %v6714_v15 = vld [vmem:[%s7198_s21 + $0x30] sm:$0xff]   ;;  %v6715_v16 = vld [vmem:[%s7198_s21 + $0x38] sm:$0xff]   ;;  %vm1777_vm13 = vsmask.f32 7440  ;;  %s6966_s26 = smov 40  }
  0x6c   : > { %6453 = vmatpush3.bf16.msra.mxu0 %v6700_v1  ;;  %v6716_v17 = vld [vmem:[%s7198_s21 + $0x40] sm:$0xff]   ;;  %vm7250_vm2 = vmand %vm951_vm0, %vm952_vm1  ;;  %v957_v19 = vld [vmem:[#allocation2 + $0xc] sm:$0x1]  ;;  %s6967_s19 = smov 8   ;;  %s6968_s28 = smov 48   ;;  %vm2259_vm15 = vcmask 126016  }
  0x6d   : > { %6454 = vmatprep.subr.bf16.mxu0 %v6701_v2  ;;  %v958_v20 = vsel %vm7250_vm2, 0, %v957_v19  ;;  %v954_v21 = vld [vmem:[#allocation2] sm:$0x1]  ;;  %vm7259_vm4 = vmand %vm951_vm0, %vm1008_vm3  ;;  %v1013_v24 = vld [vmem:[#allocation2 + $0x14] sm:$0x1]  ;;  %s6969_s14 = smov 32  }
  0x6e   : > { %959 = vst [vmem:[#allocation2 + $0xc] sm:$0x1] %v958_v20  ;;  %v955_v22 = vsel %vm7250_vm2, 0, %v954_v21  ;;  %v1014_v25 = vsel %vm7259_vm4, 0, %v1013_v24  ;;  %v1010_v26 = vld [vmem:[#allocation2 + $0x8] sm:$0x1]  ;;  %vm7305_vm7 = vmand %vm1516_vm5, %vm1008_vm3 }
  0x6f   : > { %956 = vst [vmem:[#allocation2] sm:$0x1] %v955_v22  ;;  %1015 = vst [vmem:[#allocation2 + $0x14] sm:$0x1] %v1014_v25  ;;  %v1011_v27 = vsel %vm7259_vm4, 0, %v1010_v26  ;;  %v6717_v42 = vld [vmem:[%s7198_s21 + $0x48] sm:$0xff]  }
  0x70   : > { %6455 = vmatpush3.bf16.msra.mxu0 %v6701_v2  ;;  %1012 = vst [vmem:[#allocation2 + $0x8] sm:$0x1] %v1011_v27  ;;  %v963_v28 = vld [vmem:[#allocation2 + $0x24] sm:$0x1]  ;;  %v960_v29 = vld [vmem:[#allocation2 + $0x18] sm:$0x1]  ;;  %vm7316_vm8 = vmor %vm952_vm1, %vm1154_vm6 }
  0x71   : > { %6456 = vmatprep.subr.bf16.mxu0 %v6702_v3  ;;  %v964_v30 = vsel %vm7250_vm2, 0, %v963_v28  ;;  %v961_v31 = vsel %vm7250_vm2, 0, %v960_v29  ;;  %v1019_v32 = vld [vmem:[#allocation2 + $0x2c] sm:$0x1]  ;;  %v1016_v34 = vld [vmem:[#allocation2 + $0x20] sm:$0x1]  ;;  %vm7348_vm12 = vmor %vm2388_vm9, %vm2389_vm10 }
  0x72   : > { %965 = vst [vmem:[#allocation2 + $0x24] sm:$0x1] %v964_v30  ;;  %962 = vst [vmem:[#allocation2 + $0x18] sm:$0x1] %v961_v31  ;;  %v1020_v33 = vsel %vm7259_vm4, 0, %v1019_v32  ;;  %v1017_v35 = vsel %vm7259_vm4, 0, %v1016_v34 }
  0x73   : > { %1021 = vst [vmem:[#allocation2 + $0x2c] sm:$0x1] %v1020_v33  ;;  %1018 = vst [vmem:[#allocation2 + $0x20] sm:$0x1] %v1017_v35  ;;  %v969_v36 = vld [vmem:[#allocation2 + $0x3c] sm:$0x1] }
  0x74   : > { %6457 = vmatpush3.bf16.msra.mxu0 %v6702_v3  ;;  %v966_v37 = vld [vmem:[#allocation2 + $0x30] sm:$0x1]  ;;  %v970_v38 = vsel %vm7250_vm2, 0, %v969_v36  ;;  %v1025_v40 = vld [vmem:[#allocation2 + $0x44] sm:$0x1]  ;;  %v6718_v45 = vld [vmem:[%s7198_s21 + $0x50] sm:$0xff]  }
  0x75   : > { %6458 = vmatprep.subr.bf16.mxu0 %v6703_v5  ;;  %v967_v39 = vsel %vm7250_vm2, 0, %v966_v37  ;;  %971 = vst [vmem:[#allocation2 + $0x3c] sm:$0x1] %v970_v38  ;;  %v1022_v41 = vld [vmem:[#allocation2 + $0x38] sm:$0x1]  ;;  %v1026_v43 = vsel %vm7259_vm4, 0, %v1025_v40  ;;  %vm7376_vm14 = vmor %vm1776_vm11, %vm1777_vm13 }
  0x76   : > { %968 = vst [vmem:[#allocation2 + $0x30] sm:$0x1] %v967_v39  ;;  %v1023_v44 = vsel %vm7259_vm4, 0, %v1022_v41  ;;  %1027 = vst [vmem:[#allocation2 + $0x44] sm:$0x1] %v1026_v43  ;;  %v6719_v4 = vld [vmem:[%s7198_s21 + $0x58] sm:$0xff]  }
  0x77   : > { %1024 = vst [vmem:[#allocation2 + $0x38] sm:$0x1] %v1023_v44  ;;  %v975_v46 = vld [vmem:[#allocation2 + $0x54] sm:$0x1]  ;;  %v972_v48 = vld [vmem:[#allocation2 + $0x48] sm:$0x1] }
  0x78   : > { %6459 = vmatpush3.bf16.msra.mxu0 %v6703_v5  ;;  %v976_v47 = vsel %vm7250_vm2, 0, %v975_v46  ;;  %v1031_v49 = vld [vmem:[#allocation2 + $0x5c] sm:$0x1]  ;;  %v973_v50 = vsel %vm7250_vm2, 0, %v972_v48  ;;  %v1028_v52 = vld [vmem:[#allocation2 + $0x50] sm:$0x1] }
  0x79   : > { %6460 = vmatprep.subr.bf16.mxu0 %v6704_v6  ;;  %977 = vst [vmem:[#allocation2 + $0x54] sm:$0x1] %v976_v47  ;;  %v1032_v51 = vsel %vm7259_vm4, 0, %v1031_v49  ;;  %974 = vst [vmem:[#allocation2 + $0x48] sm:$0x1] %v973_v50  ;;  %v1029_v53 = vsel %vm7259_vm4, 0, %v1028_v52 }
  0x7a   : > { %1033 = vst [vmem:[#allocation2 + $0x5c] sm:$0x1] %v1032_v51  ;;  %1030 = vst [vmem:[#allocation2 + $0x50] sm:$0x1] %v1029_v53  ;;  %v7296_v54 = vld [vmem:[%s9314_s4] ss:$0 sm:$0xff] }
  0x7b   : > { %v6720_v22 = vld [vmem:[%s7198_s21 + $0x60] sm:$0xff]   ;;  %v1518_v24 = vld [vmem:[#allocation2] sm:$0xf]  ;;  %v1530_v35 = vld [vmem:[#allocation2 + $0x14] sm:$0x1]  ;;  %s6970_s25 = smov 64  }
  0x7c   : > { %6461 = vmatpush3.bf16.msra.mxu0 %v6704_v6  ;;  %v1523_v51 = vld [vmem:[#allocation2 + $0x8] sm:$0x1]  ;;  %s6971_s17 = smov 56   ;;  %vm2599_vm0 = vcmask 191616   ;;  %vm2793_vm1 = vcmask 257216   ;;  %vm5020_vm3 = vcmask 1043456  }
  0x7d   : > { %6462 = vmatprep.subr.bf16.mxu0 %v6705_v7  ;;  %vm3354_vm6 = vcmask 322816   ;;  %vm3691_vm9 = vcmask 388416   ;;  %vm3885_vm10 = vcmask 454016   ;;  %vm4446_vm11 = vcmask 519616   ;;  %v6756_v23 = vld [vmem:[%s9314_s4] ss:$0 sm:$0xff] }
  0x7e   : > { %vm4783_vm13 = vcmask 585216   ;;  %s5754_s27 = scalar_lea.sflag [#allocation6], %s7192_s13  ;;  %p9379_p8 = scmp.ne.s32.totalorder %s9346_s23, 0 }
  0x80   : > { %6463 = vmatpush3.bf16.msra.mxu0 %v6705_v7 }
  0x81   : > { %6464 = vmatprep.subr.bf16.mxu0 %v6706_v8 }
  0x84   : > { %6465 = vmatpush3.bf16.msra.mxu0 %v6706_v8 }
  0x87   : > { %6467 = vmatmul.mubr.bf16.vlgmr.msra.gmra.mxu0 %v6708_v9 }
  0x88   : > { %6470 = vmatprep.mubr.bf16.mxu0 %v6709_v10 }
  0x8f   : > { %6471 = vmatmul.mubr.bf16.gmra.mxu0 %v6710_v11 }
  0x90   : > { %6474 = vmatprep.mubr.bf16.mxu0 %v6711_v12  ;;  %v1526_v12 = vld [vmem:[#allocation2 + $0xc] sm:$0xf] }
  0x97   : > { %6475 = vmatmul.mubr.bf16.gmra.mxu0 %v6712_v13 }
  0x98   : > { %6478 = vmatprep.mubr.bf16.mxu0 %v6713_v14 }
  0x9f   : > { %6479 = vmatmul.mubr.bf16.gmra.mxu0 %v6714_v15 }
  0xa0   : > { %6482 = vmatprep.mubr.bf16.mxu0 %v6715_v16 }
  0xa7   : > { %6483 = vmatmul.mubr.bf16.gmra.mxu0 %v6716_v17 }
  0xa8   : > { %6486 = vmatprep.mubr.bf16.mxu0 %v6717_v42 }
  0xaf   : > { %6487 = vmatmul.mubr.bf16.gmra.mxu0 %v6718_v45 }
  0xb0   : > { %6490 = vmatprep.mubr.bf16.mxu0 %v6719_v4 }
  0xb7   : > { %6491 = vmatmul.mubr.bf16.gmra.mxu0 %v6720_v22 }
 0x147   : > { %v6468_v55 = vpop.f32.mrf.mxu0 }
 0x148   : > { %v763_v56 = vadd.f32 %v6468_v55, %v7296_v54 }
 0x149   : > { %v754_v57 = vpop.f32.mrf.mxu0 }
 0x14a   : > { %v899_v58 = vmax.f32 %v763_v56, 0.0  ;;  %v755_v59 = vadd.f32 %v7296_v54, %v754_v57 }
 0x14b   : > { %v6469_v60 = vpop.f32.mrf.mxu0 }
 0x14c   : > { %v6137_v61 = vpack.c.bf16 %v899_v58, %v899_v58  ;;  %v897_v62 = vmax.f32 %v755_v59, 0.0  ;;  %v766_v63 = vadd.f32 %v6469_v60, %v7296_v54  ;;  %v1540_v59 = vld [vmem:[#allocation2 + $0x24] sm:$0xf] }
 0x14d   : > { %v757_v0 = vpop.f32.mrf.mxu0 }
 0x14e   : > { %v1174_v1 = vshrl.u32 %v6137_v61, 16  ;;  %v6135_v2 = vpack.c.bf16 %v897_v62, %v897_v62  ;;  %v900_v3 = vmax.f32 %v766_v63, 0.0  ;;  %v758_v5 = vadd.f32 %v7296_v54, %v757_v0 }
 0x14f   : > { %v6472_v6 = vpop.f32.mrf.mxu0  ;;  %v1177_v8 = vshll.u32 %v6137_v61, 16 }
 0x150   : > { %v1176_v7 = vrot.slane %v1174_v1, 7  ;;  %v1157_v9 = vshrl.u32 %v6135_v2, 16  ;;  %v6138_v10 = vpack.c.bf16 %v900_v3, %v900_v3  ;;  %v1160_v13 = vshll.u32 %v6135_v2, 16  ;;  %v1533_v2 = vld [vmem:[#allocation2 + $0x18] sm:$0xf] }
 0x151   : > { %v898_v14 = vmax.f32 %v758_v5, 0.0  ;;  %v779_v15 = vadd.f32 %v6472_v6, %v7296_v54  ;;  %v770_v16 = vpop.f32.mrf.mxu0 }
 0x152   : > { %v1179_v17 = vor.u32 %v1177_v8, %v1176_v7  ;;  %v1180_v19 = vrot.slane %v1176_v7, 4  ;;  %v1159_v20 = vrot.slane %v1157_v9, 7  ;;  %v1182_v21 = vshrl.u32 %v6138_v10, 16 }
 0x153   : > { %v1185_v25 = vshll.u32 %v6138_v10, 16  ;;  %v6136_v26 = vpack.c.bf16 %v898_v14, %v898_v14  ;;  %v903_v27 = vmax.f32 %v779_v15, 0.0  ;;  %v771_v28 = vadd.f32 %v7296_v54, %v770_v16  ;;  %v6473_v29 = vpop.f32.mrf.mxu0 }
 0x154   : > { %v1527_v30 = vsel %vm7305_vm7, %v1179_v17, %v1526_v12  ;;  %v1162_v31 = vor.u32 %v1160_v13, %v1159_v20  ;;  %v1163_v32 = vrot.slane %v1159_v20, 4  ;;  %v1184_v33 = vrot.slane %v1182_v21, 7  ;;  %v1544_v13 = vld [vmem:[#allocation2 + $0x2c] sm:$0x1] }
 0x155   : > { %1528 = vst [vmem:[#allocation2 + $0xc] sm:$0xf] %v1527_v30  ;;  %v1165_v36 = vshrl.u32 %v6136_v26, 16  ;;  %v1168_v37 = vshll.u32 %v6136_v26, 16  ;;  %v6141_v38 = vpack.c.bf16 %v903_v27, %v903_v27  ;;  %v901_v39 = vmax.f32 %v771_v28, 0.0  ;;  %v773_v40 = vpop.f32.mrf.mxu0 }
 0x156   : > { %v1519_v41 = vsel %vm7305_vm7, %v1162_v31, %v1518_v24  ;;  %v1187_v42 = vor.u32 %v1185_v25, %v1184_v33  ;;  %v1189_v43 = vrot.slane %v1184_v33, 4  ;;  %v782_v44 = vadd.f32 %v6473_v29, %v7296_v54  ;;  %v1537_v26 = vld [vmem:[#allocation2 + $0x20] sm:$0x1] }
 0x157   : > { %1520 = vst [vmem:[#allocation2] sm:$0xf] %v1519_v41  ;;  %v1167_v45 = vrot.slane %v1165_v36, 7  ;;  %v1208_v46 = vshrl.u32 %v6141_v38, 16  ;;  %v1211_v47 = vshll.u32 %v6141_v38, 16  ;;  %v6139_v48 = vpack.c.bf16 %v901_v39, %v901_v39  ;;  %v6476_v8 = vpop.f32.mrf.mxu0 }
 0x158   : > { %v1188_v49 = vsel %vm7316_vm8, %v1180_v19, %v1187_v42  ;;  %v1531_v50 = vsel %vm7250_vm2, %v1189_v43, %v1530_v35  ;;  %v904_v52 = vmax.f32 %v782_v44, 0.0  ;;  %v774_v53 = vadd.f32 %v7296_v54, %v773_v40 }
 0x159   : > { %1529 = vst.msk [vmem:[#allocation2 + $0x10] sm:$0xf] %vm1516_vm5, %v1188_v49  ;;  %1532 = vst [vmem:[#allocation2 + $0x14] sm:$0x1] %v1531_v50  ;;  %v1170_v55 = vor.u32 %v1168_v37, %v1167_v45  ;;  %v1172_v56 = vrot.slane %v1167_v45, 4  ;;  %v1210_v57 = vrot.slane %v1208_v46, 7  ;;  %v7340_v21 = vadd.f32 %v6476_v8, %v7296_v54  ;;  %v786_v36 = vpop.f32.mrf.mxu0 }
 0x15a   : > { %v1191_v58 = vshrl.u32 %v6139_v48, 16  ;;  %v1194_v60 = vshll.u32 %v6139_v48, 16  ;;  %v6142_v61 = vpack.c.bf16 %v904_v52, %v904_v52  ;;  %v902_v62 = vmax.f32 %v774_v53, 0.0 }
 0x15b   : > { %v1171_v63 = vsel %vm7316_vm8, %v1163_v32, %v1170_v55  ;;  %v1524_v0 = vsel %vm7250_vm2, %v1172_v56, %v1523_v51  ;;  %v1213_v1 = vor.u32 %v1211_v47, %v1210_v57  ;;  %v9333_v9 = vmov 0  }
 0x15c   : > { %1522 = vst.msk [vmem:[#allocation2 + $0x4] sm:$0xf] %vm1516_vm5, %v1171_v63  ;;  %1525 = vst [vmem:[#allocation2 + $0x8] sm:$0x1] %v1524_v0  ;;  %v1193_v3 = vrot.slane %v1191_v58, 7  ;;  %v1216_v4 = vshrl.u32 %v6142_v61, 16  ;;  %v6140_v6 = vpack.c.bf16 %v902_v62, %v902_v62  ;;  %v6477_v58 = vpop.f32.mrf.mxu0  ;;  %v787_v63 = vadd.f32 %v7296_v54, %v786_v36 }
 0x15d   : > { %v1219_v5 = vshll.u32 %v6142_v61, 16  ;;  %v2633_v7 = vld [vmem:[#allocation2 + $0xc] sm:$0xf]  ;;  %1652 = vst.msk [vmem:[#allocation2 + $0x4] sm:$0xf] %vm1516_vm5, %v9333_v9  ;;  %v1214_v10 = vrot.slane %v1210_v57, 4  ;;  %v1541_v12 = vsel %vm7305_vm7, %v1213_v1, %v1540_v59 }
 0x15e   : > { %2697 = vrot.lane.b32.xlu0 %v2633_v7, %s6964_s30  ;;  %v1731_v14 = vld [vmem:[#allocation2 + $0xc] sm:$0xf]  ;;  %v1649_v15 = vld [vmem:[#allocation2] sm:$0xf]  ;;  %1542 = vst [vmem:[#allocation2 + $0x24] sm:$0xf] %v1541_v12  ;;  %v1196_v16 = vor.u32 %v1194_v60, %v1193_v3 }
 0x15f   : > { %v1218_v17 = vrot.slane %v1216_v4, 7  ;;  %v1199_v19 = vshrl.u32 %v6140_v6, 16  ;;  %v2295_v20 = vld [vmem:[#allocation2 + $0xc] sm:$0xe]  ;;  %v1650_v22 = vsel %vm7305_vm7, 0, %v1649_v15  ;;  %v1197_v24 = vrot.slane %v1193_v3, 4 }
 0x160   : > { %v1202_v25 = vshll.u32 %v6140_v6, 16  ;;  %v1804_v27 = vshrl.u32 %v1731_v14, 16  ;;  %1651 = vst [vmem:[#allocation2] sm:$0xf] %v1650_v22  ;;  %v1534_v28 = vsel %vm7305_vm7, %v1196_v16, %v1533_v2  ;;  %v2634_v32 = vld [vmem:[#allocation2 + $0x10] sm:$0xf]  ;;  %v798_v2 = vadd.f32 %v6477_v58, %v7296_v54 }
 0x161   : > { %v1221_v29 = vor.u32 %v1219_v5, %v1218_v17  ;;  %v1223_v30 = vrot.slane %v1218_v17, 4  ;;  %v1201_v31 = vrot.slane %v1199_v19, 7  ;;  %v2296_v33 = vld [vmem:[#allocation2 + $0x10] sm:$0xf]  ;;  %1535 = vst [vmem:[#allocation2 + $0x18] sm:$0xf] %v1534_v28  ;;  %2699 = vrot.lane.b32.xlu1 %v2634_v32, %s6964_s30 }
 0x162   : > { %v6000_v37 = vrot.slane %v2295_v20, 9  ;;  %v2400_v38 = vrot.slane %v2296_v33, 5  ;;  %v7353_v39 = vld [vmem:[#allocation2 + $0x10] sm:$0xf]  ;;  %v1806_v40 = vrot.slane %v1804_v27, 4  ;;  %v1807_v41 = vshll.u32 %v1731_v14, 16  ;;  %v789_v14 = vpop.f32.mrf.mxu0 }
 0x163   : > { %v1222_v42 = vsel %vm7316_vm8, %v1214_v10, %v1221_v29  ;;  %v1545_v43 = vsel %vm7250_vm2, %v1223_v30, %v1544_v13  ;;  %v1204_v44 = vor.u32 %v1202_v25, %v1201_v31  ;;  %v1206_v45 = vrot.slane %v1201_v31, 4  ;;  %v3387_v46 = vld [vmem:[#allocation2 + $0xc] sm:$0xe]  ;;  %v3388_v47 = vld [vmem:[#allocation2 + $0x10] sm:$0xf] }
 0x164   : > { %v1653_v48 = vld [vmem:[#allocation2 + $0x8] sm:$0x1]  ;;  %1543 = vst.msk [vmem:[#allocation2 + $0x28] sm:$0xf] %vm1516_vm5, %v1222_v42  ;;  %1546 = vst [vmem:[#allocation2 + $0x2c] sm:$0x1] %v1545_v43  ;;  %v2401_v49 = vsel %vm7348_vm12, %v6000_v37, %v2400_v38  ;;  %v790_v29 = vadd.f32 %v7296_v54, %v789_v14 }
 0x165   : > { %v1809_v50 = vrot.slane %v1807_v41, 5  ;;  %v1813_v51 = vshll.u32 %v7353_v39, 16  ;;  %v1654_v52 = vsel %vm7250_vm2, 0, %v1653_v48  ;;  %v1205_v53 = vsel %vm7316_vm8, %v1197_v24, %v1204_v44  ;;  %2507 = vrot.lane.b32.xlu0 %v2401_v49, %s6965_s11  ;;  %v2826_v57 = vld [vmem:[#allocation2 + $0xc] sm:$0xf]  ;;  %v6750_v0 = vld [vmem:[%s9317_s7 + $0x10] sm:$0xff]  }
 0x166   : > { %v1538_v55 = vsel %vm7250_vm2, %v1206_v45, %v1537_v26  ;;  %v3485_v56 = vrot.slane %v3388_v47, 5  ;;  %1655 = vst [vmem:[#allocation2 + $0x8] sm:$0x1] %v1654_v52  ;;  %1536 = vst.msk [vmem:[#allocation2 + $0x1c] sm:$0xf] %vm1516_vm5, %v1205_v53  ;;  %v6015_v61 = vrot.slane %v3387_v46, 9 }
 0x167   : > { %1539 = vst [vmem:[#allocation2 + $0x20] sm:$0x1] %v1538_v55  ;;  %v1810_v59 = vor.u32 %v1809_v50, %v1806_v40  ;;  %v7371_v60 = vrot.slane %v1813_v51, 5  ;;  %v2297_v62 = vld [vmem:[#allocation2 + $0x14] sm:$0x1]  ;;  %v907_v1 = vmax.f32 %v7340_v21, 0.0 }
 0x168   : > { %v3486_v4 = vsel %vm7348_vm12, %v6015_v61, %v3485_v56  ;;  %v2875_v5 = vshrl.u32 %v2826_v57, 16  ;;  %v2878_v6 = vshll.u32 %v2826_v57, 16  ;;  %v2402_v7 = vrot.slane %v2400_v38, 4  ;;  %v3389_v10 = vld [vmem:[#allocation2 + $0x14] sm:$0x1] }
 0x169   : > { %v1811_v3 = vrot.slane %v1810_v59, 4  ;;  %3595 = vrot.lane.b32.xlu0 %v3486_v4, %s6966_s26  ;;  %v2403_v8 = vrot.slane %v2297_v62, 5  ;;  %v6145_v12 = vpack.c.bf16 %v907_v1, %v907_v1  ;;  %v7385_v13 = vld [vmem:[#allocation2 + $0x10] sm:$0xf]  ;;  %v3727_v16 = vld [vmem:[#allocation2 + $0x24] sm:$0xf] }
 0x16a   : > { %v2877_v17 = vrot.slane %v2875_v5, 4  ;;  %v2880_v19 = vrot.slane %v2878_v6, 5  ;;  %v905_v20 = vmax.f32 %v787_v63, 0.0  ;;  %v3487_v21 = vrot.slane %v3485_v56, 4  ;;  %v1554_v37 = vld [vmem:[#allocation2 + $0x3c] sm:$0xf] }
 0x16b   : > { %v1816_v15 = vsel %vm7376_vm14, %v1811_v3, %v7371_v60  ;;  %v1242_v22 = vshrl.u32 %v6145_v12, 16  ;;  %v1245_v24 = vshll.u32 %v6145_v12, 16  ;;  %v908_v25 = vmax.f32 %v798_v2, 0.0  ;;  %v2637_v45 = vld [vmem:[#allocation2 + $0x24] sm:$0xf] }
 0x16c   : > { %2167 = vrot.lane.b32.xlu1 %v1816_v15, %s6967_s19  ;;  %v2881_v26 = vor.u32 %v2880_v19, %v2877_v17  ;;  %v2884_v27 = vshll.u32 %v7385_v13, 16  ;;  %v6143_v28 = vpack.c.bf16 %v905_v20, %v905_v20  ;;  %v1817_v30 = vshrl.u32 %v7353_v39, 16  ;;  %v1547_v53 = vld [vmem:[#allocation2 + $0x30] sm:$0xf]  ;;  %v1558_v57 = vld [vmem:[#allocation2 + $0x44] sm:$0x1] }
 0x16d   : > { %3793 = vrot.lane.b32.xlu0 %v3727_v16, %s6968_s28  ;;  %v3488_v31 = vrot.slane %v3389_v10, 5  ;;  %v1244_v32 = vrot.slane %v1242_v22, 7  ;;  %v6146_v33 = vpack.c.bf16 %v908_v25, %v908_v25  ;;  %v2404_v36 = vsel %vm7348_vm12, %v2402_v7, %v2403_v8  ;;  %v1551_v7 = vld [vmem:[#allocation2 + $0x38] sm:$0x1]  ;;  %v1733_v8 = vld [vmem:[#allocation2 + $0x14] sm:$0x1] }
 0x16e   : > { %v1225_v38 = vshrl.u32 %v6143_v28, 16  ;;  %v1228_v40 = vshll.u32 %v6143_v28, 16  ;;  %v906_v41 = vmax.f32 %v790_v29, 0.0  ;;  %v2882_v46 = vrot.slane %v2881_v26, 4  ;;  %v3728_v10 = vld [vmem:[#allocation2 + $0x28] sm:$0xf] }
 0x16f   : > { %v3489_v42 = vsel %vm7348_vm12, %v3487_v21, %v3488_v31  ;;  %v1247_v43 = vor.u32 %v1245_v24, %v1244_v32  ;;  %v1250_v39 = vshrl.u32 %v6146_v33, 16  ;;  %v1253_v44 = vshll.u32 %v6146_v33, 16  ;;  %v2635_v19 = vld [vmem:[#allocation2 + $0x18] sm:$0xf]  ;;  %v2828_v21 = vld [vmem:[#allocation2 + $0x14] sm:$0x1] }
 0x170   : > { %2509 = vrot.lane.b32.xlu1 %v2404_v36, %s6965_s11  ;;  %v2886_v47 = vrot.slane %v2884_v27, 5  ;;  %v1227_v48 = vrot.slane %v1225_v38, 7  ;;  %v6144_v49 = vpack.c.bf16 %v906_v41, %v906_v41  ;;  %v1248_v50 = vrot.slane %v1244_v32, 4  ;;  %v2292_v22 = vld [vmem:[#allocation2] sm:$0xe] }
 0x171   : > { %2705 = vrot.lane.b32.xlu0 %v2637_v45, %s6964_s30  ;;  %v1555_v51 = vsel %vm7305_vm7, %v1247_v43, %v1554_v37  ;;  %v2888_v52 = vshrl.u32 %v7385_v13, 16  ;;  %v1252_v55 = vrot.slane %v1250_v39, 7  ;;  %v1819_v61 = vrot.slane %v1817_v30, 4  ;;  %v2293_v24 = vld [vmem:[#allocation2 + $0x4] sm:$0xf] }
 0x172   : > { %1556 = vst [vmem:[#allocation2 + $0x3c] sm:$0xf] %v1555_v51  ;;  %v1230_v56 = vor.u32 %v1228_v40, %v1227_v48  ;;  %v1233_v58 = vshrl.u32 %v6144_v49, 16  ;;  %v1236_v59 = vshll.u32 %v6144_v49, 16  ;;  %v2887_v1 = vsel %vm7376_vm14, %v2882_v46, %v2886_v47  ;;  %v3725_v28 = vld [vmem:[#allocation2 + $0x18] sm:$0xf] }
 0x173   : > { %v1255_v62 = vor.u32 %v1253_v44, %v1252_v55  ;;  %v1257_v63 = vrot.slane %v1252_v55, 4  ;;  %v1231_v2 = vrot.slane %v1227_v48, 4  ;;  %v1820_v14 = vor.u32 %v1819_v61, %v7371_v60  ;;  %v2638_v60 = vld [vmem:[#allocation2 + $0x28] sm:$0xf]  ;;  %v4482_v32 = vld [vmem:[#allocation2 + $0x24] sm:$0xe] }
 0x174   : > { %3597 = vrot.lane.b32.xlu1 %v3489_v42, %s6966_s26  ;;  %v1548_v3 = vsel %vm7305_vm7, %v1230_v56, %v1547_v53  ;;  %v1235_v4 = vrot.slane %v1233_v58, 7  ;;  %v2890_v15 = vrot.slane %v2888_v52, 4  ;;  %v1823_v20 = vshll.u32 %v1733_v8, 16  ;;  %v4483_v33 = vld [vmem:[#allocation2 + $0x28] sm:$0xf] }
 0x175   : > { %3258 = vrot.lane.b32.xlu0 %v2887_v1, %s6969_s14  ;;  %1549 = vst [vmem:[#allocation2 + $0x30] sm:$0xf] %v1548_v3  ;;  %v1256_v5 = vsel %vm7316_vm8, %v1248_v50, %v1255_v62  ;;  %v1559_v6 = vsel %vm7250_vm2, %v1257_v63, %v1558_v57  ;;  %v1821_v25 = vrot.slane %v1820_v14, 4  ;;  %v2894_v29 = vshll.u32 %v2828_v21, 16  ;;  %v2301_v38 = vld [vmem:[#allocation2 + $0x24] sm:$0xe] }
 0x176   : > { %1557 = vst.msk [vmem:[#allocation2 + $0x40] sm:$0xf] %vm1516_vm5, %v1256_v5  ;;  %1560 = vst [vmem:[#allocation2 + $0x44] sm:$0x1] %v1559_v6  ;;  %v1238_v12 = vor.u32 %v1236_v59, %v1235_v4  ;;  %v1240_v13 = vrot.slane %v1235_v4, 4  ;;  %v2891_v26 = vor.u32 %v2890_v15, %v2886_v47  ;;  %v1825_v27 = vrot.slane %v1823_v20, 5  ;;  %v6480_v47 = vpop.f32.mrf.mxu0 }
 0x177   : > { %v5999_v30 = vrot.slane %v2292_v22, 9  ;;  %v2393_v31 = vrot.slane %v2293_v24, 5  ;;  %v2896_v40 = vrot.slane %v2894_v29, 5  ;;  %v6032_v42 = vrot.slane %v4482_v32, 9  ;;  %v2302_v39 = vld [vmem:[#allocation2 + $0x28] sm:$0xf] }
 0x178   : > { %3795 = vrot.lane.b32.xlu1 %v3728_v10, %s6968_s28  ;;  %v1239_v16 = vsel %vm7316_vm8, %v1231_v2, %v1238_v12  ;;  %v1552_v17 = vsel %vm7250_vm2, %v1240_v13, %v1551_v7  ;;  %v1826_v36 = vsel %vm7376_vm14, %v1821_v25, %v1825_v27  ;;  %v2892_v37 = vrot.slane %v2891_v26, 4  ;;  %v3393_v49 = vld [vmem:[#allocation2 + $0x24] sm:$0xe]  ;;  %v3394_v50 = vld [vmem:[#allocation2 + $0x28] sm:$0xf]  ;;  %v802_v57 = vpop.f32.mrf.mxu0 }
 0x179   : > { %1550 = vst.msk [vmem:[#allocation2 + $0x34] sm:$0xf] %vm1516_vm5, %v1239_v16  ;;  %1553 = vst [vmem:[#allocation2 + $0x38] sm:$0x1] %v1552_v17  ;;  %2701 = vrot.lane.b32.xlu0 %v2635_v19, %s6964_s30  ;;  %v2394_v41 = vsel %vm7348_vm12, %v5999_v30, %v2393_v31  ;;  %v4584_v43 = vrot.slane %v4483_v33, 5  ;;  %v6002_v45 = vrot.slane %v2301_v38, 9  ;;  %v803_v29 = vadd.f32 %v7296_v54, %v802_v57 }
 0x17a   : > { %v2897_v44 = vsel %vm7376_vm14, %v2892_v37, %v2896_v40  ;;  %v2414_v46 = vrot.slane %v2302_v39, 5  ;;  %v3921_v51 = vld [vmem:[#allocation2 + $0x24] sm:$0xf]  ;;  %v2636_v52 = vld [vmem:[#allocation2 + $0x1c] sm:$0xf]  ;;  %v6017_v58 = vrot.slane %v3393_v49, 9  ;;  %v6481_v13 = vpop.f32.mrf.mxu0 }
 0x17b   : > { %v4585_v48 = vsel %vm7348_vm12, %v6032_v42, %v4584_v43  ;;  %v4484_v55 = vld [vmem:[#allocation2 + $0x2c] sm:$0x1]  ;;  %v3499_v59 = vrot.slane %v3394_v50, 5  ;;  %v2294_v61 = vld [vmem:[#allocation2 + $0x8] sm:$0x1]  ;;  %v3991_v62 = vshrl.u32 %v3921_v51, 16  ;;  %v814_v42 = vadd.f32 %v6481_v13, %v7296_v54 }
 0x17c   : > { %2707 = vrot.lane.b32.xlu1 %v2638_v60, %s6964_s30  ;;  %v2415_v53 = vsel %vm7348_vm12, %v6002_v45, %v2414_v46  ;;  %v2303_v56 = vld [vmem:[#allocation2 + $0x2c] sm:$0x1]  ;;  %v3994_v63 = vshll.u32 %v3921_v51, 16  ;;  %v3391_v1 = vld [vmem:[#allocation2 + $0x1c] sm:$0xf]  ;;  %v4586_v3 = vrot.slane %v4584_v43, 4  ;;  %v805_v30 = vpop.f32.mrf.mxu0 }
 0x17d   : > { %3789 = vrot.lane.b32.xlu0 %v3725_v28, %s6968_s28  ;;  %v3726_v2 = vld [vmem:[#allocation2 + $0x1c] sm:$0xf]  ;;  %v4587_v4 = vrot.slane %v4484_v55, 5  ;;  %v3395_v5 = vld [vmem:[#allocation2 + $0x2c] sm:$0x1]  ;;  %v2416_v6 = vrot.slane %v2414_v46, 4  ;;  %v3500_v14 = vsel %vm7348_vm12, %v6017_v58, %v3499_v59  ;;  %v811_v28 = vadd.f32 %v6480_v47, %v7296_v54 }
 0x17e   : > { %v2417_v7 = vrot.slane %v2303_v56, 5  ;;  %v2395_v8 = vrot.slane %v2393_v31, 4  ;;  %v2396_v10 = vrot.slane %v2294_v61, 5  ;;  %v3390_v12 = vld [vmem:[#allocation2 + $0x18] sm:$0xe]  ;;  %v3492_v15 = vrot.slane %v3391_v1, 5 }
 0x17f   : > { %v3993_v16 = vrot.slane %v3991_v62, 4  ;;  %v3996_v17 = vrot.slane %v3994_v63, 5  ;;  %v3501_v19 = vrot.slane %v3499_v59, 4  ;;  %v3502_v20 = vrot.slane %v3395_v5, 5  ;;  %v3392_v21 = vld [vmem:[#allocation2 + $0x20] sm:$0x1] }
 0x180   : > { %2169 = vrot.lane.b32.xlu1 %v1826_v36, %s6967_s19  ;;  %v4588_v22 = vsel %vm7348_vm12, %v4586_v3, %v4587_v4  ;;  %v3731_v24 = vld [vmem:[#allocation2 + $0x3c] sm:$0xf]  ;;  %v6016_v60 = vrot.slane %v3390_v12, 9  ;;  %v2418_v25 = vsel %vm7348_vm12, %v2416_v6, %v2417_v7  ;;  %v7450_v26 = vld [vmem:[#allocation2 + $0x28] sm:$0xf]  ;;  %v7456_v31 = vsel %vm7348_vm12, %v2395_v8, %v2396_v10  ;;  %v6721_v43 = vld [vmem:[%s7198_s21 + $0x68] sm:$0xff]  }
 0x181   : > { %2503 = vrot.lane.b32.xlu0 %v2394_v41, %s6965_s11  ;;  %v1737_v27 = vld [vmem:[#allocation2 + $0x24] sm:$0xf]  ;;  %v3494_v32 = vrot.slane %v3492_v15, 4  ;;  %v3495_v33 = vrot.slane %v3392_v21, 5  ;;  %v3997_v36 = vor.u32 %v3996_v17, %v3993_v16  ;;  %v3503_v37 = vsel %vm7348_vm12, %v3501_v19, %v3502_v20  ;;  %v7461_v38 = vld [vmem:[#allocation2 + $0x1c] sm:$0xf]  ;;  %6494 = vmatprep.mubr.bf16.mxu0 %v6721_v43 }
 0x182   : > { %v911_v40 = vmax.f32 %v811_v28, 0.0  ;;  %v909_v41 = vmax.f32 %v803_v29, 0.0  ;;  %v3493_v39 = vsel %vm7348_vm12, %v6016_v60, %v3492_v15  ;;  %v1852_v45 = vshrl.u32 %v1737_v27, 16  ;;  %v7470_v47 = vld [vmem:[#allocation2 + $0x18] sm:$0xe]  ;;  %v6722_v17 = vld [vmem:[%s7198_s21 + $0x70] sm:$0xff]  }
 0x183   : > { %v806_v46 = vadd.f32 %v7296_v54, %v805_v30  ;;  %v912_v51 = vmax.f32 %v814_v42, 0.0  ;;  %v3998_v55 = vrot.slane %v3997_v36, 4  ;;  %v4577_v56 = vrot.slane %v7461_v38, 5  ;;  %v7481_v1 = vld [vmem:[#allocation2 + $0x24] sm:$0xf]  ;;  %6495 = vmatmul.mubr.bf16.gmra.mxu0 %v6722_v17 }
 0x184   : > { %3260 = vrot.lane.b32.xlu1 %v2897_v44, %s6969_s14  ;;  %v4000_v44 = vshll.u32 %v7450_v26, 16  ;;  %v6149_v49 = vpack.c.bf16 %v911_v40, %v911_v40  ;;  %v6147_v50 = vpack.c.bf16 %v909_v41, %v909_v41  ;;  %v6031_v63 = vrot.slane %v7470_v47, 9  ;;  %v1561_v10 = vld [vmem:[#allocation2 + $0x48] sm:$0xf]  ;;  %v4481_v13 = vld [vmem:[#allocation2 + $0x20] sm:$0x1] }
 0x185   : > { %4691 = vrot.lane.b32.xlu0 %v4585_v48, %s6970_s25  ;;  %v1855_v48 = vshll.u32 %v1737_v27, 16  ;;  %v910_v57 = vmax.f32 %v806_v46, 0.0  ;;  %v6150_v3 = vpack.c.bf16 %v912_v51, %v912_v51  ;;  %v1854_v5 = vrot.slane %v1852_v45, 4  ;;  %v7489_v19 = vld [vmem:[#allocation2 + $0x1c] sm:$0xf] }
 0x186   : > { %v1276_v54 = vshrl.u32 %v6149_v49, 16  ;;  %v1279_v58 = vshll.u32 %v6149_v49, 16  ;;  %v1259_v59 = vshrl.u32 %v6147_v50, 16  ;;  %v1262_v61 = vshll.u32 %v6147_v50, 16  ;;  %v1666_v60 = vld [vmem:[#allocation2 + $0xc] sm:$0xf] }
 0x187   : > { %v7478_v62 = vrot.slane %v4000_v44, 5  ;;  %v6148_v4 = vpack.c.bf16 %v910_v57, %v910_v57  ;;  %v1857_v6 = vrot.slane %v1855_v48, 5  ;;  %v1287_v15 = vshll.u32 %v6150_v3, 16  ;;  %1698 = vst.msk [vmem:[#allocation3 + $0x8] sm:$0xf] %vm1516_vm5, %v1666_v60 }
 0x188   : > { %2703 = vrot.lane.b32.xlu1 %v2636_v52, %s6964_s30  ;;  %v2641_v52 = vld [vmem:[#allocation2 + $0x3c] sm:$0xf]  ;;  %v1278_v7 = vrot.slane %v1276_v54, 7  ;;  %v1261_v8 = vrot.slane %v1259_v59, 7  ;;  %v2923_v20 = vshrl.u32 %v7481_v1, 16  ;;  %v4580_v45 = vrot.slane %v4481_v13, 5 }
 0x189   : > { %2515 = vrot.lane.b32.xlu0 %v2415_v53, %s6965_s11  ;;  %v7474_v53 = vsel %vm7348_vm12, %v3494_v32, %v3495_v33  ;;  %v4003_v12 = vsel %vm7376_vm14, %v3998_v55, %v7478_v62  ;;  %v1267_v16 = vshrl.u32 %v6148_v4, 16  ;;  %v1270_v30 = vshll.u32 %v6148_v4, 16  ;;  %v1572_v40 = vld [vmem:[#allocation2 + $0x5c] sm:$0x1]  ;;  %v1565_v41 = vld [vmem:[#allocation2 + $0x50] sm:$0x1] }
 0x18a   : > { %v1281_v21 = vor.u32 %v1279_v58, %v1278_v7  ;;  %v1265_v27 = vrot.slane %v1261_v8, 4  ;;  %v1858_v32 = vor.u32 %v1857_v6, %v1854_v5  ;;  %v2926_v33 = vshll.u32 %v7481_v1, 16  ;;  %v1667_v55 = vld [vmem:[#allocation2 + $0x10] sm:$0xf]  ;;  %v2298_v58 = vld [vmem:[#allocation2 + $0x18] sm:$0xe] }
 0x18b   : > { %v1269_v29 = vrot.slane %v1267_v16, 7  ;;  %v2407_v46 = vrot.slane %v7489_v19, 5  ;;  %v4578_v57 = vsel %vm7348_vm12, %v6031_v63, %v4577_v56  ;;  %v2925_v59 = vrot.slane %v2923_v20, 4  ;;  %1699 = vst.msk [vmem:[#allocation3 + $0xc] sm:$0xf] %vm1516_vm5, %v1667_v55  ;;  %v6484_v55 = vpop.f32.mrf.mxu0 }
 0x18c   : > { %3791 = vrot.lane.b32.xlu1 %v3726_v2, %s6968_s28  ;;  %v1568_v2 = vld [vmem:[#allocation2 + $0x54] sm:$0xf]  ;;  %v1859_v54 = vrot.slane %v1858_v32, 4  ;;  %v6001_v38 = vrot.slane %v2298_v58, 9  ;;  %v3923_v6 = vld [vmem:[#allocation2 + $0x2c] sm:$0x1] }
 0x18d   : > { %3603 = vrot.lane.b32.xlu0 %v3500_v14, %s6966_s26  ;;  %v1284_v14 = vshrl.u32 %v6150_v3, 16  ;;  %v1569_v36 = vsel %vm7305_vm7, %v1281_v21, %v1568_v2  ;;  %v1274_v44 = vrot.slane %v1269_v29, 4  ;;  %v2409_v2 = vrot.slane %v2407_v46, 4  ;;  %v3918_v13 = vld [vmem:[#allocation2 + $0x18] sm:$0xf] }
 0x18e   : > { %1570 = vst [vmem:[#allocation2 + $0x54] sm:$0xf] %v1569_v36  ;;  %v4010_v19 = vshll.u32 %v3923_v6, 16  ;;  %v1739_v20 = vld [vmem:[#allocation2 + $0x2c] sm:$0x1]  ;;  %v3970_v60 = vshll.u32 %v3918_v13, 16  ;;  %v818_v6 = vpop.f32.mrf.mxu0 }
 0x18f   : > { %v1286_v28 = vrot.slane %v1284_v14, 7  ;;  %v1566_v51 = vsel %vm7250_vm2, %v1274_v44, %v1565_v41  ;;  %v1734_v14 = vld [vmem:[#allocation2 + $0x18] sm:$0xf]  ;;  %v2639_v58 = vld [vmem:[#allocation2 + $0x30] sm:$0xf] }
 0x190   : > { %4693 = vrot.lane.b32.xlu1 %v4588_v22, %s6970_s25  ;;  %v1282_v22 = vrot.slane %v1278_v7, 4  ;;  %1567 = vst [vmem:[#allocation2 + $0x50] sm:$0x1] %v1566_v51  ;;  %v2829_v7 = vld [vmem:[#allocation2 + $0x18] sm:$0xf] }
 0x191   : > { %3801 = vrot.lane.b32.xlu0 %v3731_v24, %s6968_s28  ;;  %v1264_v24 = vor.u32 %v1262_v61, %v1261_v8  ;;  %v1289_v42 = vor.u32 %v1287_v15, %v1286_v28  ;;  %v1291_v43 = vrot.slane %v1286_v28, 4  ;;  %v2928_v61 = vrot.slane %v2926_v33, 5  ;;  %v3732_v28 = vld [vmem:[#allocation2 + $0x40] sm:$0xf] }
 0x192   : > { %v2408_v15 = vsel %vm7348_vm12, %v6001_v38, %v2407_v46  ;;  %v2899_v21 = vshrl.u32 %v2829_v7, 16  ;;  %v1871_v33 = vshll.u32 %v1739_v20, 16 }
 0x193   : > { %v1290_v48 = vsel %vm7316_vm8, %v1282_v22, %v1289_v42  ;;  %v1573_v49 = vsel %vm7250_vm2, %v1291_v43, %v1572_v40  ;;  %v2929_v5 = vor.u32 %v2928_v61, %v2925_v59  ;;  %v2902_v22 = vshll.u32 %v2829_v7, 16  ;;  %v2642_v40 = vld [vmem:[#allocation2 + $0x40] sm:$0xf]  ;;  %v2834_v43 = vld [vmem:[#allocation2 + $0x2c] sm:$0x1] }
 0x194   : > { %2517 = vrot.lane.b32.xlu1 %v2418_v25, %s6965_s11  ;;  %v7492_v25 = vld [vmem:[#allocation2 + $0x28] sm:$0xf]  ;;  %1571 = vst.msk [vmem:[#allocation2 + $0x58] sm:$0xf] %vm1516_vm5, %v1290_v48  ;;  %1574 = vst [vmem:[#allocation2 + $0x5c] sm:$0x1] %v1573_v49 }
 0x195   : > { %2713 = vrot.lane.b32.xlu0 %v2641_v52, %s6964_s30  ;;  %v1861_v47 = vshll.u32 %v7492_v25, 16  ;;  %v2300_v52 = vld [vmem:[#allocation2 + $0x20] sm:$0x1]  ;;  %v2930_v17 = vrot.slane %v2929_v5, 4  ;;  %v4012_v42 = vrot.slane %v4010_v19, 5  ;;  %v2904_v44 = vrot.slane %v2902_v22, 5 }
 0x196   : > { %v2410_v3 = vrot.slane %v2300_v52, 5  ;;  %v7550_v52 = vld [vmem:[#allocation2 + $0x1c] sm:$0xf]  ;;  %v2831_v5 = vld [vmem:[#allocation2 + $0x20] sm:$0x1] }
 0x197   : > { %v7528_v4 = vrot.slane %v1861_v47, 5  ;;  %v3729_v7 = vld [vmem:[#allocation2 + $0x30] sm:$0xf] }
 0x198   : > { %3605 = vrot.lane.b32.xlu1 %v3503_v37, %s6966_s26  ;;  %v1562_v37 = vsel %vm7305_vm7, %v1264_v24, %v1561_v10  ;;  %v2411_v8 = vsel %vm7348_vm12, %v2409_v2, %v2410_v3  ;;  %v3967_v24 = vshrl.u32 %v3918_v13, 16  ;;  %v1837_v3 = vshll.u32 %v7550_v52, 16 }
 0x199   : > { %3599 = vrot.lane.b32.xlu0 %v3493_v39, %s6966_s26  ;;  %1563 = vst [vmem:[#allocation2 + $0x48] sm:$0xf] %v1562_v37  ;;  %v1272_v39 = vor.u32 %v1270_v30, %v1269_v29  ;;  %v1864_v63 = vsel %vm7376_vm14, %v1859_v54, %v7528_v4  ;;  %v2830_v37 = vld [vmem:[#allocation2 + $0x1c] sm:$0xf]  ;;  %v2942_v54 = vshll.u32 %v2834_v43, 16  ;;  %v1841_v43 = vshrl.u32 %v7550_v52, 16 }
 0x19a   : > { %v2912_v51 = vshrl.u32 %v2830_v37, 16  ;;  %v7564_v20 = vrot.slane %v1837_v3, 5 }
 0x19b   : > { %v1273_v50 = vsel %vm7316_vm8, %v1265_v27, %v1272_v39  ;;  %v1831_v27 = vshll.u32 %v1734_v14, 16  ;;  %v2901_v39 = vrot.slane %v2899_v21, 4  ;;  %v2918_v21 = vshll.u32 %v2831_v5, 16 }
 0x19c   : > { %2505 = vrot.lane.b32.xlu1 %v7456_v31, %s6965_s11  ;;  %v4579_v31 = vrot.slane %v4577_v56, 4  ;;  %1564 = vst.msk [vmem:[#allocation2 + $0x4c] sm:$0xf] %vm1516_vm5, %v1273_v50  ;;  %v2833_v56 = vld [vmem:[#allocation2 + $0x28] sm:$0xf]  ;;  %v2908_v50 = vshll.u32 %v2830_v37, 16 }
 0x19d   : > { %4354 = vrot.lane.b32.xlu0 %v4003_v12, %s6971_s17  ;;  %v2932_v10 = vshll.u32 %v2833_v56, 16  ;;  %v2936_v16 = vshrl.u32 %v2833_v56, 16  ;;  %v1833_v47 = vrot.slane %v1831_v27, 5  ;;  %v2905_v59 = vor.u32 %v2904_v44, %v2901_v39  ;;  %v1730_v37 = vld [vmem:[#allocation2 + $0x8] sm:$0x1] }
 0x19e   : > { %v4581_v1 = vsel %vm7348_vm12, %v4579_v31, %v4580_v45  ;;  %v7547_v31 = vld [vmem:[#allocation2 + $0x1c] sm:$0xf]  ;;  %v3969_v45 = vrot.slane %v3967_v24, 4  ;;  %v7583_v39 = vrot.slane %v2918_v21, 5  ;;  %v978_v44 = vld [vmem:[#allocation2 + $0x60] sm:$0x1] }
 0x19f   : > { %v2934_v29 = vrot.slane %v2932_v10, 5  ;;  %v2938_v36 = vrot.slane %v2936_v16, 4  ;;  %v3976_v61 = vshll.u32 %v7547_v31, 16  ;;  %v2944_v10 = vrot.slane %v2942_v54, 5  ;;  %v1034_v54 = vld [vmem:[#allocation2 + $0x68] sm:$0x1] }
 0x1a0   : > { %3601 = vrot.lane.b32.xlu1 %v7474_v53, %s6966_s26  ;;  %v4004_v53 = vshrl.u32 %v7450_v26, 16  ;;  %v1865_v26 = vshrl.u32 %v7492_v25, 16  ;;  %v1828_v25 = vshrl.u32 %v1734_v14, 16  ;;  %v1729_v14 = vld [vmem:[#allocation2 + $0x4] sm:$0xf]  ;;  %v3980_v24 = vshrl.u32 %v7547_v31, 16 }
 0x1a1   : > { %4687 = vrot.lane.b32.xlu0 %v4578_v57, %s6970_s25  ;;  %v2935_v41 = vsel %vm7376_vm14, %v2930_v17, %v2934_v29  ;;  %v2939_v57 = vor.u32 %v2938_v36, %v2934_v29  ;;  %v7559_v13 = vrot.slane %v3976_v61, 5  ;;  %v1789_v27 = vshll.u32 %v1729_v14, 16  ;;  %v3920_v29 = vld [vmem:[#allocation2 + $0x20] sm:$0x1] }
 0x1a2   : > { %v4006_v12 = vrot.slane %v4004_v53, 4  ;;  %v1867_v32 = vrot.slane %v1865_v26, 4  ;;  %v1830_v46 = vrot.slane %v1828_v25, 4  ;;  %v1873_v53 = vrot.slane %v1871_v33, 5  ;;  %v6485_v25 = vpop.f32.mrf.mxu0 }
 0x1a3   : > { %v2914_v26 = vrot.slane %v2912_v51, 4  ;;  %v1799_v52 = vshll.u32 %v1730_v37, 16 }
 0x1a4   : > { %4689 = vrot.lane.b32.xlu1 %v4581_v1, %s6970_s25  ;;  %v4007_v30 = vor.u32 %v4006_v12, %v7478_v62  ;;  %v3972_v62 = vrot.slane %v3970_v60, 5  ;;  %v1868_v49 = vor.u32 %v1867_v32, %v7528_v4  ;;  %v1834_v2 = vor.u32 %v1833_v47, %v1830_v46  ;;  %v1728_v4 = vld [vmem:[#allocation2] sm:$0xf] }
 0x1a5   : > { %2175 = vrot.lane.b32.xlu0 %v1864_v63, %s6967_s19  ;;  %v2910_v63 = vrot.slane %v2908_v50, 5  ;;  %v2906_v12 = vrot.slane %v2905_v59, 4  ;;  %v1783_v16 = vshll.u32 %v1728_v4, 16  ;;  %v7592_v46 = vld [vmem:[%s9314_s4] ss:$0 sm:$0xff]  ;;  %v1791_v50 = vrot.slane %v1789_v27, 5 }
 0x1a6   : > { %v4008_v48 = vrot.slane %v4007_v30, 4  ;;  %v3973_v1 = vor.u32 %v3972_v62, %v3969_v45  ;;  %v1869_v56 = vrot.slane %v1868_v49, 4  ;;  %v7562_v19 = vrot.slane %v1834_v2, 4  ;;  %v821_v49 = vpop.f32.mrf.mxu0 }
 0x1a7   : > { %v2915_v60 = vor.u32 %v2914_v26, %v2910_v63  ;;  %v2911_v32 = vsel %vm7376_vm14, %v2906_v12, %v2910_v63  ;;  %v1785_v36 = vrot.slane %v1783_v16, 5  ;;  %v7587_v45 = vrot.slane %v3980_v24, 4  ;;  %v3730_v16 = vld [vmem:[#allocation2 + $0x34] sm:$0xf]  ;;  %v1671_v24 = vld [vmem:[#allocation2 + $0x28] sm:$0xf] }
 0x1a8   : > { %2513 = vrot.lane.b32.xlu1 %v2411_v8, %s6965_s11  ;;  %v4013_v38 = vsel %vm7376_vm14, %v4008_v48, %v4012_v42  ;;  %v2940_v8 = vrot.slane %v2939_v57, 4  ;;  %v3974_v17 = vrot.slane %v3973_v1, 4  ;;  %v1874_v22 = vsel %vm7376_vm14, %v1869_v56, %v1873_v53  ;;  %v1037_v48 = vld [vmem:[#allocation2 + $0x74] sm:$0x1]  ;;  %1703 = vst.msk [vmem:[#allocation3 + $0x1c] sm:$0xf] %vm1516_vm5, %v1671_v24 }
 0x1a9   : > { %2511 = vrot.lane.b32.xlu0 %v2408_v15, %s6965_s11  ;;  %v1780_v15 = vshrl.u32 %v1728_v4, 16  ;;  %v1840_v42 = vsel %vm7376_vm14, %v7562_v19, %v7564_v20  ;;  %v7585_v31 = vrot.slane %v2915_v60, 4  ;;  %v3986_v62 = vshll.u32 %v3920_v29, 16  ;;  %v1736_v60 = vld [vmem:[#allocation2 + $0x20] sm:$0x1]  ;;  %v6726_v24 = vld [vmem:[%s7198_s21 + $0x78] sm:$0xff]  }
 0x1aa   : > { %v2945_v30 = vsel %vm7376_vm14, %v2940_v8, %v2944_v10  ;;  %v827_v47 = vadd.f32 %v7592_v46, %v6484_v55  ;;  %v819_v61 = vadd.f32 %v7592_v46, %v818_v6  ;;  %v979_v53 = vsel %vm7250_vm2, 0, %v978_v44  ;;  %v1670_v55 = vld [vmem:[#allocation2 + $0x24] sm:$0xf]  ;;  %6498 = vmatprep.mubr.bf16.mxu0 %v6726_v24 }
 0x1ab   : > { %v1782_v33 = vrot.slane %v1780_v15, 4  ;;  %v7602_v1 = vrot.slane %v1841_v43, 4  ;;  %980 = vst [vmem:[#allocation2 + $0x60] sm:$0x1] %v979_v53  ;;  %v830_v2 = vadd.f32 %v7592_v46, %v6485_v25  ;;  %v1038_v3 = vsel %vm7259_vm4, 0, %v1037_v48 }
 0x1ac   : > { %3803 = vrot.lane.b32.xlu1 %v3732_v28, %s6968_s28  ;;  %v1793_v28 = vshrl.u32 %v1729_v14, 16  ;;  %v915_v59 = vmax.f32 %v827_v47, 0.0  ;;  %v822_v4 = vadd.f32 %v7592_v46, %v821_v49  ;;  %1702 = vst.msk [vmem:[#allocation3 + $0x18] sm:$0xf] %vm1516_vm5, %v1670_v55  ;;  %v3983_v56 = vor.u32 %v7587_v45, %v7559_v13  ;;  %1039 = vst [vmem:[#allocation2 + $0x74] sm:$0x1] %v1038_v3 }
 0x1ad   : > { %3266 = vrot.lane.b32.xlu0 %v2935_v41, %s6969_s14  ;;  %v3979_v41 = vsel %vm7376_vm14, %v3974_v17, %v7559_v13  ;;  %v913_v5 = vmax.f32 %v819_v61, 0.0  ;;  %v1035_v26 = vsel %vm7259_vm4, 0, %v1034_v54  ;;  %v2921_v6 = vsel %vm7376_vm14, %v7585_v31, %v7583_v39  ;;  %v4489_v43 = vld [vmem:[#allocation2 + $0x40] sm:$0xf]  ;;  %v2307_v3 = vld [vmem:[#allocation2 + $0x3c] sm:$0xe] }
 0x1ae   : > { %v1795_v51 = vrot.slane %v1793_v28, 4  ;;  %v6153_v63 = vpack.c.bf16 %v915_v59, %v915_v59  ;;  %v916_v8 = vmax.f32 %v830_v2, 0.0  ;;  %v914_v10 = vmax.f32 %v822_v4, 0.0  ;;  %1036 = vst [vmem:[#allocation2 + $0x68] sm:$0x1] %v1035_v26 }
 0x1af   : > { %v6151_v15 = vpack.c.bf16 %v913_v5, %v913_v5  ;;  %v3988_v17 = vrot.slane %v3986_v62, 5  ;;  %v1801_v19 = vrot.slane %v1799_v52, 5  ;;  %v1844_v25 = vor.u32 %v7602_v1, %v7564_v20  ;;  %v2308_v4 = vld [vmem:[#allocation2 + $0x40] sm:$0xf]  ;;  %v1668_v26 = vld [vmem:[#allocation2 + $0x18] sm:$0xf] }
 0x1b0   : > { %2715 = vrot.lane.b32.xlu1 %v2642_v40, %s6964_s30  ;;  %v981_v40 = vld [vmem:[#allocation2 + $0x6c] sm:$0x1]  ;;  %v1310_v14 = vshrl.u32 %v6153_v63, 16  ;;  %v1313_v13 = vshll.u32 %v6153_v63, 16  ;;  %v6154_v21 = vpack.c.bf16 %v916_v8, %v916_v8  ;;  %v3984_v44 = vrot.slane %v3983_v56, 4 }
 0x1b1   : > { %2709 = vrot.lane.b32.xlu0 %v2639_v58, %s6964_s30  ;;  %v982_v57 = vsel %vm7250_vm2, 0, %v981_v40  ;;  %v1786_v58 = vor.u32 %v1785_v36, %v1782_v33  ;;  %v1293_v28 = vshrl.u32 %v6151_v15, 16  ;;  %v1296_v29 = vshll.u32 %v6151_v15, 16  ;;  %1700 = vst.msk [vmem:[#allocation3 + $0x10] sm:$0xf] %vm1516_vm5, %v1668_v26 }
 0x1b2   : > { %983 = vst [vmem:[#allocation2 + $0x6c] sm:$0x1] %v982_v57  ;;  %v1312_v27 = vrot.slane %v1310_v14, 7  ;;  %v1321_v33 = vshll.u32 %v6154_v21, 16  ;;  %v1575_v45 = vld [vmem:[#allocation2 + $0x60] sm:$0xf] }
 0x1b3   : > { %v1787_v12 = vrot.slane %v1786_v58, 4  ;;  %v1295_v20 = vrot.slane %v1293_v28, 7  ;;  %v1847_v48 = vshll.u32 %v1736_v60, 16  ;;  %v1586_v57 = vld [vmem:[#allocation2 + $0x74] sm:$0x1]  ;;  %v4598_v1 = vrot.slane %v4489_v43, 5 }
 0x1b4   : > { %4356 = vrot.lane.b32.xlu1 %v4013_v38, %s6971_s17  ;;  %v2640_v38 = vld [vmem:[#allocation2 + $0x34] sm:$0xf]  ;;  %v1315_v39 = vor.u32 %v1313_v13, %v1312_v27  ;;  %v1316_v31 = vrot.slane %v1312_v27, 4  ;;  %v6004_v14 = vrot.slane %v2307_v3, 9  ;;  %v2428_v13 = vrot.slane %v2308_v4, 5 }
 0x1b5   : > { %3797 = vrot.lane.b32.xlu0 %v3729_v7, %s6968_s28  ;;  %v1796_v7 = vor.u32 %v1795_v51, %v1791_v50  ;;  %v1792_v40 = vsel %vm7376_vm14, %v1787_v12, %v1791_v50  ;;  %v1298_v51 = vor.u32 %v1296_v29, %v1295_v20  ;;  %v1299_v52 = vrot.slane %v1295_v20, 4  ;;  %v1579_v50 = vld [vmem:[#allocation2 + $0x68] sm:$0x1]  ;;  %v1664_v15 = vld [vmem:[#allocation2] sm:$0xf] }
 0x1b6   : > { %v1849_v8 = vrot.slane %v1847_v48, 5  ;;  %1696 = vst.msk [vmem:[#allocation3] sm:$0xf] %vm1516_vm5, %v1664_v15  ;;  %v2309_v60 = vld [vmem:[#allocation2 + $0x44] sm:$0x1]  ;;  %v6727_v29 = vld [vmem:[%s7210_s22] sm:$0xff]  }
 0x1b7   : > { %v1576_v2 = vsel %vm7305_vm7, %v1298_v51, %v1575_v45  ;;  %6499 = vmatmul.mubr.bf16.gmra.mxu0 %v6727_v29  ;;  %v3928_v45 = vld [vmem:[#allocation2 + $0x40] sm:$0xf] }
 0x1b8   : > { %2177 = vrot.lane.b32.xlu1 %v1874_v22, %s6967_s19  ;;  %v6152_v22 = vpack.c.bf16 %v914_v10, %v914_v10  ;;  %1577 = vst [vmem:[#allocation2 + $0x60] sm:$0xf] %v1576_v2  ;;  %v4490_v10 = vld [vmem:[#allocation2 + $0x44] sm:$0x1]  ;;  %v4487_v2 = vld [vmem:[#allocation2 + $0x38] sm:$0x1] }
 0x1b9   : > { %3262 = vrot.lane.b32.xlu0 %v2911_v32, %s6969_s14  ;;  %v1318_v32 = vshrl.u32 %v6154_v21, 16  ;;  %v4600_v21 = vrot.slane %v4598_v1, 4 }
 0x1ba   : > { %v1301_v36 = vshrl.u32 %v6152_v22, 16  ;;  %v1304_v37 = vshll.u32 %v6152_v22, 16  ;;  %v4601_v22 = vrot.slane %v4490_v10, 5 }
 0x1bb   : > { %v1320_v62 = vrot.slane %v1318_v32, 7 }
 0x1bc   : > { %3268 = vrot.lane.b32.xlu1 %v2945_v30, %s6969_s14  ;;  %v1582_v30 = vld [vmem:[#allocation2 + $0x6c] sm:$0xf]  ;;  %v1303_v47 = vrot.slane %v1301_v36, 7  ;;  %v4602_v32 = vsel %vm7348_vm12, %v4600_v21, %v4601_v22  ;;  %v2431_v36 = vrot.slane %v2309_v60, 5  ;;  %v4594_v22 = vrot.slane %v4487_v2, 5 }
 0x1bd   : > { %4350 = vrot.lane.b32.xlu0 %v3979_v41, %s6971_s17  ;;  %v1797_v41 = vrot.slane %v1796_v7, 4  ;;  %v1583_v49 = vsel %vm7305_vm7, %v1315_v39, %v1582_v30  ;;  %v1323_v54 = vor.u32 %v1321_v33, %v1320_v62  ;;  %v1325_v58 = vrot.slane %v1320_v62, 4  ;;  %v3927_v30 = vld [vmem:[#allocation2 + $0x3c] sm:$0xf]  ;;  %v3929_v60 = vld [vmem:[#allocation2 + $0x44] sm:$0x1] }
 0x1be   : > { %1584 = vst [vmem:[#allocation2 + $0x6c] sm:$0xf] %v1583_v49  ;;  %v1306_v59 = vor.u32 %v1304_v37, %v1303_v47  ;;  %v1308_v61 = vrot.slane %v1303_v47, 4  ;;  %v1845_v7 = vrot.slane %v1844_v25, 4  ;;  %v2429_v25 = vsel %vm7348_vm12, %v6004_v14, %v2428_v13  ;;  %v3735_v49 = vld [vmem:[#allocation2 + $0x54] sm:$0xf] }
 0x1bf   : > { %v1802_v53 = vsel %vm7376_vm14, %v1797_v41, %v1801_v19  ;;  %v1587_v56 = vsel %vm7250_vm2, %v1325_v58, %v1586_v57  ;;  %v2430_v33 = vrot.slane %v2428_v13, 4  ;;  %v7665_v41 = vld [vmem:[#allocation2 + $0x34] sm:$0xf]  ;;  %v4039_v39 = vshrl.u32 %v3927_v30, 16  ;;  %v1743_v58 = vld [vmem:[#allocation2 + $0x3c] sm:$0xf] }
 0x1c0   : > { %2711 = vrot.lane.b32.xlu1 %v2640_v38, %s6964_s30  ;;  %v1324_v38 = vsel %vm7316_vm8, %v1316_v31, %v1323_v54  ;;  %v1307_v63 = vsel %vm7316_vm8, %v1299_v52, %v1306_v59  ;;  %v1580_v5 = vsel %vm7250_vm2, %v1308_v61, %v1579_v50  ;;  %1588 = vst [vmem:[#allocation2 + $0x74] sm:$0x1] %v1587_v56  ;;  %v4042_v20 = vshll.u32 %v3927_v30, 16  ;;  %v7671_v31 = vld [vmem:[#allocation2 + $0x34] sm:$0xf] }
 0x1c1   : > { %2171 = vrot.lane.b32.xlu0 %v1840_v42, %s6967_s19  ;;  %v4488_v42 = vld [vmem:[#allocation2 + $0x3c] sm:$0xe]  ;;  %1585 = vst.msk [vmem:[#allocation2 + $0x70] sm:$0xf] %vm1516_vm5, %v1324_v38  ;;  %1578 = vst.msk [vmem:[#allocation2 + $0x64] sm:$0xf] %vm1516_vm5, %v1307_v63  ;;  %v1850_v19 = vsel %vm7376_vm14, %v1845_v7, %v1849_v8  ;;  %v2432_v62 = vsel %vm7348_vm12, %v2430_v33, %v2431_v36 }
 0x1c2   : > { %v6034_v55 = vrot.slane %v4488_v42, 9  ;;  %1581 = vst [vmem:[#allocation2 + $0x68] sm:$0x1] %v1580_v5  ;;  %v1665_v42 = vld [vmem:[#allocation2 + $0x4] sm:$0xf]  ;;  %v3506_v51 = vrot.slane %v7665_v41, 5 }
 0x1c3   : > { %1697 = vst.msk [vmem:[#allocation3 + $0x4] sm:$0xf] %vm1516_vm5, %v1665_v42  ;;  %v3398_v50 = vld [vmem:[#allocation2 + $0x38] sm:$0x1]  ;;  %v3396_v54 = vld [vmem:[#allocation2 + $0x30] sm:$0xe] }
 0x1c4   : > { %3799 = vrot.lane.b32.xlu1 %v3730_v16, %s6968_s28  ;;  %v4599_v12 = vsel %vm7348_vm12, %v6034_v55, %v4598_v1  ;;  %v3399_v16 = vld [vmem:[#allocation2 + $0x3c] sm:$0xe]  ;;  %v4041_v59 = vrot.slane %v4039_v39, 4  ;;  %v4044_v61 = vrot.slane %v4042_v20, 5  ;;  %v4052_v55 = vshrl.u32 %v3928_v45, 16 }
 0x1c5   : > { %2163 = vrot.lane.b32.xlu0 %v1792_v40, %s6967_s19  ;;  %v6019_v27 = vrot.slane %v3399_v16, 9  ;;  %v3401_v40 = vld [vmem:[#allocation2 + $0x44] sm:$0x1]  ;;  %v1744_v1 = vld [vmem:[#allocation2 + $0x40] sm:$0xf]  ;;  %v4591_v3 = vrot.slane %v7671_v31, 5 }
 0x1c6   : > { %v3516_v48 = vrot.slane %v3401_v40, 5  ;;  %v3508_v38 = vrot.slane %v3506_v51, 4  ;;  %v3509_v56 = vrot.slane %v3398_v50, 5  ;;  %v6018_v63 = vrot.slane %v3396_v54, 9  ;;  %v7684_v5 = vld [vmem:[#allocation2 + $0x34] sm:$0xf] }
 0x1c7   : > { %v1903_v7 = vshll.u32 %v1743_v58, 16  ;;  %v1909_v8 = vshll.u32 %v1744_v1, 16  ;;  %v1913_v10 = vshrl.u32 %v1744_v1, 16  ;;  %v2645_v14 = vld [vmem:[#allocation2 + $0x54] sm:$0xf]  ;;  %v4045_v13 = vor.u32 %v4044_v61, %v4041_v59 }
 0x1c8   : > { %3264 = vrot.lane.b32.xlu1 %v2921_v6, %s6969_s14  ;;  %v3989_v6 = vsel %vm7376_vm14, %v3984_v44, %v3988_v17  ;;  %v3400_v17 = vld [vmem:[#allocation2 + $0x40] sm:$0xf]  ;;  %v1669_v44 = vld [vmem:[#allocation2 + $0x1c] sm:$0xf]  ;;  %v4054_v16 = vrot.slane %v4052_v55, 4  ;;  %v4593_v21 = vrot.slane %v4591_v3, 4 }
 0x1c9   : > { %2165 = vrot.lane.b32.xlu0 %v1802_v53, %s6967_s19  ;;  %v3513_v28 = vrot.slane %v3400_v17, 5  ;;  %1701 = vst.msk [vmem:[#allocation3 + $0x14] sm:$0xf] %vm1516_vm5, %v1669_v44  ;;  %v4048_v53 = vshll.u32 %v3928_v45, 16  ;;  %v7689_v17 = vpop.f32.mrf.mxu0  ;;  %v2421_v24 = vrot.slane %v7684_v5, 5  ;;  %v1905_v36 = vrot.slane %v1903_v7, 5 }
 0x1ca   : > { %v7702_v40 = vrot.slane %v1909_v8, 5  ;;  %v2304_v41 = vld [vmem:[#allocation2 + $0x30] sm:$0xe]  ;;  %v1915_v42 = vrot.slane %v1913_v10, 4  ;;  %v4046_v39 = vrot.slane %v4045_v13, 4  ;;  %v4058_v44 = vshll.u32 %v3929_v60, 16 }
 0x1cb   : > { %v3514_v43 = vsel %vm7348_vm12, %v6019_v27, %v3513_v28  ;;  %v3515_v47 = vrot.slane %v3513_v28, 4  ;;  %v4050_v15 = vrot.slane %v4048_v53, 5  ;;  %v2306_v27 = vld [vmem:[#allocation2 + $0x38] sm:$0x1]  ;;  %v4485_v28 = vld [vmem:[#allocation2 + $0x30] sm:$0xe] }
 0x1cc   : > { %4352 = vrot.lane.b32.xlu1 %v3989_v6, %s6971_s17  ;;  %v1900_v6 = vshrl.u32 %v1743_v58, 16  ;;  %v1745_v45 = vld [vmem:[#allocation2 + $0x44] sm:$0x1]  ;;  %v2839_v50 = vld [vmem:[#allocation2 + $0x40] sm:$0xf]  ;;  %v6033_v54 = vrot.slane %v4485_v28, 9  ;;  %v1916_v55 = vor.u32 %v1915_v42, %v7702_v40 }
 0x1cd   : > { %4699 = vrot.lane.b32.xlu0 %v4599_v12, %s6970_s25  ;;  %v3517_v4 = vsel %vm7348_vm12, %v3515_v47, %v3516_v48  ;;  %v2838_v12 = vld [vmem:[#allocation2 + $0x3c] sm:$0xf]  ;;  %v4055_v20 = vor.u32 %v4054_v16, %v4050_v15  ;;  %v4595_v48 = vsel %vm7348_vm12, %v4593_v21, %v4594_v22  ;;  %v6003_v58 = vrot.slane %v2304_v41, 9  ;;  %v987_v10 = vld [vmem:[#allocation2 + $0x84] sm:$0x1] }
 0x1ce   : > { %v2971_v29 = vshrl.u32 %v2838_v12, 16  ;;  %v2974_v30 = vshll.u32 %v2838_v12, 16  ;;  %v1902_v33 = vrot.slane %v1900_v6, 4  ;;  %v1919_v1 = vshll.u32 %v1745_v45, 16  ;;  %v984_v16 = vld [vmem:[#allocation2 + $0x78] sm:$0x1] }
 0x1cf   : > { %v4051_v2 = vsel %vm7376_vm14, %v4046_v39, %v4050_v15  ;;  %v2984_v8 = vshrl.u32 %v2839_v50, 16  ;;  %v4592_v12 = vsel %vm7348_vm12, %v6033_v54, %v4591_v3  ;;  %v7734_v15 = vld [vmem:[#allocation2 + $0x44] sm:$0x1]  ;;  %v7739_v22 = vrot.slane %v1916_v55, 4  ;;  %v7743_v60 = vld [vmem:[#allocation2 + $0x30] sm:$0xf] }
 0x1d0   : > { %2173 = vrot.lane.b32.xlu1 %v1850_v19, %s6967_s19  ;;  %v7663_v37 = vpop.permute.xlu0 %2697  ;;  %v2973_v59 = vrot.slane %v2971_v29, 4  ;;  %v2976_v61 = vrot.slane %v2974_v30, 5  ;;  %v1906_v53 = vor.u32 %v1905_v36, %v1902_v33  ;;  %v7741_v31 = vrot.slane %v1919_v1, 5  ;;  %v6724_v3 = vld [vmem:[#allocation10 + $0x18] sm:$0xff]   ;;  %v1043_v29 = vld [vmem:[#allocation2 + $0x8c] sm:$0x1] }
 0x1d1   : > { %2523 = vrot.lane.b32.xlu0 %v2429_v25, %s6965_s11  ;;  %v3510_v25 = vsel %vm7348_vm12, %v3508_v38, %v3509_v56  ;;  %v7719_v38 = vrot.slane %v4058_v44, 5  ;;  %v2980_v56 = vshll.u32 %v2839_v50, 16  ;;  %v988_v28 = vsel %vm7250_vm2, 0, %v987_v10  ;;  %v1040_v33 = vld [vmem:[#allocation2 + $0x80] sm:$0x1] }
 0x1d2   : > { %v2977_v13 = vor.u32 %v2976_v61, %v2973_v59  ;;  %v1907_v21 = vrot.slane %v1906_v53, 4  ;;  %v7758_v41 = vrot.slane %v2984_v8, 4  ;;  %989 = vst [vmem:[#allocation2 + $0x84] sm:$0x1] %v988_v28  ;;  %v1674_v39 = vld [vmem:[#allocation2 + $0x3c] sm:$0xf] }
 0x1d3   : > { %v7678_v52 = vpop.permute.xlu1 %2699  ;;  %v2990_v45 = vshll.u32 %v7734_v15, 16  ;;  %1706 = vst.msk [vmem:[#allocation3 + $0x28] sm:$0xf] %vm1516_vm5, %v1674_v39  ;;  %v1044_v50 = vsel %vm7259_vm4, 0, %v1043_v29  ;;  %v6725_v59 = vld [vmem:[#allocation10 + $0x10] sm:$0xff]   ;;  %v2947_v53 = vshrl.u32 %v7743_v60, 16 }
 0x1d4   : > { %4701 = vrot.lane.b32.xlu1 %v4602_v32, %s6970_s25  ;;  %v7763_v44 = vrot.slane %v2977_v13, 4  ;;  %v1912_v61 = vsel %vm7376_vm14, %v1907_v21, %v7702_v40  ;;  %1045 = vst [vmem:[#allocation2 + $0x8c] sm:$0x1] %v1044_v50  ;;  %v7788_v8 = vld [vmem:[#allocation2 + $0x34] sm:$0xf]  ;;  %v2950_v10 = vshll.u32 %v7743_v60, 16 }
 0x1d5   : > { %3611 = vrot.lane.b32.xlu0 %v3514_v43, %s6966_s26  ;;  %v3507_v43 = vsel %vm7348_vm12, %v6018_v63, %v3506_v51  ;;  %v6723_v63 = vld [vmem:[#allocation10 + $0x20] ss:$0 sps:$4 sm:$0xff]   ;;  %v6728_v60 = vld [vmem:[#allocation10 + $0x8] sm:$0xff]  }
 0x1d6   : > { %6602 = vmatprep.subr.msk.bf16.mxu0 %vm5020_vm3, %v6723_v63  ;;  %6603 = vmatprep.subr.msk.bf16.mxu1 %vm5020_vm3, %v6723_v63  ;;  %v5022_v42 = vsel %vm5020_vm3, %v6723_v63, 0  ;;  %vm4971_vm3 = vcmask 588800  }
 0x1d7   : > { %v2508_v57 = vpop.permute.xlu0 %2507  ;;  %6503 = vmatpush3.bf16.msra.mxu0 %v5022_v42  ;;  %6597 = vmatpush3.bf16.msra.mxu1 %v5022_v42  ;;  %v7801_v42 = vld [vmem:[#allocation2 + $0x30] sm:$0xf] }
 0x1d8   : > { %2525 = vrot.lane.b32.xlu1 %v2432_v62, %s6965_s11  ;;  %v834_v62 = vpop.f32.mrf.mxu0  ;;  %6504 = vmatprep.subr.bf16.mxu0 %v6724_v3 }
 0x1d9   : > { %3809 = vrot.lane.b32.xlu0 %v3735_v49, %s6968_s28  ;;  %v2423_v49 = vrot.slane %v2421_v24, 4  ;;  %6593 = vmatprep.subr.bf16.mxu1 %v6724_v3 }
 0x1da   : > { %v6489_v5 = vpop.f32.mrf.mxu0 }
 0x1db   : > { %v7687_v26 = vpop.permute.xlu0 %3595  ;;  %6505 = vmatpush3.bf16.msra.mxu0 %v6724_v3  ;;  %6598 = vmatpush3.bf16.msra.mxu1 %v6724_v3 }
 0x1dc   : > { %3613 = vrot.lane.b32.xlu1 %v3517_v4, %s6966_s26  ;;  %v7717_v4 = vrot.slane %v4055_v20, 4  ;;  %v837_v30 = vpop.f32.mrf.mxu0  ;;  %v3736_v20 = vld [vmem:[#allocation2 + $0x58] sm:$0xf]  ;;  %6506 = vmatprep.subr.bf16.mxu0 %v6725_v59 }
 0x1dd   : > { %2721 = vrot.lane.b32.xlu0 %v2645_v14, %s6964_s30  ;;  %v7732_v14 = vsel %vm7348_vm12, %v6003_v58, %v2421_v24  ;;  %v838_v54 = vadd.f32 %v7592_v46, %v837_v30  ;;  %v1041_v58 = vsel %vm7259_vm4, 0, %v1040_v33  ;;  %v7799_v33 = vrot.slane %v2947_v53, 4  ;;  %6594 = vmatprep.subr.bf16.mxu1 %v6725_v59 }
 0x1de   : > { %v2168_v19 = vpop.permute.xlu1 %2167  ;;  %v4061_v24 = vsel %vm7376_vm14, %v7717_v4, %v7719_v38  ;;  %1042 = vst [vmem:[#allocation2 + $0x80] sm:$0x1] %v1041_v58  ;;  %v4015_v53 = vshrl.u32 %v7801_v42, 16  ;;  %v2960_v38 = vshrl.u32 %v7788_v8, 16 }
 0x1df   : > { %2262 = vst.msk [vmem:[#allocation3 + $0x8] sm:$0xf] %vm2259_vm15, %v2168_v19  ;;  %v7699_v32 = vpop.permute.xlu0 %3793  ;;  %6507 = vmatpush3.bf16.msra.mxu0 %v6725_v59  ;;  %6599 = vmatpush3.bf16.msra.mxu1 %v6725_v59  ;;  %v6729_v59 = vld [vmem:[#allocation10] sm:$0xff]  }
 0x1e0   : > { %3609 = vrot.lane.b32.xlu1 %v3510_v25, %s6966_s26  ;;  %2602 = vst.msk [vmem:[#allocation3 + $0x8] sm:$0xf] %vm2599_vm0, %v2508_v57  ;;  %v2424_v57 = vrot.slane %v2306_v27, 5  ;;  %v7749_v25 = vrot.slane %v2980_v56, 5  ;;  %v843_v27 = vadd.f32 %v7592_v46, %v7689_v17  ;;  %v985_v17 = vsel %vm7250_vm2, 0, %v984_v16  ;;  %6508 = vmatprep.subr.bf16.mxu0 %v6728_v60 }
 0x1e1   : > { %3607 = vrot.lane.b32.xlu0 %v3507_v43, %s6966_s26  ;;  %v835_v43 = vadd.f32 %v7592_v46, %v834_v62  ;;  %986 = vst [vmem:[#allocation2 + $0x78] sm:$0x1] %v985_v17  ;;  %v1922_v56 = vsel %vm7376_vm14, %v7739_v22, %v7741_v31  ;;  %6595 = vmatprep.subr.bf16.mxu1 %v6728_v60  ;;  %v1673_v22 = vld [vmem:[#allocation2 + $0x34] sm:$0xf] }
 0x1e2   : > { %v7706_v47 = vpop.permute.xlu1 %2509  ;;  %v2425_v7 = vsel %vm7348_vm12, %v2423_v49, %v2424_v57  ;;  %v846_v49 = vadd.f32 %v7592_v46, %v6489_v5  ;;  %v2646_v46 = vld [vmem:[#allocation2 + $0x58] sm:$0xf]  ;;  %v2987_v40 = vor.u32 %v7758_v41, %v7749_v25  ;;  %v918_v5 = vmax.f32 %v838_v54, 0.0  ;;  %v3925_v41 = vld [vmem:[#allocation2 + $0x34] sm:$0xf] }
 0x1e3   : > { %v7712_v51 = vpop.permute.xlu0 %2705  ;;  %v917_v57 = vmax.f32 %v835_v43, 0.0  ;;  %6509 = vmatpush3.bf16.msra.mxu0 %v6728_v60  ;;  %6600 = vmatpush3.bf16.msra.mxu1 %v6728_v60  ;;  %v1678_v31 = vld [vmem:[#allocation2 + $0x54] sm:$0xf]  ;;  %1705 = vst.msk [vmem:[#allocation3 + $0x24] sm:$0xf] %vm1516_vm5, %v1673_v22 }
 0x1e4   : > { %4697 = vrot.lane.b32.xlu1 %v4595_v48, %s6970_s25  ;;  %v919_v48 = vmax.f32 %v843_v27, 0.0  ;;  %v920_v1 = vmax.f32 %v846_v49, 0.0  ;;  %v2983_v27 = vsel %vm7376_vm14, %v7763_v44, %v7749_v25  ;;  %v6156_v30 = vpack.c.bf16 %v918_v5, %v918_v5  ;;  %v1596_v44 = vld [vmem:[#allocation2 + $0x84] sm:$0xf]  ;;  %6510 = vmatprep.subr.bf16.mxu0 %v6729_v59  ;;  %1710 = vst.msk [vmem:[#allocation3 + $0x38] sm:$0xf] %vm1516_vm5, %v1678_v31 }
 0x1e5   : > { %4362 = vrot.lane.b32.xlu0 %v4051_v2, %s6971_s17  ;;  %v6155_v63 = vpack.c.bf16 %v917_v57, %v917_v57  ;;  %v7807_v57 = vrot.slane %v2950_v10, 5  ;;  %v4018_v5 = vshll.u32 %v7801_v42, 16  ;;  %v2643_v42 = vld [vmem:[#allocation2 + $0x48] sm:$0xf]  ;;  %6596 = vmatprep.subr.bf16.mxu1 %v6729_v59  ;;  %v1742_v31 = vld [vmem:[#allocation2 + $0x38] sm:$0x1] }
 0x1e6   : > { %v7721_v6 = vpop.permute.xlu1 %3597  ;;  %v6157_v55 = vpack.c.bf16 %v919_v48, %v919_v48  ;;  %v6158_v16 = vpack.c.bf16 %v920_v1, %v920_v1  ;;  %v1335_v49 = vshrl.u32 %v6156_v30, 16 }
 0x1e7   : > { %v7737_v19 = vpop.permute.xlu0 %3258  ;;  %v1327_v28 = vshrl.u32 %v6155_v63, 16  ;;  %v1330_v29 = vshll.u32 %v6155_v63, 16  ;;  %v2953_v25 = vor.u32 %v7807_v57, %v7799_v33  ;;  %v4020_v60 = vrot.slane %v4018_v5, 5  ;;  %v1679_v33 = vld [vmem:[#allocation2 + $0x58] sm:$0xf]  ;;  %6511 = vmatpush3.bf16.msra.mxu0 %v6729_v59  ;;  %6601 = vmatpush3.bf16.msra.mxu1 %v6729_v59 }
 0x1e8   : > { %2521 = vrot.lane.b32.xlu1 %v2425_v7, %s6965_s11  ;;  %v1675_v7 = vld [vmem:[#allocation2 + $0x40] sm:$0xf]  ;;  %v1347_v13 = vshll.u32 %v6157_v55, 16  ;;  %v1352_v3 = vshrl.u32 %v6158_v16, 16  ;;  %v1355_v17 = vshll.u32 %v6158_v16, 16  ;;  %v1337_v63 = vrot.slane %v1335_v49, 7 }
 0x1e9   : > { %4695 = vrot.lane.b32.xlu0 %v4592_v12, %s6970_s25  ;;  %v1344_v12 = vshrl.u32 %v6157_v55, 16  ;;  %1707 = vst.msk [vmem:[#allocation3 + $0x2c] sm:$0xf] %vm1516_vm5, %v1675_v7  ;;  %v1329_v48 = vrot.slane %v1327_v28, 7  ;;  %v1589_v58 = vld [vmem:[#allocation2 + $0x78] sm:$0xf] }
 0x1ea   : > { %v7755_v36 = vpop.permute.xlu1 %3795  ;;  %v1342_v28 = vrot.slane %v1337_v63, 4  ;;  %v2962_v49 = vrot.slane %v2960_v38, 4  ;;  %1711 = vst.msk [vmem:[#allocation3 + $0x3c] sm:$0xf] %vm1516_vm5, %v1679_v33  ;;  %v4494_v33 = vld [vmem:[#allocation2 + $0x54] sm:$0xe] }
 0x1eb   : > { %v2702_v62 = vpop.permute.xlu0 %2701  ;;  %v1346_v43 = vrot.slane %v1344_v12, 7  ;;  %v1332_v55 = vor.u32 %v1330_v29, %v1329_v48  ;;  %v1333_v1 = vrot.slane %v1329_v48, 4  ;;  %v1593_v12 = vld [vmem:[#allocation2 + $0x80] sm:$0x1]  ;;  %v2988_v29 = vrot.slane %v2987_v40, 4 }
 0x1ec   : > { %3811 = vrot.lane.b32.xlu1 %v3736_v20, %s6968_s28  ;;  %2796 = vst.msk [vmem:[#allocation3 + $0x8] sm:$0xf] %vm2793_vm1, %v2702_v62  ;;  %v2956_v20 = vshll.u32 %v7788_v8, 16  ;;  %v1338_v62 = vshll.u32 %v6156_v30, 16  ;;  %v2992_v30 = vrot.slane %v2990_v45, 5  ;;  %v1594_v40 = vsel %vm7250_vm2, %v1342_v28, %v1593_v12 }
 0x1ed   : > { %2183 = vrot.lane.b32.xlu0 %v1912_v61, %s6967_s19  ;;  %v1349_v50 = vor.u32 %v1347_v13, %v1346_v43  ;;  %v1350_v54 = vrot.slane %v1346_v43, 4  ;;  %v1354_v61 = vrot.slane %v1352_v3, 7  ;;  %v1590_v13 = vsel %vm7305_vm7, %v1332_v55, %v1589_v58  ;;  %v1672_v3 = vld [vmem:[#allocation2 + $0x30] sm:$0xf]  ;;  %1595 = vst [vmem:[#allocation2 + $0x80] sm:$0x1] %v1594_v40 }
 0x1ee   : > { %v7779_v2 = vpop.permute.xlu1 %2707  ;;  %v1340_v16 = vor.u32 %v1338_v62, %v1337_v63  ;;  %1591 = vst [vmem:[#allocation2 + $0x78] sm:$0xf] %v1590_v13  ;;  %1704 = vst.msk [vmem:[#allocation3 + $0x20] sm:$0xf] %vm1516_vm5, %v1672_v3  ;;  %v2958_v48 = vrot.slane %v2956_v20, 5  ;;  %v2993_v57 = vsel %vm7376_vm14, %v2988_v29, %v2992_v30  ;;  %v4028_v58 = vshrl.u32 %v3925_v41, 16 }
 0x1ef   : > { %v7793_v21 = vpop.permute.xlu0 %3789  ;;  %v1357_v7 = vor.u32 %v1355_v17, %v1354_v61  ;;  %v1359_v10 = vrot.slane %v1354_v61, 4  ;;  %v1676_v62 = vld [vmem:[#allocation2 + $0x48] sm:$0xf]  ;;  %v1677_v61 = vld [vmem:[#allocation2 + $0x4c] sm:$0xf]  ;;  %v2954_v55 = vrot.slane %v2953_v25, 4 }
 0x1f0   : > { %2723 = vrot.lane.b32.xlu1 %v2646_v46, %s6964_s30  ;;  %v1600_v46 = vld [vmem:[#allocation2 + $0x8c] sm:$0x1]  ;;  %v1341_v45 = vsel %vm7316_vm8, %v1333_v1, %v1340_v16  ;;  %1708 = vst.msk [vmem:[#allocation3 + $0x30] sm:$0xf] %vm1516_vm5, %v1676_v62  ;;  %v1741_v20 = vld [vmem:[#allocation2 + $0x34] sm:$0xf] }
 0x1f1   : > { %2519 = vrot.lane.b32.xlu0 %v7732_v14, %s6965_s11  ;;  %v1601_v43 = vsel %vm7250_vm2, %v1359_v10, %v1600_v46  ;;  %1592 = vst.msk [vmem:[#allocation2 + $0x7c] sm:$0xf] %vm1516_vm5, %v1341_v45  ;;  %1709 = vst.msk [vmem:[#allocation3 + $0x34] sm:$0xf] %vm1516_vm5, %v1677_v61  ;;  %v3926_v12 = vld [vmem:[#allocation2 + $0x38] sm:$0x1]  ;;  %v2959_v28 = vsel %vm7376_vm14, %v2954_v55, %v2958_v48 }
 0x1f2   : > { %v2170_v39 = vpop.permute.xlu1 %2169  ;;  %1602 = vst [vmem:[#allocation2 + $0x8c] sm:$0x1] %v1601_v43  ;;  %v4030_v38 = vrot.slane %v4028_v58, 4  ;;  %v1889_v13 = vshrl.u32 %v1741_v20, 16  ;;  %v4034_v43 = vshll.u32 %v3926_v12, 16 }
 0x1f3   : > { %2263 = vst.msk [vmem:[#allocation3 + $0xc] sm:$0xf] %vm2259_vm15, %v2170_v39  ;;  %v7817_v14 = vpop.permute.xlu0 %2503  ;;  %v3734_v3 = vld [vmem:[#allocation2 + $0x4c] sm:$0xf]  ;;  %v1683_v58 = vld [vmem:[#allocation2 + $0x70] sm:$0xf] }
 0x1f4   : > { %2603 = vst.msk [vmem:[#allocation3 + $0xc] sm:$0xf] %vm2599_vm0, %v7706_v47  ;;  %4364 = vrot.lane.b32.xlu1 %v4061_v24, %s6971_s17  ;;  %v1597_v47 = vsel %vm7305_vm7, %v1349_v50, %v1596_v44  ;;  %v1740_v24 = vld [vmem:[#allocation2 + $0x30] sm:$0xf]  ;;  %v2837_v50 = vld [vmem:[#allocation2 + $0x38] sm:$0x1] }
 0x1f5   : > { %3274 = vrot.lane.b32.xlu0 %v2983_v27, %s6969_s14  ;;  %1598 = vst [vmem:[#allocation2 + $0x84] sm:$0xf] %v1597_v47  ;;  %v1358_v27 = vsel %vm7316_vm8, %v1350_v54, %v1357_v7  ;;  %v1876_v17 = vshrl.u32 %v1740_v24, 16  ;;  %v1879_v39 = vshll.u32 %v1740_v24, 16  ;;  %v4024_v54 = vshll.u32 %v3925_v41, 16 }
 0x1f6   : > { %v7823_v4 = vpop.permute.xlu1 %3260  ;;  %1599 = vst.msk [vmem:[#allocation2 + $0x88] sm:$0xf] %vm1516_vm5, %v1358_v27  ;;  %v2644_v47 = vld [vmem:[#allocation2 + $0x4c] sm:$0xf]  ;;  %v2963_v7 = vor.u32 %v2962_v49, %v2958_v48  ;;  %v2966_v10 = vshll.u32 %v2837_v50, 16  ;;  %v1885_v24 = vshll.u32 %v1741_v20, 16 }
 0x1f7   : > { %v7844_v15 = vpop.permute.xlu0 %4691  ;;  %v1878_v46 = vrot.slane %v1876_v17, 4  ;;  %v1881_v63 = vrot.slane %v1879_v39, 5  ;;  %v4026_v59 = vrot.slane %v4024_v54, 5  ;;  %v1891_v40 = vrot.slane %v1889_v13, 4  ;;  %v1682_v54 = vld [vmem:[#allocation2 + $0x6c] sm:$0xf] }
 0x1f8   : > { %2185 = vrot.lane.b32.xlu1 %v1922_v56, %s6967_s19  ;;  %v4017_v56 = vrot.slane %v4015_v53, 4  ;;  %v3733_v53 = vld [vmem:[#allocation2 + $0x48] sm:$0xf]  ;;  %v2968_v27 = vrot.slane %v2966_v10, 5  ;;  %v2964_v25 = vrot.slane %v2963_v7, 4  ;;  %v1887_v45 = vrot.slane %v1885_v24, 5 }
 0x1f9   : > { %2717 = vrot.lane.b32.xlu0 %v2643_v42, %s6964_s30  ;;  %v1882_v30 = vor.u32 %v1881_v63, %v1878_v46  ;;  %v4031_v41 = vor.u32 %v4030_v38, %v4026_v59  ;;  %v4036_v39 = vrot.slane %v4034_v43, 5  ;;  %v6036_v20 = vrot.slane %v4494_v33, 9  ;;  %1714 = vst.msk [vmem:[#allocation3 + $0x48] sm:$0xf] %vm1516_vm5, %v1682_v54  ;;  %1715 = vst.msk [vmem:[#allocation3 + $0x4c] sm:$0xf] %vm1516_vm5, %v1683_v58 }
 0x1fa   : > { %v2704_v44 = vpop.permute.xlu1 %2703  ;;  %v4021_v1 = vor.u32 %v4020_v60, %v4017_v56  ;;  %v2969_v48 = vsel %vm7376_vm14, %v2964_v25, %v2968_v27  ;;  %v1892_v62 = vor.u32 %v1891_v40, %v1887_v45  ;;  %v1680_v55 = vld [vmem:[#allocation2 + $0x60] sm:$0xf]  ;;  %v2313_v46 = vld [vmem:[#allocation2 + $0x54] sm:$0xe]  ;;  %v2314_v63 = vld [vmem:[#allocation2 + $0x58] sm:$0xf] }
 0x1fb   : > { %2797 = vst.msk [vmem:[#allocation3 + $0xc] sm:$0xf] %vm2793_vm1, %v2704_v44  ;;  %v7866_v8 = vpop.permute.xlu0 %2515  ;;  %v1883_v60 = vrot.slane %v1882_v30, 4  ;;  %v4495_v44 = vld [vmem:[#allocation2 + $0x58] sm:$0xf]  ;;  %v4032_v49 = vrot.slane %v4031_v41, 4 }
 0x1fc   : > { %3276 = vrot.lane.b32.xlu1 %v2993_v57, %s6969_s14  ;;  %v4022_v29 = vrot.slane %v4021_v1, 4  ;;  %v1895_v57 = vshll.u32 %v1742_v31, 16  ;;  %1712 = vst.msk [vmem:[#allocation3 + $0x40] sm:$0xf] %vm1516_vm5, %v1680_v55  ;;  %v1893_v10 = vrot.slane %v1892_v62, 4  ;;  %v6006_v13 = vrot.slane %v2313_v46, 9 }
 0x1fd   : > { %3805 = vrot.lane.b32.xlu0 %v3733_v53, %s6968_s28  ;;  %v1888_v61 = vsel %vm7376_vm14, %v1883_v60, %v1887_v45  ;;  %v4612_v53 = vrot.slane %v4495_v44, 5  ;;  %v4037_v7 = vsel %vm7376_vm14, %v4032_v49, %v4036_v39  ;;  %v4496_v38 = vld [vmem:[#allocation2 + $0x5c] sm:$0x1]  ;;  %v3405_v30 = vld [vmem:[#allocation2 + $0x54] sm:$0xe] }
 0x1fe   : > { %v7869_v5 = vpop.permute.xlu1 %3791  ;;  %v4027_v56 = vsel %vm7376_vm14, %v4022_v29, %v4026_v59  ;;  %v1897_v59 = vrot.slane %v1895_v57, 5  ;;  %v3406_v27 = vld [vmem:[#allocation2 + $0x58] sm:$0xf]  ;;  %v4615_v25 = vrot.slane %v4496_v38, 5  ;;  %v2315_v45 = vld [vmem:[#allocation2 + $0x5c] sm:$0x1] }
 0x1ff   : > { %v7873_v16 = vpop.permute.xlu0 %3603  ;;  %v4613_v24 = vsel %vm7348_vm12, %v6036_v20, %v4612_v53  ;;  %v6021_v31 = vrot.slane %v3405_v30, 9  ;;  %v3933_v39 = vld [vmem:[#allocation2 + $0x54] sm:$0xf]  ;;  %v3403_v49 = vld [vmem:[#allocation2 + $0x4c] sm:$0xf] }
 0x200   : > { %2719 = vrot.lane.b32.xlu1 %v2644_v47, %s6964_s30  ;;  %v1681_v47 = vld [vmem:[#allocation2 + $0x64] sm:$0xf]  ;;  %v1898_v43 = vsel %vm7376_vm14, %v1893_v10, %v1897_v59  ;;  %v3407_v57 = vld [vmem:[#allocation2 + $0x5c] sm:$0x1]  ;;  %v4087_v58 = vshrl.u32 %v3933_v39, 16  ;;  %v3520_v55 = vrot.slane %v3403_v49, 5 }
 0x201   : > { %3270 = vrot.lane.b32.xlu0 %v2959_v28, %s6969_s14  ;;  %1713 = vst.msk [vmem:[#allocation3 + $0x44] sm:$0xf] %vm1516_vm5, %v1681_v47  ;;  %v2442_v28 = vrot.slane %v2314_v63, 5  ;;  %v3530_v47 = vrot.slane %v3407_v57, 5  ;;  %v7934_v10 = vld [vmem:[#allocation2 + $0x4c] sm:$0xf] }
 0x202   : > { %v7877_v42 = vpop.permute.xlu1 %4693  ;;  %v3402_v38 = vld [vmem:[#allocation2 + $0x48] sm:$0xe] }
 0x203   : > { %v7881_v22 = vpop.permute.xlu0 %3801  ;;  %v2443_v40 = vsel %vm7348_vm12, %v6006_v13, %v2442_v28  ;;  %v2444_v44 = vrot.slane %v2442_v28, 4  ;;  %v4089_v13 = vrot.slane %v4087_v58, 4 }
 0x204   : > { %3807 = vrot.lane.b32.xlu1 %v3734_v3, %s6968_s28  ;;  %9365 = vst [vmem:[#allocation24_spill] sm:$0xff] %v7881_v22  ;;  %v4614_v3 = vrot.slane %v4612_v53, 4  ;;  %v3404_v53 = vld [vmem:[#allocation2 + $0x50] sm:$0x1] }
 0x205   : > { %4358 = vrot.lane.b32.xlu0 %v4027_v56, %s6971_s17  ;;  %v3527_v56 = vrot.slane %v3406_v27, 5  ;;  %v3522_v27 = vrot.slane %v3520_v55, 4 }
 0x206   : > { %v7885_v17 = vpop.permute.xlu1 %2517  ;;  %v4616_v33 = vsel %vm7348_vm12, %v4614_v3, %v4615_v25  ;;  %v4605_v3 = vrot.slane %v7934_v10, 5  ;;  %v1749_v25 = vld [vmem:[#allocation2 + $0x54] sm:$0xf] }
 0x207   : > { %v7891_v50 = vpop.permute.xlu0 %2713  ;;  %v3528_v54 = vsel %vm7348_vm12, %v6021_v31, %v3527_v56  ;;  %v3529_v63 = vrot.slane %v3527_v56, 4  ;;  %v2312_v31 = vld [vmem:[#allocation2 + $0x50] sm:$0x1]  ;;  %v1948_v57 = vshrl.u32 %v1749_v25, 16 }
 0x208   : > { %3272 = vrot.lane.b32.xlu1 %v2969_v48, %s6969_s14  ;;  %9366 = vst [vmem:[#allocation25_spill] sm:$0xff] %v7891_v50  ;;  %v2445_v48 = vrot.slane %v2315_v45, 5 }
 0x209   : > { %2179 = vrot.lane.b32.xlu0 %v1888_v61, %s6967_s19  ;;  %v4090_v61 = vshll.u32 %v3933_v39, 16  ;;  %v3531_v45 = vsel %vm7348_vm12, %v3529_v63, %v3530_v47  ;;  %v6020_v39 = vrot.slane %v3402_v38, 9 }
 0x20a   : > { %v7897_v1 = vpop.permute.xlu1 %3605  ;;  %v2446_v46 = vsel %vm7348_vm12, %v2444_v44, %v2445_v48  ;;  %v1750_v44 = vld [vmem:[#allocation2 + $0x58] sm:$0xf] }
 0x20b   : > { %9367 = vst [vmem:[#allocation26_spill] sm:$0xff] %v7897_v1  ;;  %v7905_v12 = vpop.permute.xlu0 %3599  ;;  %v4092_v28 = vrot.slane %v4090_v61, 5  ;;  %v1957_v10 = vshll.u32 %v1750_v44, 16 }
 0x20c   : > { %4360 = vrot.lane.b32.xlu1 %v4037_v7, %s6971_s17  ;;  %v3739_v7 = vld [vmem:[#allocation2 + $0x6c] sm:$0xf] }
 0x20d   : > { %4707 = vrot.lane.b32.xlu0 %v4613_v24, %s6970_s25  ;;  %v7938_v24 = vld [vmem:[#allocation2 + $0x4c] sm:$0xf]  ;;  %v4093_v49 = vor.u32 %v4092_v28, %v4089_v13  ;;  %v3521_v13 = vsel %vm7348_vm12, %v6020_v39, %v3520_v55  ;;  %v2438_v28 = vrot.slane %v2312_v31, 5  ;;  %v7969_v50 = vrot.slane %v1957_v10, 5  ;;  %v1751_v31 = vld [vmem:[#allocation2 + $0x5c] sm:$0x1] }
 0x20e   : > { %v7909_v29 = vpop.permute.xlu1 %2505  ;;  %v9334_v48 = vrot.slane %v7938_v24, 5 }
 0x20f   : > { %v7915_v41 = vpop.permute.xlu0 %4354 }
 0x210   : > { %2181 = vrot.lane.b32.xlu1 %v1898_v43, %s6967_s19  ;;  %v3523_v43 = vrot.slane %v3404_v53, 5  ;;  %v4607_v53 = vrot.slane %v4605_v3, 4 }
 0x211   : > { %2531 = vrot.lane.b32.xlu0 %v2443_v40, %s6965_s11  ;;  %v4493_v40 = vld [vmem:[#allocation2 + $0x50] sm:$0x1] }
 0x212   : > { %v7919_v60 = vpop.permute.xlu1 %3601  ;;  %v3524_v61 = vsel %vm7348_vm12, %v3522_v27, %v3523_v43  ;;  %v2437_v27 = vrot.slane %v9334_v48, 4  ;;  %v4094_v43 = vrot.slane %v4093_v49, 4  ;;  %v6492_v48 = vpop.f32.mrf.mxu0 }
 0x213   : > { %v7925_v62 = vpop.permute.xlu0 %4687 }
 0x214   : > { %4709 = vrot.lane.b32.xlu1 %v4616_v33, %s6970_s25  ;;  %v3934_v33 = vld [vmem:[#allocation2 + $0x58] sm:$0xf] }
 0x215   : > { %3619 = vrot.lane.b32.xlu0 %v3528_v54, %s6966_s26  ;;  %v1951_v54 = vshll.u32 %v1749_v25, 16  ;;  %v4096_v63 = vshll.u32 %v3934_v33, 16  ;;  %v4100_v47 = vshrl.u32 %v3934_v33, 16  ;;  %v1950_v25 = vrot.slane %v1948_v57, 4 }
 0x216   : > { %v7929_v20 = vpop.permute.xlu1 %4689 }
 0x217   : > { %v2176_v59 = vpop.permute.xlu0 %2175  ;;  %v4098_v9 = vrot.slane %v4096_v63, 5  ;;  %v4102_v55 = vrot.slane %v4100_v47, 4 }
 0x218   : > { %2533 = vrot.lane.b32.xlu1 %v2446_v46, %s6965_s11  ;;  %2266 = vst.msk [vmem:[#allocation3 + $0x18] sm:$0xf] %vm2259_vm15, %v2176_v59  ;;  %v4608_v46 = vrot.slane %v4493_v40, 5  ;;  %v1961_v59 = vshrl.u32 %v1750_v44, 16  ;;  %v2844_v40 = vld [vmem:[#allocation2 + $0x54] sm:$0xf] }
 0x219   : > { %2606 = vst.msk [vmem:[#allocation3 + $0x18] sm:$0xf] %vm2599_vm0, %v7866_v8  ;;  %3817 = vrot.lane.b32.xlu0 %v3739_v7, %s6968_s28  ;;  %v2649_v8 = vld [vmem:[#allocation2 + $0x6c] sm:$0xf]  ;;  %v4491_v7 = vld [vmem:[#allocation2 + $0x48] sm:$0xe] }
 0x21a   : > { %v7940_v30 = vpop.permute.xlu1 %2513  ;;  %v4609_v33 = vsel %vm7348_vm12, %v4607_v53, %v4608_v46  ;;  %v6035_v44 = vrot.slane %v4491_v7, 9  ;;  %v1963_v39 = vrot.slane %v1961_v59, 4  ;;  %v3019_v57 = vshrl.u32 %v2844_v40, 16  ;;  %v2845_v59 = vld [vmem:[#allocation2 + $0x58] sm:$0xf] }
 0x21b   : > { %v7949_v56 = vpop.permute.xlu0 %2511  ;;  %v2439_v53 = vsel %vm7348_vm12, %v2437_v27, %v2438_v28  ;;  %v4099_v46 = vsel %vm7376_vm14, %v4094_v43, %v4098_v9  ;;  %v4103_v27 = vor.u32 %v4102_v55, %v4098_v9  ;;  %v2310_v43 = vld [vmem:[#allocation2 + $0x48] sm:$0xe]  ;;  %v3032_v55 = vshrl.u32 %v2845_v59, 16 }
 0x21c   : > { %3621 = vrot.lane.b32.xlu1 %v3531_v45, %s6966_s26  ;;  %v1953_v45 = vrot.slane %v1951_v54, 5  ;;  %v3022_v54 = vshll.u32 %v2844_v40, 16  ;;  %v4606_v7 = vsel %vm7348_vm12, %v6035_v44, %v4605_v3  ;;  %v3021_v44 = vrot.slane %v3019_v57, 4 }
 0x21d   : > { %2729 = vrot.lane.b32.xlu0 %v2649_v8, %s6964_s30  ;;  %v7999_v57 = vrot.slane %v4103_v27, 4 }
 0x21e   : > { %v7952_v58 = vpop.permute.xlu1 %3803  ;;  %v1954_v63 = vor.u32 %v1953_v45, %v1950_v25  ;;  %v1964_v25 = vor.u32 %v1963_v39, %v7969_v50  ;;  %v1967_v45 = vshll.u32 %v1751_v31, 16  ;;  %v3740_v31 = vld [vmem:[#allocation2 + $0x70] sm:$0xf] }
 0x21f   : > { %9368 = vst [vmem:[#allocation27_spill] sm:$0xff] %v7952_v58  ;;  %v7958_v38 = vpop.permute.xlu0 %3266  ;;  %v6005_v58 = vrot.slane %v2310_v43, 9 }
 0x220   : > { %3617 = vrot.lane.b32.xlu1 %v3524_v61, %s6966_s26  ;;  %v3935_v61 = vld [vmem:[#allocation2 + $0x5c] sm:$0x1]  ;;  %v1955_v9 = vrot.slane %v1954_v63, 4  ;;  %v8003_v63 = vrot.slane %v1967_v45, 5 }
 0x221   : > { %3615 = vrot.lane.b32.xlu0 %v3521_v13, %s6966_s26  ;;  %v4106_v10 = vshll.u32 %v3935_v61, 16  ;;  %v7985_v13 = vld [vmem:[%s9314_s4] ss:$0 sm:$0xff]  ;;  %v3024_v61 = vrot.slane %v3022_v54, 5  ;;  %v8001_v54 = vrot.slane %v1964_v25, 4 }
 0x222   : > { %v7964_v8 = vpop.permute.xlu1 %2715  ;;  %v859_v28 = vadd.f32 %v7985_v13, %v6492_v48  ;;  %v3028_v48 = vshll.u32 %v2845_v59, 16  ;;  %v1960_v25 = vsel %vm7376_vm14, %v1955_v9, %v7969_v50  ;;  %v9370_v9 = vrot.slane %v7938_v24, 5 }
 0x223   : > { %9369 = vst [vmem:[#allocation28_spill] sm:$0xff] %v7964_v8  ;;  %v2710_v49 = vpop.permute.xlu0 %2709  ;;  %v993_v8 = vld [vmem:[#allocation2 + $0x9c] sm:$0x1]  ;;  %v3025_v43 = vor.u32 %v3024_v61, %v3021_v44  ;;  %v2650_v44 = vld [vmem:[#allocation2 + $0x70] sm:$0xf] }
 0x224   : > { %4705 = vrot.lane.b32.xlu1 %v4609_v33, %s6970_s25  ;;  %2800 = vst.msk [vmem:[#allocation3 + $0x18] sm:$0xf] %vm2793_vm1, %v2710_v49  ;;  %v994_v40 = vsel %vm7250_vm2, 0, %v993_v8  ;;  %v850_v33 = vpop.f32.mrf.mxu0  ;;  %v923_v49 = vmax.f32 %v859_v28, 0.0  ;;  %v7995_v8 = vrot.slane %v4106_v10, 5  ;;  %v8014_v45 = vrot.slane %v3028_v48, 5 }
 0x225   : > { %4370 = vrot.lane.b32.xlu0 %v4099_v46, %s6971_s17  ;;  %995 = vst [vmem:[#allocation2 + $0x9c] sm:$0x1] %v994_v40  ;;  %v990_v46 = vld [vmem:[#allocation2 + $0x90] sm:$0x1]  ;;  %v851_v1 = vadd.f32 %v7985_v13, %v850_v33  ;;  %v2841_v40 = vld [vmem:[#allocation2 + $0x48] sm:$0xf]  ;;  %v2436_v48 = vsel %vm7348_vm12, %v6005_v58, %v9370_v9 }
 0x226   : > { %v7977_v47 = vpop.permute.xlu1 %4356  ;;  %v6161_v22 = vpack.c.bf16 %v923_v49, %v923_v49  ;;  %v991_v59 = vsel %vm7250_vm2, 0, %v990_v46  ;;  %v6493_v28 = vpop.f32.mrf.mxu0  ;;  %v8016_v46 = vrot.slane %v3032_v55, 4  ;;  %v2995_v55 = vshrl.u32 %v2841_v40, 16 }
 0x227   : > { %v7992_v3 = vpop.permute.xlu0 %3797  ;;  %v921_v49 = vmax.f32 %v851_v1, 0.0  ;;  %992 = vst [vmem:[#allocation2 + $0x90] sm:$0x1] %v991_v59  ;;  %v4109_v58 = vsel %vm7376_vm14, %v7999_v57, %v7995_v8 }
 0x228   : > { %2529 = vrot.lane.b32.xlu1 %v2439_v53, %s6965_s11  ;;  %v2846_v53 = vld [vmem:[#allocation2 + $0x5c] sm:$0x1]  ;;  %v1378_v33 = vshrl.u32 %v6161_v22, 16  ;;  %v1381_v27 = vshll.u32 %v6161_v22, 16 }
 0x229   : > { %4703 = vrot.lane.b32.xlu0 %v4606_v7, %s6970_s25  ;;  %v1049_v7 = vld [vmem:[#allocation2 + $0xa4] sm:$0x1]  ;;  %v3038_v22 = vshll.u32 %v2846_v53, 16  ;;  %v6159_v61 = vpack.c.bf16 %v921_v49, %v921_v49  ;;  %v853_v53 = vpop.f32.mrf.mxu0 }
 0x22a   : > { %v2178_v39 = vpop.permute.xlu1 %2177  ;;  %v8024_v1 = vrot.slane %v1378_v33, 7  ;;  %v1050_v50 = vsel %vm7259_vm4, 0, %v1049_v7  ;;  %v3026_v7 = vrot.slane %v3025_v43, 4  ;;  %v3035_v43 = vor.u32 %v8016_v46, %v8014_v45 }
 0x22b   : > { %2267 = vst.msk [vmem:[#allocation3 + $0x1c] sm:$0xf] %vm2259_vm15, %v2178_v39  ;;  %v3263_v10 = vpop.permute.xlu0 %3262  ;;  %1051 = vst [vmem:[#allocation2 + $0xa4] sm:$0x1] %v1050_v50  ;;  %v1361_v24 = vshrl.u32 %v6159_v61, 16  ;;  %v8053_v49 = vrot.slane %v3038_v22, 5  ;;  %v854_v57 = vadd.f32 %v7985_v13, %v853_v53 }
 0x22c   : > { %2607 = vst.msk [vmem:[#allocation3 + $0x1c] sm:$0xf] %vm2599_vm0, %v7885_v17  ;;  %3819 = vrot.lane.b32.xlu1 %v3740_v31, %s6968_s28  ;;  %v862_v17 = vadd.f32 %v7985_v13, %v6493_v28  ;;  %v2998_v31 = vshll.u32 %v2841_v40, 16  ;;  %v3930_v40 = vld [vmem:[#allocation2 + $0x48] sm:$0xf]  ;;  %v3031_v50 = vsel %vm7376_vm14, %v3026_v7, %v8014_v45 }
 0x22d   : > { %3357 = vst.msk [vmem:[#allocation3 + $0x8] sm:$0xf] %vm3354_vm6, %v3263_v10  ;;  %2191 = vrot.lane.b32.xlu0 %v1960_v25, %s6967_s19  ;;  %v1364_v10 = vshll.u32 %v6159_v61, 16  ;;  %v8057_v8 = vrot.slane %v1361_v24, 7  ;;  %v4063_v9 = vshrl.u32 %v3930_v40, 16 }
 0x22e   : > { %v8019_v39 = vpop.permute.xlu1 %3268  ;;  %3694 = vst.msk [vmem:[#allocation3 + $0x8] sm:$0xf] %vm3691_vm9, %v7905_v12  ;;  %v1610_v12 = vld [vmem:[#allocation2 + $0x9c] sm:$0xf]  ;;  %v924_v59 = vmax.f32 %v862_v17, 0.0 }
 0x22f   : > { %3888 = vst.msk [vmem:[#allocation3 + $0x8] sm:$0xf] %vm3885_vm10, %v7699_v32  ;;  %v8037_v28 = vpop.permute.xlu0 %4350  ;;  %v1383_v32 = vor.u32 %v1381_v27, %v8024_v1  ;;  %v1046_v17 = vld [vmem:[#allocation2 + $0x98] sm:$0x1]  ;;  %v1603_v46 = vld [vmem:[#allocation2 + $0x90] sm:$0xf] }
 0x230   : > { %2731 = vrot.lane.b32.xlu1 %v2650_v44, %s6964_s30  ;;  %4449 = vst.msk [vmem:[#allocation3 + $0x8] sm:$0xf] %vm4446_vm11, %v7915_v41  ;;  %v1970_v41 = vsel %vm7376_vm14, %v8001_v54, %v8003_v63  ;;  %v6162_v33 = vpack.c.bf16 %v924_v59, %v924_v59  ;;  %v8061_v54 = vrot.slane %v2995_v55, 4  ;;  %v8063_v63 = vrot.slane %v2998_v31, 5  ;;  %v8071_v31 = vld [vmem:[#allocation2 + $0x48] sm:$0xf] }
 0x231   : > { %4786 = vst.msk [vmem:[#allocation3 + $0x8] sm:$0xf] %vm4783_vm13, %v7844_v15  ;;  %2527 = vrot.lane.b32.xlu0 %v2436_v48, %s6965_s11  ;;  %v2842_v15 = vld [vmem:[#allocation2 + $0x4c] sm:$0xf]  ;;  %v1611_v25 = vsel %vm7305_vm7, %v1383_v32, %v1610_v12  ;;  %v1366_v48 = vor.u32 %v1364_v10, %v8057_v8  ;;  %v922_v12 = vmax.f32 %v854_v57, 0.0  ;;  %v4066_v55 = vshll.u32 %v3930_v40, 16 }
 0x232   : > { %v2712_v27 = vpop.permute.xlu1 %2711  ;;  %1612 = vst [vmem:[#allocation2 + $0x9c] sm:$0xf] %v1611_v25  ;;  %v1386_v44 = vshrl.u32 %v6162_v33, 16  ;;  %v1389_v22 = vshll.u32 %v6162_v33, 16  ;;  %v1384_v59 = vrot.slane %v8024_v1, 4  ;;  %v1047_v32 = vsel %vm7259_vm4, 0, %v1046_v17 }
 0x233   : > { %2801 = vst.msk [vmem:[#allocation3 + $0x1c] sm:$0xf] %vm2793_vm1, %v2712_v27  ;;  %v2172_v61 = vpop.permute.xlu0 %2171  ;;  %v3004_v45 = vshll.u32 %v2842_v15, 16  ;;  %v3008_v7 = vshrl.u32 %v2842_v15, 16  ;;  %v1604_v10 = vsel %vm7305_vm7, %v1366_v48, %v1603_v46  ;;  %1048 = vst [vmem:[#allocation2 + $0x98] sm:$0x1] %v1047_v32  ;;  %v6160_v40 = vpack.c.bf16 %v922_v12, %v922_v12 }
 0x234   : > { %4372 = vrot.lane.b32.xlu1 %v4109_v58, %s6971_s17  ;;  %2264 = vst.msk [vmem:[#allocation3 + $0x10] sm:$0xf] %vm2259_vm15, %v2172_v61  ;;  %v1388_v53 = vrot.slane %v1386_v44, 7  ;;  %v1614_v58 = vld [vmem:[#allocation2 + $0xa4] sm:$0x1]  ;;  %v3036_v1 = vrot.slane %v3035_v43, 4  ;;  %v3001_v33 = vor.u32 %v8063_v63, %v8061_v54 }
 0x235   : > { %2604 = vst.msk [vmem:[#allocation3 + $0x10] sm:$0xf] %vm2599_vm0, %v7949_v56  ;;  %3282 = vrot.lane.b32.xlu0 %v3031_v50, %s6969_s14  ;;  %v8087_v27 = vld [vmem:[#allocation2 + $0x4c] sm:$0xf]  ;;  %1605 = vst [vmem:[#allocation2 + $0x90] sm:$0xf] %v1604_v10 }
 0x236   : > { %v8076_v24 = vpop.permute.xlu1 %3799  ;;  %2798 = vst.msk [vmem:[#allocation3 + $0x10] sm:$0xf] %vm2793_vm1, %v7712_v51  ;;  %v1391_v56 = vor.u32 %v1389_v22, %v1388_v53  ;;  %v1393_v25 = vrot.slane %v1388_v53, 4  ;;  %v8092_v57 = vrot.slane %v4063_v9, 4  ;;  %v1924_v17 = vshrl.u32 %v8071_v31, 16 }
 0x237   : > { %3359 = vst.msk [vmem:[#allocation3 + $0x10] sm:$0xf] %vm3354_vm6, %v7958_v38  ;;  %v2164_v15 = vpop.permute.xlu0 %2163  ;;  %v1369_v51 = vshrl.u32 %v6160_v40, 16  ;;  %v1372_v43 = vshll.u32 %v6160_v40, 16  ;;  %v2647_v54 = vld [vmem:[#allocation2 + $0x60] sm:$0xf] }
 0x238   : > { %2193 = vrot.lane.b32.xlu1 %v1970_v41, %s6967_s19  ;;  %3696 = vst.msk [vmem:[#allocation3 + $0x10] sm:$0xf] %vm3691_vm9, %v7873_v16  ;;  %v8098_v63 = vrot.slane %v4066_v55, 5  ;;  %v1927_v41 = vshll.u32 %v8071_v31, 16  ;;  %v1392_v38 = vsel %vm7316_vm8, %v1384_v59, %v1391_v56  ;;  %v1615_v46 = vsel %vm7250_vm2, %v1393_v25, %v1614_v58  ;;  %v3737_v12 = vld [vmem:[#allocation2 + $0x60] sm:$0xf] }
 0x239   : > { %2260 = vst.msk [vmem:[#allocation3] sm:$0xf] %vm2259_vm15, %v2164_v15  ;;  %2725 = vrot.lane.b32.xlu0 %v2647_v54, %s6964_s30  ;;  %v8110_v16 = vrot.slane %v3004_v45, 5  ;;  %v8112_v22 = vrot.slane %v3008_v7, 4  ;;  %v1367_v61 = vrot.slane %v8057_v8, 4  ;;  %v1371_v50 = vrot.slane %v1369_v51, 7 }
 0x23a   : > { %v3265_v44 = vpop.permute.xlu1 %3264  ;;  %3890 = vst.msk [vmem:[#allocation3 + $0x10] sm:$0xf] %vm3885_vm10, %v7992_v3  ;;  %1616 = vst [vmem:[#allocation2 + $0xa4] sm:$0x1] %v1615_v46  ;;  %v3041_v3 = vsel %vm7376_vm14, %v3036_v1, %v8053_v49  ;;  %v4072_v9 = vshll.u32 %v8087_v27, 16  ;;  %v4076_v48 = vshrl.u32 %v8087_v27, 16 }
 0x23b   : > { %2600 = vst.msk [vmem:[#allocation3] sm:$0xf] %vm2599_vm0, %v7817_v14  ;;  %v2843_v14 = vld [vmem:[#allocation2 + $0x50] sm:$0x1]  ;;  %v2166_v8 = vpop.permute.xlu0 %2165  ;;  %v1747_v55 = vld [vmem:[#allocation2 + $0x4c] sm:$0xf]  ;;  %v1374_v49 = vor.u32 %v1372_v43, %v1371_v50 }
 0x23c   : > { %1613 = vst.msk [vmem:[#allocation2 + $0xa0] sm:$0xf] %vm1516_vm5, %v1392_v38  ;;  %3284 = vrot.lane.b32.xlu1 %v3041_v3, %s6969_s14  ;;  %v1376_v31 = vrot.slane %v1371_v50, 4  ;;  %v1926_v59 = vrot.slane %v1924_v17, 4  ;;  %v1929_v53 = vrot.slane %v1927_v41, 5  ;;  %v3014_v45 = vshll.u32 %v2843_v14, 16 }
 0x23d   : > { %3358 = vst.msk [vmem:[#allocation3 + $0xc] sm:$0xf] %vm3354_vm6, %v3265_v44  ;;  %3813 = vrot.lane.b32.xlu0 %v3737_v12, %s6968_s28  ;;  %v1375_v7 = vsel %vm7316_vm8, %v1367_v61, %v1374_v49  ;;  %v4078_v10 = vrot.slane %v4076_v48, 4  ;;  %v1933_v58 = vshll.u32 %v1747_v55, 16  ;;  %v1937_v40 = vshrl.u32 %v1747_v55, 16 }
 0x23e   : > { %2794 = vst.msk [vmem:[#allocation3] sm:$0xf] %vm2793_vm1, %v7663_v37  ;;  %v3002_v37 = vrot.slane %v3001_v33, 4  ;;  %v4353_v32 = vpop.permute.xlu1 %4352  ;;  %v1930_v1 = vor.u32 %v1929_v53, %v1926_v59  ;;  %v3016_v33 = vrot.slane %v3014_v45, 5  ;;  %v1684_v17 = vld [vmem:[#allocation2 + $0x78] sm:$0xf] }
 0x23f   : > { %3695 = vst.msk [vmem:[#allocation3 + $0xc] sm:$0xf] %vm3691_vm9, %v7919_v60  ;;  %v4069_v60 = vor.u32 %v8098_v63, %v8092_v57  ;;  %v1935_v25 = vrot.slane %v1933_v58, 5  ;;  %v1939_v15 = vrot.slane %v1937_v40, 4  ;;  %v1748_v57 = vld [vmem:[#allocation2 + $0x50] sm:$0x1] }
 0x240   : > { %3355 = vst.msk [vmem:[#allocation3] sm:$0xf] %vm3354_vm6, %v7737_v19  ;;  %v1607_v19 = vld [vmem:[#allocation2 + $0x98] sm:$0x1]  ;;  %v1685_v51 = vld [vmem:[#allocation2 + $0x7c] sm:$0xf] }
 0x241   : > { %3889 = vst.msk [vmem:[#allocation3 + $0xc] sm:$0xf] %vm3885_vm10, %v7755_v36  ;;  %v2648_v36 = vld [vmem:[#allocation2 + $0x64] sm:$0xf]  ;;  %v1931_v54 = vrot.slane %v1930_v1, 4 }
 0x242   : > { %3692 = vst.msk [vmem:[#allocation3] sm:$0xf] %vm3691_vm9, %v7687_v26  ;;  %v3011_v26 = vor.u32 %v8112_v22, %v8110_v16  ;;  %2727 = vrot.lane.b32.xlu1 %v2648_v36, %s6964_s30  ;;  %v4500_v63 = vld [vmem:[#allocation2 + $0x6c] sm:$0xe]  ;;  %v4501_v38 = vld [vmem:[#allocation2 + $0x70] sm:$0xf] }
 0x243   : > { %2261 = vst.msk [vmem:[#allocation3 + $0x4] sm:$0xf] %vm2259_vm15, %v2166_v8  ;;  %v1943_v22 = vshll.u32 %v1748_v57, 16  ;;  %v1936_v61 = vsel %vm7376_vm14, %v1931_v54, %v1935_v25  ;;  %v6038_v50 = vrot.slane %v4500_v63, 9  ;;  %v4626_v3 = vrot.slane %v4501_v38, 5 }
 0x244   : > { %4450 = vst.msk [vmem:[#allocation3 + $0xc] sm:$0xf] %vm4446_vm11, %v7977_v47  ;;  %v1608_v47 = vsel %vm7250_vm2, %v1376_v31, %v1607_v19  ;;  %v2320_v48 = vld [vmem:[#allocation2 + $0x70] sm:$0xf]  ;;  %v3411_v19 = vld [vmem:[#allocation2 + $0x6c] sm:$0xe] }
 0x245   : > { %3886 = vst.msk [vmem:[#allocation3] sm:$0xf] %vm3885_vm10, %v7793_v21  ;;  %v4074_v21 = vrot.slane %v4072_v9, 5  ;;  %1609 = vst [vmem:[#allocation2 + $0x98] sm:$0x1] %v1608_v47  ;;  %v1945_v12 = vrot.slane %v1943_v22, 5 }
 0x246   : > { %2601 = vst.msk [vmem:[#allocation3 + $0x4] sm:$0xf] %vm2599_vm0, %v7909_v29  ;;  %v3932_v29 = vld [vmem:[#allocation2 + $0x50] sm:$0x1]  ;;  %v2319_v9 = vld [vmem:[#allocation2 + $0x6c] sm:$0xe] }
 0x247   : > { %4787 = vst.msk [vmem:[#allocation3 + $0xc] sm:$0xf] %vm4783_vm13, %v7877_v42  ;;  %v8161_v42 = vpop.permute.xlu0 %4699  ;;  %v4082_v27 = vshll.u32 %v3932_v29, 16  ;;  %v4079_v56 = vor.u32 %v4078_v10, %v4074_v21  ;;  %v6008_v59 = vrot.slane %v2319_v9, 9  ;;  %v2456_v53 = vrot.slane %v2320_v48, 5 }
 0x248   : > { %4447 = vst.msk [vmem:[#allocation3] sm:$0xf] %vm4446_vm11, %v8037_v28  ;;  %v4070_v28 = vrot.slane %v4069_v60, 4  ;;  %v4627_v60 = vsel %vm7348_vm12, %v6038_v50, %v4626_v3  ;;  %v2321_v29 = vld [vmem:[#allocation2 + $0x74] sm:$0x1]  ;;  %v6023_v10 = vrot.slane %v3411_v19, 9 }
 0x249   : > { %2795 = vst.msk [vmem:[#allocation3 + $0x4] sm:$0xf] %vm2793_vm1, %v7678_v52  ;;  %v3007_v52 = vsel %vm7376_vm14, %v3002_v37, %v8110_v16  ;;  %v4084_v41 = vrot.slane %v4082_v27, 5  ;;  %v4080_v44 = vrot.slane %v4079_v56, 4  ;;  %v1940_v16 = vor.u32 %v1939_v15, %v1935_v25  ;;  %v4502_v37 = vld [vmem:[#allocation2 + $0x74] sm:$0x1] }
 0x24a   : > { %1606 = vst.msk [vmem:[#allocation2 + $0x94] sm:$0xf] %vm1516_vm5, %v1375_v7  ;;  %3278 = vrot.lane.b32.xlu0 %v3007_v52, %s6969_s14  ;;  %v4075_v43 = vsel %vm7376_vm14, %v4070_v28, %v4074_v21  ;;  %1716 = vst.msk [vmem:[#allocation3 + $0x50] sm:$0xf] %vm1516_vm5, %v1684_v17  ;;  %v4628_v7 = vrot.slane %v4626_v3, 4  ;;  %v4629_v47 = vrot.slane %v4502_v37, 5  ;;  %v2457_v52 = vsel %vm7348_vm12, %v6008_v59, %v2456_v53 }
 0x24b   : > { %4784 = vst.msk [vmem:[#allocation3] sm:$0xf] %vm4783_vm13, %v7925_v62  ;;  %v2174_v62 = vpop.permute.xlu1 %2173  ;;  %v4085_v8 = vsel %vm7376_vm14, %v4080_v44, %v4084_v41  ;;  %v1687_v40 = vld [vmem:[#allocation2 + $0x88] sm:$0xf]  ;;  %v8225_v28 = vld [vmem:[#allocation2 + $0x64] sm:$0xf] }
 0x24c   : > { %3356 = vst.msk [vmem:[#allocation3 + $0x4] sm:$0xf] %vm3354_vm6, %v7823_v4  ;;  %v3738_v4 = vld [vmem:[#allocation2 + $0x64] sm:$0xf]  ;;  %v3413_v27 = vld [vmem:[#allocation2 + $0x74] sm:$0x1]  ;;  %v4630_v56 = vsel %vm7348_vm12, %v4628_v7, %v4629_v47 }
 0x24d   : > { %3693 = vst.msk [vmem:[#allocation3 + $0x4] sm:$0xf] %vm3691_vm9, %v7721_v6  ;;  %v3012_v6 = vrot.slane %v3011_v26, 4  ;;  %3815 = vrot.lane.b32.xlu1 %v3738_v4, %s6968_s28  ;;  %v3939_v26 = vld [vmem:[#allocation2 + $0x6c] sm:$0xf]  ;;  %v2458_v25 = vrot.slane %v2456_v53, 4 }
 0x24e   : > { %3887 = vst.msk [vmem:[#allocation3 + $0x4] sm:$0xf] %vm3885_vm10, %v7869_v5  ;;  %v8178_v5 = vpop.permute.xlu0 %2523  ;;  %4366 = vrot.lane.b32.xlu0 %v4075_v43, %s6971_s17  ;;  %v6731_v31 = vld [vmem:[#allocation3 + $0x8] sm:$0xff]   ;;  %v4135_v1 = vshrl.u32 %v3939_v26, 16  ;;  %v8231_v4 = vld [vmem:[#allocation2 + $0x68] sm:$0x1] }
 0x24f   : > { %4448 = vst.msk [vmem:[#allocation3 + $0x4] sm:$0xf] %vm4446_vm11, %v4353_v32  ;;  %v3017_v46 = vsel %vm7376_vm14, %v3012_v6, %v3016_v33  ;;  %v3412_v32 = vld [vmem:[#allocation2 + $0x70] sm:$0xf]  ;;  %v8233_v6 = vld [vmem:[#allocation2 + $0x64] sm:$0xf] }
 0x250   : > { %2265 = vst.msk [vmem:[#allocation3 + $0x14] sm:$0xf] %vm2259_vm15, %v2174_v62  ;;  %v3541_v58 = vrot.slane %v3412_v32, 5  ;;  %v4138_v62 = vshll.u32 %v3939_v26, 16  ;;  %v2459_v15 = vrot.slane %v2321_v29, 5  ;;  %v3534_v63 = vrot.slane %v8225_v28, 5 }
 0x251   : > { %4785 = vst.msk [vmem:[#allocation3 + $0x4] sm:$0xf] %vm4783_vm13, %v7929_v20  ;;  %v1686_v20 = vld [vmem:[#allocation2 + $0x84] sm:$0xf]  ;;  %3280 = vrot.lane.b32.xlu1 %v3017_v46, %s6969_s14  ;;  %v8237_v57 = vld [vmem:[#allocation2 + $0x60] sm:$0xe] }
 0x252   : > { %2605 = vst.msk [vmem:[#allocation3 + $0x14] sm:$0xf] %vm2599_vm0, %v7940_v30  ;;  %v8188_v30 = vpop.permute.xlu1 %4701  ;;  %2187 = vrot.lane.b32.xlu0 %v1936_v61, %s6967_s19  ;;  %v3940_v17 = vld [vmem:[#allocation2 + $0x70] sm:$0xf]  ;;  %v3542_v54 = vsel %vm7348_vm12, %v6023_v10, %v3541_v58  ;;  %v1755_v41 = vld [vmem:[#allocation2 + $0x6c] sm:$0xf] }
 0x253   : > { %2799 = vst.msk [vmem:[#allocation3 + $0x14] sm:$0xf] %vm2793_vm1, %v7779_v2  ;;  %v9371_v2 = vld [vmem:[#allocation26_spill] sm:$0xff]  ;;  %v999_v38 = vld [vmem:[#allocation2 + $0xb4] sm:$0x1]  ;;  %v4137_v46 = vrot.slane %v4135_v1, 4 }
 0x254   : > { %1717 = vst.msk [vmem:[#allocation3 + $0x54] sm:$0xf] %vm1516_vm5, %v1685_v51  ;;  %1718 = vst.msk [vmem:[#allocation3 + $0x58] sm:$0xf] %vm1516_vm5, %v1686_v20  ;;  %v8239_v51 = vld [vmem:[#allocation2 + $0x64] sm:$0xf] }
 0x255   : > { %3360 = vst.msk [vmem:[#allocation3 + $0x14] sm:$0xf] %vm3354_vm6, %v8019_v39  ;;  %v8199_v39 = vpop.permute.xlu0 %3611  ;;  %4368 = vrot.lane.b32.xlu1 %v4085_v8, %s6971_s17  ;;  %v4499_v20 = vld [vmem:[#allocation2 + $0x68] sm:$0x1]  ;;  %v4140_v44 = vrot.slane %v4138_v62, 5  ;;  %v1000_v61 = vsel %vm7250_vm2, 0, %v999_v38 }
 0x256   : > { %3697 = vst.msk [vmem:[#allocation3 + $0x14] sm:$0xf] %vm3691_vm9, %v9371_v2  ;;  %v8203_v14 = vpop.permute.xlu1 %2525  ;;  %4715 = vrot.lane.b32.xlu0 %v4627_v60, %s6970_s25  ;;  %v4619_v2 = vrot.slane %v8233_v6, 5  ;;  %v4497_v22 = vld [vmem:[#allocation2 + $0x60] sm:$0xe]  ;;  %v3543_v3 = vrot.slane %v3541_v58, 4 }
 0x257   : > { %3891 = vst.msk [vmem:[#allocation3 + $0x14] sm:$0xf] %vm3885_vm10, %v8076_v24  ;;  %v1941_v24 = vrot.slane %v1940_v16, 4  ;;  %v8248_v16 = vld [vmem:[#allocation2 + $0x68] sm:$0x1]  ;;  %v3544_v9 = vrot.slane %v3413_v27, 5  ;;  %v4141_v10 = vor.u32 %v4140_v44, %v4137_v46 }
 0x258   : > { %v6730_v55 = vld [vmem:[#allocation3] sm:$0xff]   ;;  %1719 = vst.msk [vmem:[#allocation3 + $0x5c] sm:$0xf] %vm1516_vm5, %v1687_v40  ;;  %v3537_v48 = vrot.slane %v8231_v4, 5  ;;  %v8256_v8 = vld [vmem:[#allocation2 + $0x70] sm:$0xf] }
 0x259   : > { %v8209_v49 = vpop.permute.xlu0 %3809  ;;  %6512 = vmatprep.mubr.msk.bf16.mxu0 %vm4971_vm3, %v6730_v55  ;;  %v1946_v45 = vsel %vm7376_vm14, %v1941_v24, %v1945_v12  ;;  %1001 = vst [vmem:[#allocation2 + $0xb4] sm:$0x1] %v1000_v61  ;;  %v996_v24 = vld [vmem:[#allocation2 + $0xa8] sm:$0x1]  ;;  %v2460_v12 = vsel %vm7348_vm12, %v2458_v25, %v2459_v15  ;;  %v3743_v55 = vld [vmem:[#allocation2 + $0x84] sm:$0xf]  ;;  %v3545_v40 = vsel %vm7348_vm12, %v3543_v3, %v3544_v9 }
 0x25a   : > { %v8214_v36 = vpop.permute.xlu1 %3613  ;;  %6513 = vmatmul.mubr.msk.bf16.vlgmr.msra.gmra.mxu0 %vm4971_vm3, %v6731_v31  ;;  %2189 = vrot.lane.b32.xlu1 %v1946_v45, %s6967_s19  ;;  %v2449_v31 = vrot.slane %v8239_v51, 5  ;;  %v1996_v37 = vshrl.u32 %v1755_v41, 16  ;;  %v1999_v60 = vshll.u32 %v1755_v41, 16  ;;  %v6022_v53 = vrot.slane %v8237_v57, 9  ;;  %v1055_v45 = vld [vmem:[#allocation2 + $0xbc] sm:$0x1] }
 0x25b   : > { %2539 = vrot.lane.b32.xlu0 %v2457_v52, %s6965_s11  ;;  %v4144_v19 = vshll.u32 %v3940_v17, 16  ;;  %v4148_v32 = vshrl.u32 %v3940_v17, 16  ;;  %v997_v26 = vsel %vm7250_vm2, 0, %v996_v24  ;;  %v3536_v7 = vrot.slane %v3534_v63, 4  ;;  %v1052_v25 = vld [vmem:[#allocation2 + $0xb0] sm:$0x1] }
 0x25c   : > { %v4621_v47 = vrot.slane %v4619_v2, 4  ;;  %v4622_v29 = vrot.slane %v4499_v20, 5  ;;  %998 = vst [vmem:[#allocation2 + $0xa8] sm:$0x1] %v997_v26  ;;  %v2452_v52 = vrot.slane %v8248_v16, 5  ;;  %v6037_v28 = vrot.slane %v4497_v22, 9 }
 0x25d   : > { %v8221_v21 = vpop.permute.xlu0 %2721  ;;  %v1056_v1 = vsel %vm7259_vm4, 0, %v1055_v45  ;;  %v2451_v62 = vrot.slane %v2449_v31, 4  ;;  %v8277_v27 = vrot.slane %v1996_v37, 4  ;;  %v2001_v4 = vrot.slane %v1999_v60, 5  ;;  %v3941_v17 = vld [vmem:[#allocation2 + $0x74] sm:$0x1] }
 0x25e   : > { %v8228_v33 = vpop.permute.xlu1 %3609  ;;  %4717 = vrot.lane.b32.xlu1 %v4630_v56, %s6970_s25  ;;  %v2005_v6 = vshll.u32 %v8256_v8, 16  ;;  %v6496_v56 = vpop.f32.mrf.mxu0  ;;  %1057 = vst [vmem:[#allocation2 + $0xbc] sm:$0x1] %v1056_v1  ;;  %v4146_v57 = vrot.slane %v4144_v19, 5  ;;  %v1053_v41 = vsel %vm7259_vm4, 0, %v1052_v25  ;;  %v3538_v38 = vsel %vm7348_vm12, %v3536_v7, %v3537_v48 }
 0x25f   : > { %3627 = vrot.lane.b32.xlu0 %v3542_v54, %s6966_s26  ;;  %v4150_v54 = vrot.slane %v4148_v32, 4  ;;  %v875_v20 = vadd.f32 %v7985_v13, %v6496_v56  ;;  %v3535_v46 = vsel %vm7348_vm12, %v6022_v53, %v3534_v63  ;;  %v4623_v44 = vsel %vm7348_vm12, %v4621_v47, %v4622_v29  ;;  %1054 = vst [vmem:[#allocation2 + $0xb0] sm:$0x1] %v1053_v41  ;;  %v8298_v24 = vld [vmem:[#allocation2 + $0x60] sm:$0xe] }
 0x260   : > { %v4142_v16 = vrot.slane %v4141_v10, 4  ;;  %v866_v22 = vpop.f32.mrf.mxu0  ;;  %v4620_v3 = vsel %vm7348_vm12, %v6037_v28, %v4619_v2  ;;  %v2009_v9 = vshrl.u32 %v8256_v8, 16  ;;  %v2850_v48 = vld [vmem:[#allocation2 + $0x6c] sm:$0xf]  ;;  %v2002_v37 = vor.u32 %v2001_v4, %v8277_v27  ;;  %v8307_v8 = vld [vmem:[#allocation2 + $0x74] sm:$0x1] }
 0x261   : > { %v8242_v43 = vpop.permute.xlu0 %3607  ;;  %v867_v63 = vadd.f32 %v7985_v13, %v866_v22  ;;  %v8304_v60 = vrot.slane %v2005_v6, 5  ;;  %v4154_v53 = vshll.u32 %v3941_v17, 16  ;;  %v4151_v32 = vor.u32 %v4150_v54, %v4146_v57  ;;  %v2851_v54 = vld [vmem:[#allocation2 + $0x70] sm:$0xf] }
 0x262   : > { %v8252_v50 = vpop.permute.xlu1 %4697  ;;  %2541 = vrot.lane.b32.xlu1 %v2460_v12, %s6965_s11  ;;  %v927_v12 = vmax.f32 %v875_v20, 0.0  ;;  %v6497_v19 = vpop.f32.mrf.mxu0  ;;  %v4147_v47 = vsel %vm7376_vm14, %v4142_v16, %v4146_v57  ;;  %v6007_v29 = vrot.slane %v8298_v24, 9  ;;  %v3067_v10 = vshrl.u32 %v2850_v48, 16 }
 0x263   : > { %3825 = vrot.lane.b32.xlu0 %v3743_v55, %s6968_s28  ;;  %v2453_v55 = vsel %vm7348_vm12, %v2451_v62, %v2452_v52  ;;  %v925_v45 = vmax.f32 %v867_v63, 0.0  ;;  %v878_v7 = vadd.f32 %v7985_v13, %v6497_v19  ;;  %v8319_v6 = vrot.slane %v4154_v53, 5 }
 0x264   : > { %v6165_v26 = vpack.c.bf16 %v927_v12, %v927_v12  ;;  %v869_v52 = vpop.f32.mrf.mxu0  ;;  %v8321_v56 = vrot.slane %v2009_v9, 4  ;;  %v2015_v25 = vshll.u32 %v8307_v8, 16  ;;  %v3069_v16 = vrot.slane %v3067_v10, 4 }
 0x265   : > { %v8262_v59 = vpop.permute.xlu0 %4362  ;;  %v6163_v27 = vpack.c.bf16 %v925_v45, %v925_v45  ;;  %v928_v4 = vmax.f32 %v878_v7, 0.0  ;;  %v870_v57 = vadd.f32 %v7985_v13, %v869_v52  ;;  %v8331_v63 = vrot.slane %v4151_v32, 4 }
 0x266   : > { %v8267_v58 = vpop.permute.xlu1 %2521  ;;  %3629 = vrot.lane.b32.xlu1 %v3545_v40, %s6966_s26  ;;  %v3070_v40 = vshll.u32 %v2850_v48, 16  ;;  %v1412_v1 = vshrl.u32 %v6165_v26, 16  ;;  %v1415_v62 = vshll.u32 %v6165_v26, 16  ;;  %v1624_v48 = vld [vmem:[#allocation2 + $0xb4] sm:$0xf]  ;;  %v3076_v19 = vshll.u32 %v2851_v54, 16 }
 0x267   : > { %3623 = vrot.lane.b32.xlu0 %v3535_v46, %s6966_s26  ;;  %v1395_v20 = vshrl.u32 %v6163_v27, 16  ;;  %v1398_v41 = vshll.u32 %v6163_v27, 16  ;;  %v2003_v46 = vrot.slane %v2002_v37, 4  ;;  %v926_v12 = vmax.f32 %v870_v57, 0.0  ;;  %v1617_v26 = vld [vmem:[#allocation2 + $0xa8] sm:$0xf] }
 0x268   : > { %v3072_v22 = vrot.slane %v3070_v40, 5 }
 0x269   : > { %v8281_v15 = vpop.permute.xlu0 %4695  ;;  %v6164_v7 = vpack.c.bf16 %v926_v12, %v926_v12  ;;  %v2008_v32 = vsel %vm7376_vm14, %v2003_v46, %v8304_v60 }
 0x26a   : > { %v8292_v61 = vpop.permute.xlu1 %3811  ;;  %3625 = vrot.lane.b32.xlu1 %v3538_v38, %s6966_s26  ;;  %v6166_v38 = vpack.c.bf16 %v928_v4, %v928_v4  ;;  %v3073_v52 = vor.u32 %v3072_v22, %v3069_v16 }
 0x26b   : > { %4378 = vrot.lane.b32.xlu0 %v4147_v47, %s6971_s17  ;;  %v1403_v27 = vshrl.u32 %v6164_v7, 16  ;;  %v1406_v4 = vshll.u32 %v6164_v7, 16 }
 0x26c   : > { %v1420_v53 = vshrl.u32 %v6166_v38, 16  ;;  %v1423_v45 = vshll.u32 %v6166_v38, 16  ;;  %v3078_v38 = vrot.slane %v3076_v19, 5 }
 0x26d   : > { %v2184_v2 = vpop.permute.xlu0 %2183  ;;  %v1405_v22 = vrot.slane %v1403_v27, 7 }
 0x26e   : > { %2270 = vst.msk [vmem:[#allocation3 + $0x28] sm:$0xf] %vm2259_vm15, %v2184_v2  ;;  %v8314_v28 = vpop.permute.xlu1 %2723  ;;  %4713 = vrot.lane.b32.xlu1 %v4623_v44, %s6970_s25  ;;  %v1397_v44 = vrot.slane %v1395_v20, 7  ;;  %v3080_v2 = vshrl.u32 %v2851_v54, 16 }
 0x26f   : > { %2610 = vst.msk [vmem:[#allocation3 + $0x28] sm:$0xf] %vm2599_vm0, %v8178_v5  ;;  %v1414_v5 = vrot.slane %v1412_v1, 7  ;;  %4711 = vrot.lane.b32.xlu0 %v4620_v3, %s6970_s25  ;;  %v1422_v3 = vrot.slane %v1420_v53, 7  ;;  %v2847_v1 = vld [vmem:[#allocation2 + $0x60] sm:$0xf]  ;;  %v1408_v51 = vor.u32 %v1406_v4, %v1405_v22 }
 0x270   : > { %v1400_v40 = vor.u32 %v1398_v41, %v1397_v44  ;;  %v3744_v41 = vld [vmem:[#allocation2 + $0x88] sm:$0xf]  ;;  %v3082_v46 = vrot.slane %v3080_v2, 4  ;;  %v1401_v16 = vrot.slane %v1397_v44, 4  ;;  %v3043_v12 = vshrl.u32 %v2847_v1, 16 }
 0x271   : > { %v8326_v17 = vpop.permute.xlu0 %2519  ;;  %v1417_v13 = vor.u32 %v1415_v62, %v1414_v5  ;;  %v1418_v47 = vrot.slane %v1414_v5, 4  ;;  %v1628_v62 = vld [vmem:[#allocation2 + $0xbc] sm:$0x1]  ;;  %v1425_v5 = vor.u32 %v1423_v45, %v1422_v3  ;;  %v1427_v20 = vrot.slane %v1422_v3, 4  ;;  %v1621_v53 = vld [vmem:[#allocation2 + $0xb0] sm:$0x1] }
 0x272   : > { %v8328_v9 = vpop.permute.xlu1 %4364  ;;  %2537 = vrot.lane.b32.xlu1 %v2453_v55, %s6965_s11  ;;  %v2012_v55 = vor.u32 %v8321_v56, %v8304_v60  ;;  %v1618_v54 = vsel %vm7305_vm7, %v1400_v40, %v1617_v26  ;;  %v2450_v60 = vsel %vm7348_vm12, %v6007_v29, %v2449_v31  ;;  %v2852_v56 = vld [vmem:[#allocation2 + $0x74] sm:$0x1]  ;;  %v3046_v19 = vshll.u32 %v2847_v1, 16  ;;  %v3936_v2 = vld [vmem:[#allocation2 + $0x60] sm:$0xf] }
 0x273   : > { %v1625_v10 = vsel %vm7305_vm7, %v1417_v13, %v1624_v48  ;;  %2199 = vrot.lane.b32.xlu0 %v2008_v32, %s6967_s19  ;;  %1619 = vst [vmem:[#allocation2 + $0xa8] sm:$0xf] %v1618_v54  ;;  %v1426_v13 = vsel %vm7316_vm8, %v1418_v47, %v1425_v5  ;;  %v1629_v44 = vsel %vm7250_vm2, %v1427_v20, %v1628_v62  ;;  %v1410_v24 = vrot.slane %v1405_v22, 4  ;;  %v1752_v4 = vld [vmem:[#allocation2 + $0x60] sm:$0xf] }
 0x274   : > { %1626 = vst [vmem:[#allocation2 + $0xb4] sm:$0xf] %v1625_v10  ;;  %1627 = vst.msk [vmem:[#allocation2 + $0xb8] sm:$0xf] %vm1516_vm5, %v1426_v13  ;;  %v4157_v29 = vsel %vm7376_vm14, %v8331_v63, %v8319_v6  ;;  %v2013_v26 = vrot.slane %v2012_v55, 4  ;;  %v2017_v45 = vrot.slane %v2015_v25, 5  ;;  %v3083_v7 = vor.u32 %v3082_v46, %v3078_v38 }
 0x275   : > { %v8334_v37 = vpop.permute.xlu0 %3274  ;;  %1630 = vst [vmem:[#allocation2 + $0xbc] sm:$0x1] %v1629_v44  ;;  %v3086_v47 = vshll.u32 %v2852_v56, 16  ;;  %v2848_v10 = vld [vmem:[#allocation2 + $0x64] sm:$0xf]  ;;  %v1409_v40 = vsel %vm7316_vm8, %v1401_v16, %v1408_v51  ;;  %v1622_v3 = vsel %vm7250_vm2, %v1410_v24, %v1621_v53  ;;  %v4111_v6 = vshrl.u32 %v3936_v2, 16 }
 0x276   : > { %v2186_v57 = vpop.permute.xlu1 %2185  ;;  %3827 = vrot.lane.b32.xlu1 %v3744_v41, %s6968_s28  ;;  %v4114_v63 = vshll.u32 %v3936_v2, 16  ;;  %1620 = vst.msk [vmem:[#allocation2 + $0xac] sm:$0xf] %vm1516_vm5, %v1409_v40  ;;  %1623 = vst [vmem:[#allocation2 + $0xb0] sm:$0x1] %v1622_v3  ;;  %v3045_v25 = vrot.slane %v3043_v12, 4 }
 0x277   : > { %2271 = vst.msk [vmem:[#allocation3 + $0x2c] sm:$0xf] %vm2259_vm15, %v2186_v57  ;;  %2535 = vrot.lane.b32.xlu0 %v2450_v60, %s6965_s11  ;;  %v3052_v62 = vshll.u32 %v2848_v10, 16  ;;  %v3056_v27 = vshrl.u32 %v2848_v10, 16  ;;  %v2018_v57 = vsel %vm7376_vm14, %v2013_v26, %v2017_v45  ;;  %v3084_v55 = vrot.slane %v3083_v7, 4  ;;  %v9372_v44 = vld [vmem:[#allocation24_spill] sm:$0xff] }
 0x278   : > { %2611 = vst.msk [vmem:[#allocation3 + $0x2c] sm:$0xf] %vm2599_vm0, %v8203_v14  ;;  %v3074_v14 = vrot.slane %v3073_v52, 4  ;;  %v3048_v52 = vrot.slane %v3046_v19, 5  ;;  %v3088_v54 = vrot.slane %v3086_v47, 5  ;;  %v4113_v41 = vrot.slane %v4111_v6, 4 }
 0x279   : > { %v2718_v48 = vpop.permute.xlu0 %2717  ;;  %v3937_v20 = vld [vmem:[#allocation2 + $0x64] sm:$0xf]  ;;  %v2651_v46 = vld [vmem:[#allocation2 + $0x78] sm:$0xf]  ;;  %v1972_v22 = vshrl.u32 %v1752_v4, 16  ;;  %v3054_v56 = vrot.slane %v3052_v62, 5 }
 0x27a   : > { %2804 = vst.msk [vmem:[#allocation3 + $0x28] sm:$0xf] %vm2793_vm1, %v2718_v48  ;;  %v8362_v31 = vpop.permute.xlu1 %3276  ;;  %4380 = vrot.lane.b32.xlu1 %v4157_v29, %s6971_s17  ;;  %v3079_v8 = vsel %vm7376_vm14, %v3074_v14, %v3078_v38  ;;  %v4116_v38 = vrot.slane %v4114_v63, 5  ;;  %v3049_v16 = vor.u32 %v3048_v52, %v3045_v25  ;;  %v1975_v48 = vshll.u32 %v1752_v4, 16  ;;  %v2849_v53 = vld [vmem:[#allocation2 + $0x68] sm:$0x1] }
 0x27b   : > { %3290 = vrot.lane.b32.xlu0 %v3079_v8, %s6969_s14  ;;  %v3058_v12 = vrot.slane %v3056_v27, 4  ;;  %v3089_v13 = vsel %vm7376_vm14, %v3084_v55, %v3088_v54  ;;  %v4120_v14 = vshll.u32 %v3937_v20, 16  ;;  %v4124_v19 = vshrl.u32 %v3937_v20, 16  ;;  %v1753_v51 = vld [vmem:[#allocation2 + $0x64] sm:$0xf] }
 0x27c   : > { %v3741_v24 = vld [vmem:[#allocation2 + $0x78] sm:$0xf]  ;;  %v3050_v29 = vrot.slane %v3049_v16, 4  ;;  %v1974_v26 = vrot.slane %v1972_v22, 4  ;;  %v1977_v45 = vrot.slane %v1975_v48, 5  ;;  %v3062_v10 = vshll.u32 %v2849_v53, 16 }
 0x27d   : > { %v8376_v32 = vpop.permute.xlu0 %3805  ;;  %v2652_v47 = vld [vmem:[#allocation2 + $0x7c] sm:$0xf]  ;;  %v2853_v40 = vld [vmem:[#allocation2 + $0x78] sm:$0xf]  ;;  %v4122_v3 = vrot.slane %v4120_v14, 5  ;;  %v1981_v6 = vshll.u32 %v1753_v51, 16 }
 0x27e   : > { %v2720_v1 = vpop.permute.xlu1 %2719  ;;  %2201 = vrot.lane.b32.xlu1 %v2018_v57, %s6967_s19  ;;  %v1985_v63 = vshrl.u32 %v1753_v51, 16  ;;  %v3946_v8 = vld [vmem:[#allocation2 + $0x88] sm:$0xf]  ;;  %v3742_v62 = vld [vmem:[#allocation2 + $0x7c] sm:$0xf]  ;;  %v3055_v27 = vsel %vm7376_vm14, %v3050_v29, %v3054_v56  ;;  %v1978_v4 = vor.u32 %v1977_v45, %v1974_v26  ;;  %v3091_v57 = vshrl.u32 %v2853_v40, 16 }
 0x27f   : > { %2805 = vst.msk [vmem:[#allocation3 + $0x2c] sm:$0xf] %vm2793_vm1, %v2720_v1  ;;  %2733 = vrot.lane.b32.xlu0 %v2651_v46, %s6964_s30  ;;  %v9373_v1 = vld [vmem:[#allocation27_spill] sm:$0xff]  ;;  %v3094_v55 = vshll.u32 %v2853_v40, 16  ;;  %v3064_v20 = vrot.slane %v3062_v10, 5  ;;  %v4196_v46 = vshrl.u32 %v3946_v8, 16 }
 0x280   : > { %v3942_v54 = vld [vmem:[#allocation2 + $0x78] sm:$0xf]  ;;  %v9374_v16 = vld [vmem:[#allocation25_spill] sm:$0xff]  ;;  %v1983_v48 = vrot.slane %v1981_v6, 5  ;;  %v1979_v14 = vrot.slane %v1978_v4, 4 }
 0x281   : > { %v3271_v5 = vpop.permute.xlu0 %3270  ;;  %v3945_v53 = vld [vmem:[#allocation2 + $0x84] sm:$0xf]  ;;  %v3415_v51 = vld [vmem:[#allocation2 + $0x7c] sm:$0xf]  ;;  %v4198_v26 = vrot.slane %v4196_v46, 4 }
 0x282   : > { %3361 = vst.msk [vmem:[#allocation3 + $0x18] sm:$0xf] %vm3354_vm6, %v3271_v5  ;;  %v8387_v60 = vpop.permute.xlu1 %3807  ;;  %3292 = vrot.lane.b32.xlu1 %v3089_v13, %s6969_s14  ;;  %v4159_v13 = vshrl.u32 %v3942_v54, 16  ;;  %v3943_v10 = vld [vmem:[#allocation2 + $0x7c] sm:$0xf]  ;;  %v4186_v6 = vshll.u32 %v3945_v53, 16 }
 0x283   : > { %3698 = vst.msk [vmem:[#allocation3 + $0x18] sm:$0xf] %vm3691_vm9, %v8242_v43  ;;  %v4117_v43 = vor.u32 %v4116_v38, %v4113_v41  ;;  %3821 = vrot.lane.b32.xlu0 %v3741_v24, %s6968_s28  ;;  %v1754_v41 = vld [vmem:[#allocation2 + $0x68] sm:$0x1]  ;;  %v4192_v38 = vshll.u32 %v3946_v8, 16  ;;  %v1984_v8 = vsel %vm7376_vm14, %v1979_v14, %v1983_v48 }
 0x284   : > { %3892 = vst.msk [vmem:[#allocation3 + $0x18] sm:$0xf] %vm3885_vm10, %v9372_v44  ;;  %v4162_v44 = vshll.u32 %v3942_v54, 16  ;;  %v2854_v24 = vld [vmem:[#allocation2 + $0x7c] sm:$0xf]  ;;  %v4161_v40 = vrot.slane %v4159_v13, 4 }
 0x285   : > { %4453 = vst.msk [vmem:[#allocation3 + $0x18] sm:$0xf] %vm4446_vm11, %v8262_v59  ;;  %v4359_v2 = vpop.permute.xlu0 %4358  ;;  %v3059_v59 = vor.u32 %v3058_v12, %v3054_v56  ;;  %v4118_v52 = vrot.slane %v4117_v43, 4  ;;  %v1987_v56 = vrot.slane %v1985_v63, 4  ;;  %v8442_v29 = vrot.slane %v4192_v38, 5  ;;  %v9375_v63 = vld [vmem:[#allocation28_spill] sm:$0xff] }
 0x286   : > { %4790 = vst.msk [vmem:[#allocation3 + $0x18] sm:$0xf] %vm4783_vm13, %v8161_v42  ;;  %v3273_v7 = vpop.permute.xlu1 %3272  ;;  %v4126_v42 = vrot.slane %v4124_v19, 4  ;;  %2735 = vrot.lane.b32.xlu1 %v2652_v47, %s6964_s30  ;;  %v1991_v19 = vshll.u32 %v1754_v41, 16  ;;  %v2855_v46 = vld [vmem:[#allocation2 + $0x80] sm:$0x1] }
 0x287   : > { %4451 = vst.msk [vmem:[#allocation3 + $0x10] sm:$0xf] %vm4446_vm11, %v4359_v2  ;;  %3286 = vrot.lane.b32.xlu0 %v3055_v27, %s6969_s14  ;;  %v3060_v5 = vrot.slane %v3059_v59, 4  ;;  %v4123_v12 = vsel %vm7376_vm14, %v4118_v52, %v4122_v3  ;;  %v3093_v2 = vrot.slane %v3091_v57, 4  ;;  %v3947_v59 = vld [vmem:[#allocation2 + $0x8c] sm:$0x1]  ;;  %v4199_v4 = vor.u32 %v4198_v26, %v8442_v29 }
 0x288   : > { %4788 = vst.msk [vmem:[#allocation3 + $0x10] sm:$0xf] %vm4783_vm13, %v8281_v15  ;;  %v3938_v15 = vld [vmem:[#allocation2 + $0x68] sm:$0x1]  ;;  %v3548_v52 = vrot.slane %v3415_v51, 5  ;;  %v3104_v27 = vshrl.u32 %v2854_v24, 16 }
 0x289   : > { %3362 = vst.msk [vmem:[#allocation3 + $0x1c] sm:$0xf] %vm3354_vm6, %v3273_v7  ;;  %v2180_v25 = vpop.permute.xlu0 %2179  ;;  %v4130_v22 = vshll.u32 %v3938_v15, 16  ;;  %v1988_v7 = vor.u32 %v1987_v56, %v1983_v48  ;;  %v3416_v15 = vld [vmem:[#allocation2 + $0x80] sm:$0x1]  ;;  %v4202_v57 = vshll.u32 %v3947_v59, 16 }
 0x28a   : > { %3699 = vst.msk [vmem:[#allocation3 + $0x1c] sm:$0xf] %vm3691_vm9, %v8228_v33  ;;  %v4361_v33 = vpop.permute.xlu1 %4360  ;;  %3823 = vrot.lane.b32.xlu1 %v3742_v62, %s6968_s28  ;;  %v3100_v62 = vshll.u32 %v2854_v24, 16  ;;  %v3551_v48 = vrot.slane %v3416_v15, 5  ;;  %v8482_v26 = vld [vmem:[#allocation2 + $0x7c] sm:$0xf] }
 0x28b   : > { %3893 = vst.msk [vmem:[#allocation3 + $0x1c] sm:$0xf] %vm3885_vm10, %v9373_v1  ;;  %4374 = vrot.lane.b32.xlu0 %v4123_v12, %s6971_s17  ;;  %v4132_v45 = vrot.slane %v4130_v22, 5  ;;  %v3550_v22 = vrot.slane %v3548_v52, 4  ;;  %v4200_v12 = vrot.slane %v4199_v4, 4  ;;  %v4204_v13 = vrot.slane %v4202_v57, 5 }
 0x28c   : > { %2268 = vst.msk [vmem:[#allocation3 + $0x20] sm:$0xf] %vm2259_vm15, %v2180_v25  ;;  %v1993_v25 = vrot.slane %v1991_v19, 5 }
 0x28d   : > { %4454 = vst.msk [vmem:[#allocation3 + $0x1c] sm:$0xf] %vm4446_vm11, %v8328_v9  ;;  %4452 = vst.msk [vmem:[#allocation3 + $0x14] sm:$0xf] %vm4446_vm11, %v4361_v33  ;;  %v4127_v9 = vor.u32 %v4126_v42, %v4122_v3  ;;  %v4164_v3 = vrot.slane %v4162_v44, 5  ;;  %v4183_v42 = vshrl.u32 %v3945_v53, 16 }
 0x28e   : > { %2608 = vst.msk [vmem:[#allocation3 + $0x20] sm:$0xf] %vm2599_vm0, %v8326_v17  ;;  %v8424_v17 = vld [vmem:[#allocation2 + $0x78] sm:$0xe]  ;;  %v2182_v43 = vpop.permute.xlu1 %2181  ;;  %v1989_v33 = vrot.slane %v1988_v7, 4  ;;  %v3106_v44 = vrot.slane %v3104_v27, 4 }
 0x28f   : > { %4791 = vst.msk [vmem:[#allocation3 + $0x1c] sm:$0xf] %vm4783_vm13, %v8188_v30  ;;  %4789 = vst.msk [vmem:[#allocation3 + $0x14] sm:$0xf] %vm4783_vm13, %v8252_v50  ;;  %v8431_v30 = vpop.permute.xlu0 %4707  ;;  %v3096_v50 = vrot.slane %v3094_v55, 5  ;;  %v6024_v47 = vrot.slane %v8424_v17, 9  ;;  %2195 = vrot.lane.b32.xlu0 %v1984_v8, %s6967_s19  ;;  %v4165_v38 = vor.u32 %v4164_v3, %v4161_v40  ;;  %v3552_v40 = vsel %vm7348_vm12, %v3550_v22, %v3551_v48 }
 0x290   : > { %2802 = vst.msk [vmem:[#allocation3 + $0x20] sm:$0xf] %vm2793_vm1, %v9374_v16  ;;  %v4185_v16 = vrot.slane %v4183_v42, 4  ;;  %v1758_v53 = vld [vmem:[#allocation2 + $0x78] sm:$0xf]  ;;  %v1994_v14 = vsel %vm7376_vm14, %v1989_v33, %v1993_v25  ;;  %v4205_v3 = vsel %vm7376_vm14, %v4200_v12, %v4204_v13 }
 0x291   : > { %3363 = vst.msk [vmem:[#allocation3 + $0x20] sm:$0xf] %vm3354_vm6, %v8334_v37  ;;  %v3065_v37 = vsel %vm7376_vm14, %v3060_v5, %v3064_v20  ;;  %v3097_v1 = vor.u32 %v3096_v50, %v3093_v2  ;;  %v4168_v5 = vshll.u32 %v3943_v10, 16  ;;  %v4172_v20 = vshrl.u32 %v3943_v10, 16  ;;  %v3944_v50 = vld [vmem:[#allocation2 + $0x80] sm:$0x1] }
 0x292   : > { %3700 = vst.msk [vmem:[#allocation3 + $0x20] sm:$0xf] %vm3691_vm9, %v8199_v39  ;;  %v4128_v39 = vrot.slane %v4127_v9, 4  ;;  %3288 = vrot.lane.b32.xlu1 %v3065_v37, %s6969_s14  ;;  %v4188_v9 = vrot.slane %v4186_v6, 5  ;;  %v3110_v2 = vshll.u32 %v2855_v46, 16  ;;  %v4166_v51 = vrot.slane %v4165_v38, 4 }
 0x293   : > { %3894 = vst.msk [vmem:[#allocation3 + $0x20] sm:$0xf] %vm3885_vm10, %v8376_v32  ;;  %v8449_v32 = vpop.permute.xlu0 %2531  ;;  %v3098_v56 = vrot.slane %v3097_v1, 4  ;;  %v4170_v19 = vrot.slane %v4168_v5, 5  ;;  %v1759_v7 = vld [vmem:[#allocation2 + $0x7c] sm:$0xf] }
 0x294   : > { %2269 = vst.msk [vmem:[#allocation3 + $0x24] sm:$0xf] %vm2259_vm15, %v2182_v43  ;;  %v4133_v55 = vsel %vm7376_vm14, %v4128_v39, %v4132_v45  ;;  %v4174_v43 = vrot.slane %v4172_v20, 4  ;;  %v4189_v24 = vor.u32 %v4188_v9, %v4185_v16  ;;  %v8486_v45 = vld [vmem:[#allocation2 + $0x78] sm:$0xe]  ;;  %v2023_v59 = vshll.u32 %v1758_v53, 16 }
 0x295   : > { %2609 = vst.msk [vmem:[#allocation3 + $0x24] sm:$0xf] %vm2599_vm0, %v8267_v58  ;;  %v8457_v58 = vpop.permute.xlu1 %4709  ;;  %v4178_v6 = vshll.u32 %v3944_v50, 16  ;;  %v1760_v8 = vld [vmem:[#allocation2 + $0x80] sm:$0x1]  ;;  %v4633_v1 = vrot.slane %v8482_v26, 5  ;;  %v4171_v57 = vsel %vm7376_vm14, %v4166_v51, %v4170_v19 }
 0x296   : > { %2803 = vst.msk [vmem:[#allocation3 + $0x24] sm:$0xf] %vm2793_vm1, %v9375_v63  ;;  %v6732_v54 = vld [vmem:[#allocation3 + $0x10] sm:$0xff]   ;;  %4376 = vrot.lane.b32.xlu1 %v4133_v55, %s6971_s17  ;;  %v4505_v63 = vld [vmem:[#allocation2 + $0x80] sm:$0x1]  ;;  %v4175_v15 = vor.u32 %v4174_v43, %v4170_v19  ;;  %v4190_v55 = vrot.slane %v4189_v24, 4 }
 0x297   : > { %3364 = vst.msk [vmem:[#allocation3 + $0x24] sm:$0xf] %vm3354_vm6, %v8362_v31  ;;  %v6733_v31 = vld [vmem:[#allocation3 + $0x18] sm:$0xff]   ;;  %v8468_v41 = vpop.permute.xlu0 %3619  ;;  %6516 = vmatprep.mubr.msk.bf16.mxu0 %vm4971_vm3, %v6732_v54  ;;  %v1005_v25 = vld [vmem:[#allocation2 + $0xcc] sm:$0x1]  ;;  %v2029_v54 = vshll.u32 %v1759_v7, 16 }
 0x298   : > { %3701 = vst.msk [vmem:[#allocation3 + $0x24] sm:$0xf] %vm3691_vm9, %v8214_v36  ;;  %v3549_v36 = vsel %vm7348_vm12, %v6024_v47, %v3548_v52  ;;  %6517 = vmatmul.mubr.msk.bf16.gmra.mxu0 %vm4971_vm3, %v6733_v31  ;;  %v2020_v47 = vshrl.u32 %v1758_v53, 16  ;;  %v3112_v52 = vrot.slane %v3110_v2, 5  ;;  %v1002_v27 = vld [vmem:[#allocation2 + $0xc0] sm:$0x1]  ;;  %v4195_v2 = vsel %vm7376_vm14, %v4190_v55, %v8442_v29 }
 0x299   : > { %3895 = vst.msk [vmem:[#allocation3 + $0x24] sm:$0xf] %vm3885_vm10, %v8387_v60  ;;  %v8473_v17 = vpop.permute.xlu1 %2533  ;;  %3631 = vrot.lane.b32.xlu0 %v3549_v36, %s6966_s26  ;;  %v3102_v60 = vrot.slane %v3100_v62, 5  ;;  %v1006_v62 = vsel %vm7250_vm2, 0, %v1005_v25  ;;  %v1003_v33 = vsel %vm7250_vm2, 0, %v1002_v27  ;;  %v2025_v31 = vrot.slane %v2023_v59, 5 }
 0x29a   : > { %2197 = vrot.lane.b32.xlu1 %v1994_v14, %s6967_s19  ;;  %1007 = vst [vmem:[#allocation2 + $0xcc] sm:$0x1] %v1006_v62  ;;  %v1061_v5 = vld [vmem:[#allocation2 + $0xd4] sm:$0x1]  ;;  %v2022_v20 = vrot.slane %v2020_v47, 4  ;;  %v2033_v38 = vshrl.u32 %v1759_v7, 16  ;;  %v6500_v14 = vpop.f32.mrf.mxu0 }
 0x29b   : > { %v8480_v37 = vpop.permute.xlu0 %3817  ;;  %v3103_v39 = vsel %vm7376_vm14, %v3098_v56, %v3102_v60  ;;  %v3107_v42 = vor.u32 %v3106_v44, %v3102_v60  ;;  %1004 = vst [vmem:[#allocation2 + $0xc0] sm:$0x1] %v1003_v33  ;;  %v1062_v46 = vsel %vm7259_vm4, 0, %v1061_v5  ;;  %v1058_v16 = vld [vmem:[#allocation2 + $0xc8] sm:$0x1]  ;;  %v4180_v22 = vrot.slane %v4178_v6, 5 }
 0x29c   : > { %v6039_v48 = vrot.slane %v8486_v45, 9  ;;  %v1761_v56 = vld [vmem:[#allocation2 + $0x84] sm:$0xf]  ;;  %1063 = vst [vmem:[#allocation2 + $0xd4] sm:$0x1] %v1062_v46  ;;  %v1059_v60 = vsel %vm7259_vm4, 0, %v1058_v16  ;;  %v891_v51 = vadd.f32 %v6756_v23, %v6500_v14  ;;  %v2026_v24 = vor.u32 %v2025_v31, %v2022_v20  ;;  %v882_v47 = vpop.f32.mrf.mxu0 }
 0x29d   : > { %v8488_v10 = vpop.permute.xlu1 %3621  ;;  %3294 = vrot.lane.b32.xlu0 %v3103_v39, %s6969_s14  ;;  %v3108_v36 = vrot.slane %v3107_v42, 4  ;;  %v4176_v12 = vrot.slane %v4175_v15, 4  ;;  %v4635_v13 = vrot.slane %v4633_v1, 4  ;;  %v4636_v44 = vrot.slane %v4505_v63, 5  ;;  %1060 = vst [vmem:[#allocation2 + $0xc8] sm:$0x1] %v1059_v60 }
 0x29e   : > { %3633 = vrot.lane.b32.xlu1 %v3552_v40, %s6966_s26  ;;  %v2039_v53 = vshll.u32 %v1760_v8, 16  ;;  %v2031_v50 = vrot.slane %v2029_v54, 5  ;;  %v4506_v43 = vld [vmem:[#allocation2 + $0x84] sm:$0xe]  ;;  %v2035_v26 = vrot.slane %v2033_v38, 4  ;;  %v2044_v45 = vshrl.u32 %v1761_v56, 16  ;;  %v6501_v27 = vpop.f32.mrf.mxu0 }
 0x29f   : > { %v8499_v4 = vpop.permute.xlu0 %2729  ;;  %v8522_v39 = vld [vmem:[#allocation2 + $0x88] sm:$0xf]  ;;  %v2047_v7 = vshll.u32 %v1761_v56, 16  ;;  %v3113_v40 = vsel %vm7376_vm14, %v3108_v36, %v3112_v52  ;;  %v4634_v29 = vsel %vm7348_vm12, %v6039_v48, %v4633_v1  ;;  %v883_v42 = vadd.f32 %v6756_v23, %v882_v47  ;;  %v1688_v6 = vld [vmem:[#allocation2 + $0x90] sm:$0xf] }
 0x2a0   : > { %v1689_v63 = vld [vmem:[#allocation2 + $0x94] sm:$0xf]  ;;  %v4181_v8 = vsel %vm7376_vm14, %v4176_v12, %v4180_v22  ;;  %v4637_v25 = vsel %vm7348_vm12, %v4635_v13, %v4636_v44  ;;  %v8535_v15 = vrot.slane %v2039_v53, 5  ;;  %v6040_v62 = vrot.slane %v4506_v43, 9  ;;  %1720 = vst.msk [vmem:[#allocation3 + $0x60] sm:$0xf] %vm1516_vm5, %v1688_v6  ;;  %v885_v60 = vpop.f32.mrf.mxu0 }
 0x2a1   : > { %v8507_v9 = vpop.permute.xlu1 %3617  ;;  %4382 = vrot.lane.b32.xlu0 %v4171_v57, %s6971_s17  ;;  %1721 = vst.msk [vmem:[#allocation3 + $0x64] sm:$0xf] %vm1516_vm5, %v1689_v63  ;;  %v4640_v1 = vrot.slane %v8522_v39, 5  ;;  %v8543_v57 = vld [vmem:[#allocation2 + $0x8c] sm:$0x1]  ;;  %v929_v33 = vmax.f32 %v883_v42, 0.0  ;;  %v894_v5 = vadd.f32 %v6756_v23, %v6501_v27  ;;  %v2036_v31 = vor.u32 %v2035_v26, %v2031_v50 }
 0x2a2   : > { %4388 = vrot.lane.b32.xlu1 %v4205_v3, %s6971_s17  ;;  %v931_v3 = vmax.f32 %v891_v51, 0.0  ;;  %v1762_v55 = vld [vmem:[#allocation2 + $0x88] sm:$0xf]  ;;  %v2027_v20 = vrot.slane %v2026_v24, 4  ;;  %v2046_v38 = vrot.slane %v2044_v45, 4  ;;  %v2049_v46 = vrot.slane %v2047_v7, 5 }
 0x2a3   : > { %v8514_v19 = vpop.permute.xlu0 %3615  ;;  %v6167_v48 = vpack.c.bf16 %v929_v33, %v929_v33  ;;  %v932_v56 = vmax.f32 %v894_v5, 0.0  ;;  %v4643_v12 = vrot.slane %v8543_v57, 5  ;;  %v2053_v13 = vshll.u32 %v1762_v55, 16  ;;  %v8556_v7 = vld [vmem:[#allocation2 + $0x8c] sm:$0x1] }
 0x2a4   : > { %v6169_v54 = vpack.c.bf16 %v931_v3, %v931_v3  ;;  %v2057_v44 = vshrl.u32 %v1762_v55, 16  ;;  %v886_v53 = vadd.f32 %v6756_v23, %v885_v60  ;;  %v2032_v26 = vsel %vm7376_vm14, %v2027_v20, %v2031_v50  ;;  %v1638_v47 = vld [vmem:[#allocation2 + $0xcc] sm:$0xf]  ;;  %v1690_v63 = vld [vmem:[#allocation2 + $0x9c] sm:$0xf] }
 0x2a5   : > { %v8524_v59 = vpop.permute.xlu1 %4705  ;;  %4386 = vrot.lane.b32.xlu0 %v4195_v2, %s6971_s17  ;;  %v1429_v43 = vshrl.u32 %v6167_v48, 16  ;;  %v1432_v51 = vshll.u32 %v6167_v48, 16  ;;  %v6170_v24 = vpack.c.bf16 %v932_v56, %v932_v56  ;;  %v4641_v39 = vsel %vm7348_vm12, %v6040_v62, %v4640_v1  ;;  %v1631_v50 = vld [vmem:[#allocation2 + $0xc0] sm:$0xf]  ;;  %1722 = vst.msk [vmem:[#allocation3 + $0x68] sm:$0xf] %vm1516_vm5, %v1690_v63 }
 0x2a6   : > { %3296 = vrot.lane.b32.xlu1 %v3113_v40, %s6969_s14  ;;  %v1446_v36 = vshrl.u32 %v6169_v54, 16  ;;  %v1449_v22 = vshll.u32 %v6169_v54, 16  ;;  %v2050_v45 = vor.u32 %v2049_v46, %v2046_v38  ;;  %v930_v40 = vmax.f32 %v886_v53, 0.0  ;;  %v2322_v33 = vld [vmem:[#allocation2 + $0x78] sm:$0xe] }
 0x2a7   : > { %v8540_v52 = vpop.permute.xlu0 %4370  ;;  %v1431_v42 = vrot.slane %v1429_v43, 7  ;;  %v1454_v6 = vshrl.u32 %v6170_v24, 16  ;;  %v2059_v27 = vrot.slane %v2057_v44, 4  ;;  %v1457_v55 = vshll.u32 %v6170_v24, 16  ;;  %v1691_v46 = vld [vmem:[#allocation2 + $0xa0] sm:$0xf] }
 0x2a8   : > { %v1448_v2 = vrot.slane %v1446_v36, 7  ;;  %v6168_v54 = vpack.c.bf16 %v930_v40, %v930_v40  ;;  %v4642_v36 = vrot.slane %v4640_v1, 4  ;;  %v1642_v48 = vld [vmem:[#allocation2 + $0xd4] sm:$0x1]  ;;  %1723 = vst.msk [vmem:[#allocation3 + $0x6c] sm:$0xf] %vm1516_vm5, %v1691_v46 }
 0x2a9   : > { %v8545_v16 = vpop.permute.xlu1 %2529  ;;  %4719 = vrot.lane.b32.xlu0 %v4634_v29, %s6970_s25  ;;  %v2037_v29 = vrot.slane %v2036_v31, 4  ;;  %v1434_v31 = vor.u32 %v1432_v51, %v1431_v42  ;;  %v1456_v38 = vrot.slane %v1454_v6, 7  ;;  %v2323_v44 = vld [vmem:[#allocation2 + $0x7c] sm:$0xf]  ;;  %v1435_v24 = vrot.slane %v1431_v42, 4 }
 0x2aa   : > { %4384 = vrot.lane.b32.xlu1 %v4181_v8, %s6971_s17  ;;  %v1451_v3 = vor.u32 %v1449_v22, %v1448_v2  ;;  %v2055_v8 = vrot.slane %v2053_v13, 5  ;;  %v1452_v5 = vrot.slane %v1448_v2, 4  ;;  %v2051_v22 = vrot.slane %v2050_v45, 4 }
 0x2ab   : > { %v8550_v14 = vpop.permute.xlu0 %4703  ;;  %v1437_v56 = vshrl.u32 %v6168_v54, 16  ;;  %v1440_v60 = vshll.u32 %v6168_v54, 16  ;;  %v2063_v13 = vshll.u32 %v8556_v7, 16  ;;  %v1632_v1 = vsel %vm7305_vm7, %v1434_v31, %v1631_v50  ;;  %v2856_v50 = vld [vmem:[#allocation2 + $0x84] sm:$0xf] }
 0x2ac   : > { %v1639_v20 = vsel %vm7305_vm7, %v1451_v3, %v1638_v47  ;;  %v1459_v53 = vor.u32 %v1457_v55, %v1456_v38  ;;  %v1461_v2 = vrot.slane %v1456_v38, 4  ;;  %v2042_v43 = vsel %vm7376_vm14, %v2037_v29, %v8535_v15  ;;  %1633 = vst [vmem:[#allocation2 + $0xc0] sm:$0xf] %v1632_v1  ;;  %v1635_v47 = vld [vmem:[#allocation2 + $0xc8] sm:$0x1] }
 0x2ad   : > { %v8558_v23 = vpop.permute.xlu1 %3819  ;;  %2203 = vrot.lane.b32.xlu0 %v2032_v26, %s6967_s19  ;;  %1640 = vst [vmem:[#allocation2 + $0xcc] sm:$0xf] %v1639_v20  ;;  %v2060_v51 = vor.u32 %v2059_v27, %v2055_v8  ;;  %v1439_v26 = vrot.slane %v1437_v56, 7  ;;  %v2056_v40 = vsel %vm7376_vm14, %v2051_v22, %v2055_v8  ;;  %v2463_v15 = vrot.slane %v2323_v44, 5  ;;  %v2325_v29 = vld [vmem:[#allocation2 + $0x84] sm:$0xe] }
 0x2ae   : > { %4721 = vrot.lane.b32.xlu1 %v4637_v25, %s6970_s25  ;;  %v1460_v45 = vsel %vm7316_vm8, %v1452_v5, %v1459_v53  ;;  %v1643_v7 = vsel %vm7250_vm2, %v1461_v2, %v1642_v48  ;;  %v2326_v3 = vld [vmem:[#allocation2 + $0x88] sm:$0xf]  ;;  %v4644_v27 = vsel %vm7348_vm12, %v4642_v36, %v4643_v12  ;;  %v9376_v55 = vmov 0   ;;  %v2324_v5 = vld [vmem:[#allocation2 + $0x80] sm:$0x1] }
 0x2af   : > { %v2192_v62 = vpop.permute.xlu0 %2191  ;;  %1641 = vst.msk [vmem:[#allocation2 + $0xd0] sm:$0xf] %vm1516_vm5, %v1460_v45  ;;  %1644 = vst [vmem:[#allocation2 + $0xd4] sm:$0x1] %v1643_v7  ;;  %v1442_v42 = vor.u32 %v1440_v60, %v1439_v26  ;;  %v1444_v6 = vrot.slane %v1439_v26, 4  ;;  %v2061_v8 = vrot.slane %v2060_v51, 4 }
 0x2b0   : > { %2274 = vst.msk [vmem:[#allocation3 + $0x38] sm:$0xf] %vm2259_vm15, %v2192_v62  ;;  %v2065_v54 = vrot.slane %v2063_v13, 5  ;;  %v6010_v12 = vrot.slane %v2325_v29, 9  ;;  %v2470_v20 = vrot.slane %v2326_v3, 5  ;;  %v3115_v46 = vshrl.u32 %v2856_v50, 16 }
 0x2b1   : > { %v8567_v25 = vpop.permute.xlu1 %2731  ;;  %2614 = vst.msk [vmem:[#allocation3 + $0x38] sm:$0xf] %vm2599_vm0, %v8449_v32  ;;  %4723 = vrot.lane.b32.xlu0 %v4641_v39, %s6970_s25  ;;  %v6009_v39 = vrot.slane %v2322_v33, 9  ;;  %v1443_v62 = vsel %vm7316_vm8, %v1435_v24, %v1442_v42  ;;  %v1636_v33 = vsel %vm7250_vm2, %v1444_v6, %v1635_v47  ;;  %v3118_v34 = vshll.u32 %v2856_v50, 16  ;;  %v2859_v36 = vld [vmem:[#allocation2 + $0x90] sm:$0xf] }
 0x2b2   : > { %2205 = vrot.lane.b32.xlu1 %v2042_v43, %s6967_s19  ;;  %1660 = vst.msk [vmem:[#allocation2 + $0xd0] sm:$0xf] %vm1516_vm5, %v9376_v55  ;;  %1634 = vst.msk [vmem:[#allocation2 + $0xc4] sm:$0xf] %vm1516_vm5, %v1443_v62  ;;  %v2066_v56 = vsel %vm7376_vm14, %v2061_v8, %v2065_v54  ;;  %v2465_v60 = vrot.slane %v2463_v15, 4  ;;  %v2466_v13 = vrot.slane %v2324_v5, 5  ;;  %v2471_v11 = vsel %vm7348_vm12, %v6010_v12, %v2470_v20 }
 0x2b3   : > { %v8579_v32 = vpop.permute.xlu0 %2527  ;;  %1637 = vst [vmem:[#allocation2 + $0xc8] sm:$0x1] %v1636_v33  ;;  %v2464_v38 = vsel %vm7348_vm12, %v6009_v39, %v2463_v15  ;;  %v2327_v44 = vld [vmem:[#allocation2 + $0x8c] sm:$0x1]  ;;  %v2857_v53 = vld [vmem:[#allocation2 + $0x88] sm:$0xf] }
 0x2b4   : > { %v1657_v31 = vld [vmem:[#allocation2 + $0xcc] sm:$0xf]  ;;  %v3139_v2 = vshrl.u32 %v2859_v36, 16  ;;  %v3117_v51 = vrot.slane %v3115_v46, 4  ;;  %v3120_v24 = vrot.slane %v3118_v34, 5  ;;  %v3142_v26 = vshll.u32 %v2859_v36, 16 }
 0x2b5   : > { %v8588_v63 = vpop.permute.xlu1 %4372  ;;  %2207 = vrot.lane.b32.xlu0 %v2056_v40, %s6967_s19  ;;  %v1658_v22 = vsel %vm7305_vm7, 0, %v1657_v31  ;;  %v2473_v7 = vrot.slane %v2327_v44, 5  ;;  %v2467_v47 = vsel %vm7348_vm12, %v2465_v60, %v2466_v13  ;;  %v3124_v40 = vshll.u32 %v2857_v53, 16  ;;  %v2860_v3 = vld [vmem:[#allocation2 + $0x94] sm:$0xf] }
 0x2b6   : > { %4725 = vrot.lane.b32.xlu1 %v4644_v27, %s6970_s25  ;;  %1659 = vst [vmem:[#allocation2 + $0xcc] sm:$0xf] %v1658_v22  ;;  %v1661_v43 = vld [vmem:[#allocation2 + $0xd4] sm:$0x1]  ;;  %v3128_v15 = vshrl.u32 %v2857_v53, 16  ;;  %v3121_v18 = vor.u32 %v3120_v24, %v3117_v51  ;;  %v3141_v6 = vrot.slane %v3139_v2, 4 }
 0x2b7   : > { %v8602_v57 = vpop.permute.xlu0 %3282  ;;  %v1662_v39 = vsel %vm7250_vm2, 0, %v1661_v43  ;;  %v2653_v42 = vld [vmem:[#allocation2 + $0x84] sm:$0xf]  ;;  %v3144_v27 = vrot.slane %v3142_v26, 5  ;;  %v3126_v8 = vrot.slane %v3124_v40, 5  ;;  %v3148_v62 = vshll.u32 %v2860_v3, 16 }
 0x2b8   : > { %1663 = vst [vmem:[#allocation2 + $0xd4] sm:$0x1] %v1662_v39  ;;  %v3130_v54 = vrot.slane %v3128_v15, 4  ;;  %v3152_v33 = vshrl.u32 %v2860_v3, 16  ;;  %v2858_v12 = vld [vmem:[#allocation2 + $0x8c] sm:$0x1] }
 0x2b9   : > { %v2194_v48 = vpop.permute.xlu1 %2193  ;;  %2543 = vrot.lane.b32.xlu0 %v2464_v38, %s6965_s11  ;;  %v3122_v31 = vrot.slane %v3121_v18, 4  ;;  %v3145_v38 = vor.u32 %v3144_v27, %v3141_v6  ;;  %v2654_v34 = vld [vmem:[#allocation2 + $0x88] sm:$0xf]  ;;  %v3134_v22 = vshll.u32 %v2858_v12, 16  ;;  %v2861_v13 = vld [vmem:[#allocation2 + $0x98] sm:$0x1] }
 0x2ba   : > { %2275 = vst.msk [vmem:[#allocation3 + $0x3c] sm:$0xf] %vm2259_vm15, %v2194_v48  ;;  %2209 = vrot.lane.b32.xlu1 %v2066_v56, %s6967_s19  ;;  %v3131_v36 = vor.u32 %v3130_v54, %v3126_v8  ;;  %v3150_v48 = vrot.slane %v3148_v62, 5  ;;  %v3154_v56 = vrot.slane %v3152_v33, 4  ;;  %v3158_v43 = vshll.u32 %v2861_v13, 16 }
 0x2bb   : > { %2615 = vst.msk [vmem:[#allocation3 + $0x3c] sm:$0xf] %vm2599_vm0, %v8473_v17  ;;  %v2726_v1 = vpop.permute.xlu0 %2725  ;;  %v2472_v17 = vrot.slane %v2470_v20, 4  ;;  %v2655_v20 = vld [vmem:[#allocation2 + $0x90] sm:$0xf]  ;;  %v3136_v2 = vrot.slane %v3134_v22, 5 }
 0x2bc   : > { %2808 = vst.msk [vmem:[#allocation3 + $0x38] sm:$0xf] %vm2793_vm1, %v2726_v1  ;;  %v3417_v1 = vld [vmem:[#allocation2 + $0x84] sm:$0xe]  ;;  %v3132_v53 = vrot.slane %v3131_v36, 4 }
 0x2bd   : > { %v8621_v45 = vpop.permute.xlu1 %3284  ;;  %2547 = vrot.lane.b32.xlu0 %v2471_v11, %s6965_s11  ;;  %v2474_v55 = vsel %vm7348_vm12, %v2472_v17, %v2473_v7  ;;  %v3418_v11 = vld [vmem:[#allocation2 + $0x88] sm:$0xf]  ;;  %v6025_v24 = vrot.slane %v3417_v1, 9  ;;  %v3948_v39 = vld [vmem:[#allocation2 + $0x90] sm:$0xf] }
 0x2be   : > { %2545 = vrot.lane.b32.xlu1 %v2467_v47, %s6965_s11  ;;  %v3555_v26 = vrot.slane %v3418_v11, 5  ;;  %v3421_v7 = vld [vmem:[#allocation2 + $0x94] sm:$0xf]  ;;  %v3160_v47 = vrot.slane %v3158_v43, 5  ;;  %v4207_v40 = vshrl.u32 %v3948_v39, 16  ;;  %v4210_v15 = vshll.u32 %v3948_v39, 16 }
 0x2bf   : > { %v8627_v29 = vpop.permute.xlu0 %3813  ;;  %v3951_v18 = vld [vmem:[#allocation2 + $0x9c] sm:$0xf]  ;;  %v3952_v12 = vld [vmem:[#allocation2 + $0xa0] sm:$0xf] }
 0x2c0   : > { %v3557_v6 = vrot.slane %v3555_v26, 4  ;;  %v4231_v54 = vshrl.u32 %v3951_v18, 16  ;;  %v4234_v62 = vshll.u32 %v3951_v18, 16  ;;  %v4244_v13 = vshrl.u32 %v3952_v12, 16 }
 0x2c1   : > { %v2728_v50 = vpop.permute.xlu1 %2727  ;;  %2737 = vrot.lane.b32.xlu0 %v2653_v42, %s6964_s30  ;;  %v3562_v42 = vrot.slane %v3421_v7, 5 }
 0x2c2   : > { %2809 = vst.msk [vmem:[#allocation3 + $0x3c] sm:$0xf] %vm2793_vm1, %v2728_v50  ;;  %2549 = vrot.lane.b32.xlu1 %v2474_v55, %s6965_s11  ;;  %v3949_v55 = vld [vmem:[#allocation2 + $0x94] sm:$0xf] }
 0x2c3   : > { %v3279_v5 = vpop.permute.xlu0 %3278 }
 0x2c4   : > { %3365 = vst.msk [vmem:[#allocation3 + $0x28] sm:$0xf] %vm3354_vm6, %v3279_v5 }
 0x2c5   : > { %v8635_v46 = vpop.permute.xlu1 %3815  ;;  %3702 = vst.msk [vmem:[#allocation3 + $0x28] sm:$0xf] %vm3691_vm9, %v8514_v19  ;;  %2741 = vrot.lane.b32.xlu0 %v2655_v20, %s6964_s30  ;;  %v3127_v19 = vsel %vm7376_vm14, %v3122_v31, %v3126_v8  ;;  %v4209_v8 = vrot.slane %v4207_v40, 4 }
 0x2c6   : > { %3896 = vst.msk [vmem:[#allocation3 + $0x28] sm:$0xf] %vm3885_vm10, %v8209_v49  ;;  %2739 = vrot.lane.b32.xlu1 %v2654_v34, %s6964_s30  ;;  %v3146_v49 = vrot.slane %v3145_v38, 4  ;;  %v4216_v38 = vshll.u32 %v3949_v55, 16  ;;  %v4220_v34 = vshrl.u32 %v3949_v55, 16 }
 0x2c7   : > { %4457 = vst.msk [vmem:[#allocation3 + $0x28] sm:$0xf] %vm4446_vm11, %v8540_v52  ;;  %v4367_v60 = vpop.permute.xlu0 %4366  ;;  %v2656_v52 = vld [vmem:[#allocation2 + $0x94] sm:$0xf] }
 0x2c8   : > { %4794 = vst.msk [vmem:[#allocation3 + $0x28] sm:$0xf] %vm4783_vm13, %v8431_v30  ;;  %v3155_v30 = vor.u32 %v3154_v56, %v3150_v48  ;;  %v4236_v56 = vrot.slane %v4234_v62, 5  ;;  %v4222_v1 = vrot.slane %v4220_v34, 4  ;;  %v1692_v34 = vld [vmem:[#allocation2 + $0xa8] sm:$0xf] }
 0x2c9   : > { %4455 = vst.msk [vmem:[#allocation3 + $0x20] sm:$0xf] %vm4446_vm11, %v4367_v60  ;;  %v3281_v44 = vpop.permute.xlu1 %3280  ;;  %3298 = vrot.lane.b32.xlu0 %v3127_v19, %s6969_s14  ;;  %v4240_v60 = vshll.u32 %v3952_v12, 16 }
 0x2ca   : > { %4792 = vst.msk [vmem:[#allocation3 + $0x20] sm:$0xf] %vm4783_vm13, %v8550_v14  ;;  %2743 = vrot.lane.b32.xlu1 %v2656_v52, %s6964_s30  ;;  %v3151_v14 = vsel %vm7376_vm14, %v3146_v49, %v3150_v48  ;;  %v4233_v48 = vrot.slane %v4231_v54, 4  ;;  %v3747_v52 = vld [vmem:[#allocation2 + $0x9c] sm:$0xf] }
 0x2cb   : > { %3366 = vst.msk [vmem:[#allocation3 + $0x2c] sm:$0xf] %vm3354_vm6, %v3281_v44  ;;  %v2188_v51 = vpop.permute.xlu0 %2187  ;;  %v4218_v44 = vrot.slane %v4216_v38, 5  ;;  %v4242_v43 = vrot.slane %v4240_v60, 5 }
 0x2cc   : > { %3703 = vst.msk [vmem:[#allocation3 + $0x2c] sm:$0xf] %vm3691_vm9, %v8507_v9  ;;  %v3420_v9 = vld [vmem:[#allocation2 + $0x90] sm:$0xe] }
 0x2cd   : > { %3897 = vst.msk [vmem:[#allocation3 + $0x2c] sm:$0xf] %vm3885_vm10, %v8292_v61  ;;  %v4369_v17 = vpop.permute.xlu1 %4368  ;;  %3302 = vrot.lane.b32.xlu0 %v3151_v14, %s6969_s14  ;;  %v3137_v61 = vsel %vm7376_vm14, %v3132_v53, %v3136_v2  ;;  %v6026_v3 = vrot.slane %v3420_v9, 9  ;;  %v3950_v2 = vld [vmem:[#allocation2 + $0x98] sm:$0x1]  ;;  %v4246_v14 = vrot.slane %v4244_v13, 4  ;;  %v4223_v9 = vor.u32 %v4222_v1, %v4218_v44 }
 0x2ce   : > { %2272 = vst.msk [vmem:[#allocation3 + $0x30] sm:$0xf] %vm2259_vm15, %v2188_v51  ;;  %3300 = vrot.lane.b32.xlu1 %v3137_v61, %s6969_s14  ;;  %v3953_v51 = vld [vmem:[#allocation2 + $0xa4] sm:$0x1]  ;;  %v4226_v7 = vshll.u32 %v3950_v2, 16 }
 0x2cf   : > { %4458 = vst.msk [vmem:[#allocation3 + $0x2c] sm:$0xf] %vm4446_vm11, %v8588_v63  ;;  %4456 = vst.msk [vmem:[#allocation3 + $0x24] sm:$0xf] %vm4446_vm11, %v4369_v17  ;;  %v3156_v63 = vrot.slane %v3155_v30, 4  ;;  %v3563_v33 = vsel %vm7348_vm12, %v6026_v3, %v3562_v42  ;;  %v4237_v30 = vor.u32 %v4236_v56, %v4233_v48 }
 0x2d0   : > { %2612 = vst.msk [vmem:[#allocation3 + $0x30] sm:$0xf] %vm2599_vm0, %v8579_v32  ;;  %v8679_v32 = vpop.permute.xlu0 %4715  ;;  %v3746_v17 = vld [vmem:[#allocation2 + $0x94] sm:$0xf]  ;;  %v4511_v56 = vld [vmem:[#allocation2 + $0x98] sm:$0x1] }
 0x2d1   : > { %4795 = vst.msk [vmem:[#allocation3 + $0x2c] sm:$0xf] %vm4783_vm13, %v8457_v58  ;;  %4793 = vst.msk [vmem:[#allocation3 + $0x24] sm:$0xf] %vm4783_vm13, %v8524_v59  ;;  %v3419_v58 = vld [vmem:[#allocation2 + $0x8c] sm:$0x1]  ;;  %v2190_v59 = vpop.permute.xlu1 %2189 }
 0x2d2   : > { %2806 = vst.msk [vmem:[#allocation3 + $0x30] sm:$0xf] %vm2793_vm1, %v8221_v21  ;;  %v3556_v21 = vsel %vm7348_vm12, %v6025_v24, %v3555_v26  ;;  %v3558_v27 = vrot.slane %v3419_v58, 5  ;;  %v1765_v58 = vld [vmem:[#allocation2 + $0x94] sm:$0xf] }
 0x2d3   : > { %3367 = vst.msk [vmem:[#allocation3 + $0x30] sm:$0xf] %vm3354_vm6, %v8602_v57  ;;  %3635 = vrot.lane.b32.xlu0 %v3556_v21, %s6966_s26  ;;  %v3161_v57 = vsel %vm7376_vm14, %v3156_v63, %v3160_v47  ;;  %v4238_v63 = vrot.slane %v4237_v30, 4  ;;  %v4250_v47 = vshll.u32 %v3953_v51, 16  ;;  %v4509_v21 = vld [vmem:[#allocation2 + $0x90] sm:$0xe] }
 0x2d4   : > { %3704 = vst.msk [vmem:[#allocation3 + $0x30] sm:$0xf] %vm3691_vm9, %v8468_v41  ;;  %v3422_v41 = vld [vmem:[#allocation2 + $0x98] sm:$0x1]  ;;  %3304 = vrot.lane.b32.xlu1 %v3161_v57, %s6969_s14  ;;  %v8694_v50 = vpop.permute.xlu0 %2539  ;;  %v3559_v20 = vsel %vm7348_vm12, %v3557_v6, %v3558_v27  ;;  %v4510_v3 = vld [vmem:[#allocation2 + $0x94] sm:$0xf] }
 0x2d5   : > { %3898 = vst.msk [vmem:[#allocation3 + $0x30] sm:$0xf] %vm3885_vm10, %v8627_v29  ;;  %v4212_v29 = vrot.slane %v4210_v15, 5  ;;  %v8702_v5 = vpop.permute.xlu1 %4717  ;;  %v4247_v15 = vor.u32 %v4246_v14, %v4242_v43  ;;  %v1767_v57 = vld [vmem:[#allocation2 + $0x9c] sm:$0xf]  ;;  %v4224_v27 = vrot.slane %v4223_v9, 4  ;;  %v4243_v54 = vsel %vm7376_vm14, %v4238_v63, %v4242_v43 }
 0x2d6   : > { %2273 = vst.msk [vmem:[#allocation3 + $0x34] sm:$0xf] %vm2259_vm15, %v2190_v59  ;;  %v3748_v6 = vld [vmem:[#allocation2 + $0xa0] sm:$0xf]  ;;  %v2077_v55 = vshll.u32 %v1765_v58, 16  ;;  %v4252_v62 = vrot.slane %v4250_v47, 5 }
 0x2d7   : > { %2613 = vst.msk [vmem:[#allocation3 + $0x34] sm:$0xf] %vm2599_vm0, %v8545_v16  ;;  %3639 = vrot.lane.b32.xlu0 %v3563_v33, %s6966_s26  ;;  %v3565_v16 = vrot.slane %v3422_v41, 5  ;;  %v4213_v22 = vor.u32 %v4212_v29, %v4209_v8  ;;  %v4228_v41 = vrot.slane %v4226_v7, 5  ;;  %v2081_v8 = vshrl.u32 %v1765_v58, 16 }
 0x2d8   : > { %2807 = vst.msk [vmem:[#allocation3 + $0x34] sm:$0xf] %vm2793_vm1, %v8314_v28  ;;  %v6734_v31 = vld [vmem:[#allocation3 + $0x20] sm:$0xff]   ;;  %v3564_v28 = vrot.slane %v3562_v42, 4  ;;  %3637 = vrot.lane.b32.xlu1 %v3559_v20, %s6966_s26  ;;  %v8712_v36 = vpop.permute.xlu0 %3627  ;;  %v6041_v33 = vrot.slane %v4509_v21, 9  ;;  %v4248_v12 = vrot.slane %v4247_v15, 4 }
 0x2d9   : > { %3368 = vst.msk [vmem:[#allocation3 + $0x34] sm:$0xf] %vm3354_vm6, %v8621_v45  ;;  %v6735_v45 = vld [vmem:[#allocation3 + $0x28] sm:$0xff]   ;;  %6520 = vmatprep.mubr.msk.bf16.mxu1 %vm4971_vm3, %v6734_v31  ;;  %v8715_v19 = vpop.permute.xlu1 %2541  ;;  %v4214_v53 = vrot.slane %v4213_v22, 4  ;;  %v2092_v31 = vshrl.u32 %v1767_v57, 16  ;;  %v4229_v48 = vsel %vm7376_vm14, %v4224_v27, %v4228_v41  ;;  %v2083_v60 = vrot.slane %v2081_v8, 4 }
 0x2da   : > { %3705 = vst.msk [vmem:[#allocation3 + $0x34] sm:$0xf] %vm3691_vm9, %v8488_v10  ;;  %v3745_v10 = vld [vmem:[#allocation2 + $0x90] sm:$0xf]  ;;  %6521 = vmatmul.mubr.msk.bf16.vlgmr.msra.gmra.mxu1 %vm4971_vm3, %v6735_v45  ;;  %v3566_v49 = vsel %vm7348_vm12, %v3564_v28, %v3565_v16  ;;  %v4647_v16 = vrot.slane %v4510_v3, 5  ;;  %v2095_v28 = vshll.u32 %v1767_v57, 16  ;;  %v4253_v43 = vsel %vm7376_vm14, %v4248_v12, %v4252_v62 }
 0x2db   : > { %3899 = vst.msk [vmem:[#allocation3 + $0x34] sm:$0xf] %vm3885_vm10, %v8635_v46  ;;  %3829 = vrot.lane.b32.xlu0 %v3745_v10, %s6968_s28  ;;  %v1764_v46 = vld [vmem:[#allocation2 + $0x90] sm:$0xf]  ;;  %v4219_v40 = vsel %vm7376_vm14, %v4214_v53, %v4218_v44  ;;  %v1693_v45 = vld [vmem:[#allocation2 + $0xac] sm:$0xf] }
 0x2dc   : > { %3641 = vrot.lane.b32.xlu1 %v3566_v49, %s6966_s26  ;;  %v8722_v11 = vpop.permute.xlu0 %3825  ;;  %v2068_v24 = vshrl.u32 %v1764_v46, 16  ;;  %v2071_v26 = vshll.u32 %v1764_v46, 16  ;;  %v1694_v22 = vld [vmem:[#allocation2 + $0xb4] sm:$0xf]  ;;  %v2079_v10 = vrot.slane %v2077_v55, 5  ;;  %v4648_v1 = vsel %vm7348_vm12, %v6041_v33, %v4647_v16 }
 0x2dd   : > { %v8724_v39 = vpop.permute.xlu1 %3629  ;;  %1724 = vst.msk [vmem:[#allocation3 + $0x70] sm:$0xf] %vm1516_vm5, %v1692_v34  ;;  %1725 = vst.msk [vmem:[#allocation3 + $0x74] sm:$0xf] %vm1516_vm5, %v1693_v45  ;;  %v1766_v46 = vld [vmem:[#allocation2 + $0x98] sm:$0x1] }
 0x2de   : > { %v2070_v42 = vrot.slane %v2068_v24, 4  ;;  %v2073_v18 = vrot.slane %v2071_v26, 5  ;;  %1726 = vst.msk [vmem:[#allocation3 + $0x78] sm:$0xf] %vm1516_vm5, %v1694_v22  ;;  %v1768_v49 = vld [vmem:[#allocation2 + $0xa0] sm:$0xf] }
 0x2df   : > { %3833 = vrot.lane.b32.xlu0 %v3747_v52, %s6968_s28  ;;  %v1695_v44 = vld [vmem:[#allocation2 + $0xb8] sm:$0xf]  ;;  %v2094_v53 = vrot.slane %v2092_v31, 4  ;;  %v2097_v2 = vrot.slane %v2095_v28, 5  ;;  %v4649_v51 = vrot.slane %v4647_v16, 4  ;;  %v4650_v14 = vrot.slane %v4511_v56, 5 }
 0x2e0   : > { %3831 = vrot.lane.b32.xlu1 %v3746_v17, %s6968_s28  ;;  %v8728_v61 = vpop.permute.xlu0 %3623  ;;  %v2074_v20 = vor.u32 %v2073_v18, %v2070_v42  ;;  %1727 = vst.msk [vmem:[#allocation3 + $0x7c] sm:$0xf] %vm1516_vm5, %v1695_v44  ;;  %v4512_v24 = vld [vmem:[#allocation2 + $0x9c] sm:$0xe]  ;;  %v4513_v26 = vld [vmem:[#allocation2 + $0xa0] sm:$0xf]  ;;  %v2084_v17 = vor.u32 %v2083_v60, %v2079_v10 }
 0x2e1   : > { %v8732_v59 = vpop.permute.xlu1 %3625  ;;  %v2087_v9 = vshll.u32 %v1766_v46, 16  ;;  %v2101_v7 = vshll.u32 %v1768_v49, 16  ;;  %v2105_v63 = vshrl.u32 %v1768_v49, 16  ;;  %v4654_v15 = vrot.slane %v4513_v26, 5  ;;  %v1769_v8 = vld [vmem:[#allocation2 + $0xa4] sm:$0x1] }
 0x2e2   : > { %v2075_v52 = vrot.slane %v2074_v20, 4  ;;  %v2098_v21 = vor.u32 %v2097_v2, %v2094_v53  ;;  %v4651_v42 = vsel %vm7348_vm12, %v4649_v51, %v4650_v14  ;;  %v2085_v18 = vrot.slane %v2084_v17, 4  ;;  %v2328_v16 = vld [vmem:[#allocation2 + $0x90] sm:$0xe]  ;;  %v2329_v12 = vld [vmem:[#allocation2 + $0x94] sm:$0xf] }
 0x2e3   : > { %4390 = vrot.lane.b32.xlu0 %v4219_v40, %s6971_s17  ;;  %v6042_v40 = vrot.slane %v4512_v24, 9  ;;  %v2089_v57 = vrot.slane %v2087_v9, 5  ;;  %v2103_v27 = vrot.slane %v2101_v7, 5  ;;  %v2107_v41 = vrot.slane %v2105_v63, 4  ;;  %v2332_v60 = vld [vmem:[#allocation2 + $0xa0] sm:$0xf] }
 0x2e4   : > { %3835 = vrot.lane.b32.xlu1 %v3748_v6, %s6968_s28  ;;  %v8736_v29 = vpop.permute.xlu0 %4378  ;;  %v2080_v58 = vsel %vm7376_vm14, %v2075_v52, %v2079_v10  ;;  %v4514_v6 = vld [vmem:[#allocation2 + $0xa4] sm:$0x1]  ;;  %v2099_v62 = vrot.slane %v2098_v21, 4  ;;  %v4656_v31 = vrot.slane %v4654_v15, 4  ;;  %v2111_v34 = vshll.u32 %v1769_v8, 16 }
 0x2e5   : > { %v8740_v38 = vpop.permute.xlu1 %4713  ;;  %v2090_v20 = vsel %vm7376_vm14, %v2085_v18, %v2089_v57  ;;  %v2108_v28 = vor.u32 %v2107_v41, %v2103_v27  ;;  %v2477_v56 = vrot.slane %v2329_v12, 5  ;;  %v2331_v10 = vld [vmem:[#allocation2 + $0x9c] sm:$0xe]  ;;  %v2330_v2 = vld [vmem:[#allocation2 + $0x98] sm:$0x1]  ;;  %v2484_v51 = vrot.slane %v2332_v60, 5 }
 0x2e6   : > { %v2104_v22 = vsel %vm7376_vm14, %v2099_v62, %v2103_v27  ;;  %v2862_v49 = vld [vmem:[#allocation2 + $0x9c] sm:$0xf]  ;;  %v2113_v52 = vrot.slane %v2111_v34, 5  ;;  %v2865_v9 = vld [vmem:[#allocation2 + $0xa8] sm:$0xf]  ;;  %v2480_v63 = vrot.slane %v2330_v2, 5 }
 0x2e7   : > { %4394 = vrot.lane.b32.xlu0 %v4243_v54, %s6971_s17  ;;  %v4655_v54 = vsel %vm7348_vm12, %v6042_v40, %v4654_v15  ;;  %v3163_v24 = vshrl.u32 %v2862_v49, 16  ;;  %v3166_v26 = vshll.u32 %v2862_v49, 16  ;;  %v2479_v7 = vrot.slane %v2477_v56, 4  ;;  %v2863_v15 = vld [vmem:[#allocation2 + $0xa0] sm:$0xf] }
 0x2e8   : > { %4392 = vrot.lane.b32.xlu1 %v4229_v48, %s6971_s17  ;;  %v8749_v13 = vpop.permute.xlu0 %4711  ;;  %v6011_v48 = vrot.slane %v2328_v16, 9  ;;  %v3187_v18 = vshrl.u32 %v2865_v9, 16  ;;  %v3190_v57 = vshll.u32 %v2865_v9, 16  ;;  %v2486_v27 = vrot.slane %v2484_v51, 4  ;;  %v2866_v16 = vld [vmem:[#allocation2 + $0xac] sm:$0xf] }
 0x2e9   : > { %v8754_v30 = vpop.permute.xlu1 %2537  ;;  %v3165_v21 = vrot.slane %v3163_v24, 4  ;;  %v2481_v8 = vsel %vm7348_vm12, %v2479_v7, %v2480_v63  ;;  %v3176_v62 = vshrl.u32 %v2863_v15, 16  ;;  %v2657_v12 = vld [vmem:[#allocation2 + $0x9c] sm:$0xf]  ;;  %v3200_v60 = vshrl.u32 %v2866_v16, 16 }
 0x2ea   : > { %v2478_v14 = vsel %vm7348_vm12, %v6011_v48, %v2477_v56  ;;  %v2864_v49 = vld [vmem:[#allocation2 + $0xa4] sm:$0x1]  ;;  %v3423_v24 = vld [vmem:[#allocation2 + $0x9c] sm:$0xe] }
 0x2eb   : > { %4727 = vrot.lane.b32.xlu0 %v4648_v1, %s6970_s25  ;;  %v2109_v1 = vrot.slane %v2108_v28, 4  ;;  %v3192_v28 = vrot.slane %v3190_v57, 5  ;;  %v3178_v56 = vrot.slane %v3176_v62, 4 }
 0x2ec   : > { %4396 = vrot.lane.b32.xlu1 %v4253_v43, %s6971_s17  ;;  %v2200_v47 = vpop.permute.xlu0 %2199  ;;  %v6012_v43 = vrot.slane %v2331_v10, 9  ;;  %v3196_v10 = vshll.u32 %v2866_v16, 16  ;;  %v3955_v16 = vld [vmem:[#allocation2 + $0xac] sm:$0xf] }
 0x2ed   : > { %2278 = vst.msk [vmem:[#allocation3 + $0x48] sm:$0xf] %vm2259_vm15, %v2200_v47  ;;  %v8763_v3 = vpop.permute.xlu1 %3827  ;;  %v2333_v47 = vld [vmem:[#allocation2 + $0xa4] sm:$0x1] }
 0x2ee   : > { %2618 = vst.msk [vmem:[#allocation3 + $0x48] sm:$0xf] %vm2599_vm0, %v8694_v50  ;;  %v4657_v50 = vrot.slane %v4514_v6, 5  ;;  %v2485_v40 = vsel %vm7348_vm12, %v6012_v43, %v2484_v51  ;;  %v2487_v41 = vrot.slane %v2333_v47, 5  ;;  %v3198_v2 = vrot.slane %v3196_v10, 5 }
 0x2ef   : > { %2211 = vrot.lane.b32.xlu0 %v2080_v58, %s6967_s19  ;;  %v3202_v43 = vrot.slane %v3200_v60, 4  ;;  %v2867_v51 = vld [vmem:[#allocation2 + $0xb0] sm:$0x1]  ;;  %v3426_v47 = vld [vmem:[#allocation2 + $0xa8] sm:$0xe] }
 0x2f0   : > { %4729 = vrot.lane.b32.xlu1 %v4651_v42, %s6970_s25  ;;  %v8771_v55 = vpop.permute.xlu0 %2535  ;;  %v4658_v44 = vsel %vm7348_vm12, %v4656_v31, %v4657_v50  ;;  %v3168_v42 = vrot.slane %v3166_v26, 5  ;;  %v3189_v31 = vrot.slane %v3187_v18, 4  ;;  %v3424_v26 = vld [vmem:[#allocation2 + $0xa0] sm:$0xf]  ;;  %v3206_v63 = vshll.u32 %v2867_v51, 16 }
 0x2f1   : > { %v8775_v33 = vpop.permute.xlu1 %4380  ;;  %v3203_v7 = vor.u32 %v3202_v43, %v3198_v2  ;;  %v6028_v57 = vrot.slane %v3426_v47, 9  ;;  %v1770_v43 = vld [vmem:[#allocation2 + $0xa8] sm:$0xf]  ;;  %v3956_v51 = vld [vmem:[#allocation2 + $0xb0] sm:$0x1] }
 0x2f2   : > { %v3959_v47 = vld [vmem:[#allocation2 + $0xbc] sm:$0x1] }
 0x2f3   : > { %4731 = vrot.lane.b32.xlu0 %v4655_v54, %s6970_s25  ;;  %v3172_v54 = vshll.u32 %v2863_v15, 16 }
 0x2f4   : > { %2213 = vrot.lane.b32.xlu1 %v2090_v20, %s6967_s19  ;;  %v8781_v45 = vpop.permute.xlu0 %3290  ;;  %v3169_v20 = vor.u32 %v3168_v42, %v3165_v21  ;;  %v3204_v21 = vrot.slane %v3203_v7, 4  ;;  %v3208_v42 = vrot.slane %v3206_v63, 5 }
 0x2f5   : > { %v2202_v46 = vpop.permute.xlu1 %2201  ;;  %v3174_v48 = vrot.slane %v3172_v54, 5  ;;  %v3957_v54 = vld [vmem:[#allocation2 + $0xb4] sm:$0xf] }
 0x2f6   : > { %2279 = vst.msk [vmem:[#allocation3 + $0x4c] sm:$0xf] %vm2259_vm15, %v2202_v46 }
 0x2f7   : > { %2215 = vrot.lane.b32.xlu0 %v2104_v22, %s6967_s19  ;;  %2619 = vst.msk [vmem:[#allocation3 + $0x4c] sm:$0xf] %vm2599_vm0, %v8715_v19  ;;  %v2114_v19 = vsel %vm7376_vm14, %v2109_v1, %v2113_v52  ;;  %v2488_v22 = vsel %vm7348_vm12, %v2486_v27, %v2487_v41  ;;  %v3193_v1 = vor.u32 %v3192_v28, %v3189_v31  ;;  %v2658_v52 = vld [vmem:[#allocation2 + $0xa0] sm:$0xf]  ;;  %v4279_v28 = vshrl.u32 %v3957_v54, 16 }
 0x2f8   : > { %4733 = vrot.lane.b32.xlu1 %v4658_v44, %s6970_s25  ;;  %v2734_v53 = vpop.permute.xlu0 %2733  ;;  %v3170_v44 = vrot.slane %v3169_v20, 4 }
 0x2f9   : > { %2812 = vst.msk [vmem:[#allocation3 + $0x48] sm:$0xf] %vm2793_vm1, %v2734_v53  ;;  %v8795_v17 = vpop.permute.xlu1 %3292  ;;  %v3182_v53 = vshll.u32 %v2864_v49, 16 }
 0x2fb   : > { %2551 = vrot.lane.b32.xlu0 %v2478_v14, %s6965_s11  ;;  %v3194_v14 = vrot.slane %v3193_v1, 4 }
 0x2fc   : > { %2217 = vrot.lane.b32.xlu1 %v2114_v19, %s6967_s19  ;;  %v8801_v58 = vpop.permute.xlu0 %3821  ;;  %v3184_v19 = vrot.slane %v3182_v53, 5 }
 0x2fd   : > { %v2736_v6 = vpop.permute.xlu1 %2735 }
 0x2fe   : > { %2813 = vst.msk [vmem:[#allocation3 + $0x4c] sm:$0xf] %vm2793_vm1, %v2736_v6 }
 0x2ff   : > { %2555 = vrot.lane.b32.xlu0 %v2485_v40, %s6965_s11  ;;  %v3427_v40 = vld [vmem:[#allocation2 + $0xac] sm:$0xf] }
 0x300   : > { %2553 = vrot.lane.b32.xlu1 %v2481_v8, %s6965_s11  ;;  %v3287_v50 = vpop.permute.xlu0 %3286  ;;  %v3576_v6 = vrot.slane %v3427_v40, 5  ;;  %v4515_v40 = vld [vmem:[#allocation2 + $0xa8] sm:$0xe] }
 0x301   : > { %3369 = vst.msk [vmem:[#allocation3 + $0x38] sm:$0xf] %vm3354_vm6, %v3287_v50  ;;  %v8811_v34 = vpop.permute.xlu1 %3823 }
 0x302   : > { %3706 = vst.msk [vmem:[#allocation3 + $0x38] sm:$0xf] %vm3691_vm9, %v8728_v61  ;;  %v2659_v61 = vld [vmem:[#allocation2 + $0xa8] sm:$0xf]  ;;  %v3577_v20 = vsel %vm7348_vm12, %v6028_v57, %v3576_v6  ;;  %v3578_v60 = vrot.slane %v3576_v6, 4 }
 0x303   : > { %2745 = vrot.lane.b32.xlu0 %v2657_v12, %s6964_s30  ;;  %3900 = vst.msk [vmem:[#allocation3 + $0x38] sm:$0xf] %vm3885_vm10, %v8480_v37 }
 0x304   : > { %2557 = vrot.lane.b32.xlu1 %v2488_v22, %s6965_s11  ;;  %4461 = vst.msk [vmem:[#allocation3 + $0x38] sm:$0xf] %vm4446_vm11, %v8736_v29  ;;  %v4375_v46 = vpop.permute.xlu0 %4374  ;;  %v3179_v29 = vor.u32 %v3178_v56, %v3174_v48  ;;  %v4282_v22 = vshll.u32 %v3957_v54, 16  ;;  %v4268_v56 = vshrl.u32 %v3955_v16, 16 }
 0x305   : > { %4798 = vst.msk [vmem:[#allocation3 + $0x38] sm:$0xf] %vm4783_vm13, %v8679_v32  ;;  %v3289_v37 = vpop.permute.xlu1 %3288 }
 0x306   : > { %4459 = vst.msk [vmem:[#allocation3 + $0x30] sm:$0xf] %vm4446_vm11, %v4375_v46 }
 0x307   : > { %4796 = vst.msk [vmem:[#allocation3 + $0x30] sm:$0xf] %vm4783_vm13, %v8749_v13  ;;  %2749 = vrot.lane.b32.xlu0 %v2659_v61, %s6964_s30  ;;  %v3175_v13 = vsel %vm7376_vm14, %v3170_v44, %v3174_v48  ;;  %v3958_v61 = vld [vmem:[#allocation2 + $0xb8] sm:$0xf]  ;;  %v3749_v44 = vld [vmem:[#allocation2 + $0xa8] sm:$0xf] }
 0x308   : > { %3370 = vst.msk [vmem:[#allocation3 + $0x3c] sm:$0xf] %vm3354_vm6, %v3289_v37  ;;  %2747 = vrot.lane.b32.xlu1 %v2658_v52, %s6964_s30  ;;  %v2196_v32 = vpop.permute.xlu0 %2195  ;;  %v4281_v37 = vrot.slane %v4279_v28, 4  ;;  %v4284_v52 = vrot.slane %v4282_v22, 5 }
 0x309   : > { %3707 = vst.msk [vmem:[#allocation3 + $0x3c] sm:$0xf] %vm3691_vm9, %v8732_v59  ;;  %v4377_v9 = vpop.permute.xlu1 %4376  ;;  %v3180_v59 = vrot.slane %v3179_v29, 4 }
 0x30a   : > { %3901 = vst.msk [vmem:[#allocation3 + $0x3c] sm:$0xf] %vm3885_vm10, %v8558_v23  ;;  %v2660_v23 = vld [vmem:[#allocation2 + $0xac] sm:$0xf] }
 0x30b   : > { %2276 = vst.msk [vmem:[#allocation3 + $0x40] sm:$0xf] %vm2259_vm15, %v2196_v32  ;;  %3306 = vrot.lane.b32.xlu0 %v3175_v13, %s6969_s14  ;;  %v4288_v13 = vshll.u32 %v3958_v61, 16 }
 0x30c   : > { %4462 = vst.msk [vmem:[#allocation3 + $0x3c] sm:$0xf] %vm4446_vm11, %v8775_v33  ;;  %4460 = vst.msk [vmem:[#allocation3 + $0x34] sm:$0xf] %vm4446_vm11, %v4377_v9  ;;  %2751 = vrot.lane.b32.xlu1 %v2660_v23, %s6964_s30  ;;  %v3569_v33 = vrot.slane %v3424_v26, 5  ;;  %v4285_v23 = vor.u32 %v4284_v52, %v4281_v37 }
 0x30d   : > { %2616 = vst.msk [vmem:[#allocation3 + $0x40] sm:$0xf] %vm2599_vm0, %v8771_v55  ;;  %v3632_v55 = vpop.permute.xlu0 %3631  ;;  %v2198_v15 = vpop.permute.xlu1 %2197  ;;  %v3751_v26 = vld [vmem:[#allocation2 + $0xb4] sm:$0xf] }
 0x30e   : > { %4799 = vst.msk [vmem:[#allocation3 + $0x3c] sm:$0xf] %vm4783_vm13, %v8702_v5  ;;  %4797 = vst.msk [vmem:[#allocation3 + $0x34] sm:$0xf] %vm4783_vm13, %v8740_v38  ;;  %v6027_v5 = vrot.slane %v3423_v24, 9  ;;  %v3571_v50 = vrot.slane %v3569_v33, 4 }
 0x30f   : > { %2810 = vst.msk [vmem:[#allocation3 + $0x40] sm:$0xf] %vm2793_vm1, %v8499_v4  ;;  %v3199_v4 = vsel %vm7376_vm14, %v3194_v14, %v3198_v2  ;;  %v3954_v38 = vld [vmem:[#allocation2 + $0xa8] sm:$0xf]  ;;  %v4270_v2 = vrot.slane %v4268_v56, 4  ;;  %v4292_v14 = vshrl.u32 %v3958_v61, 16 }
 0x310   : > { %3371 = vst.msk [vmem:[#allocation3 + $0x40] sm:$0xf] %vm3354_vm6, %v8781_v45  ;;  %3310 = vrot.lane.b32.xlu0 %v3199_v4, %s6969_s14  ;;  %v3185_v45 = vsel %vm7376_vm14, %v3180_v59, %v3184_v19  ;;  %v4255_v27 = vshrl.u32 %v3954_v38, 16  ;;  %v4258_v41 = vshll.u32 %v3954_v38, 16  ;;  %v2116_v59 = vshrl.u32 %v1770_v43, 16 }
 0x311   : > { %3708 = vst.msk [vmem:[#allocation3 + $0x40] sm:$0xf] %vm3691_vm9, %v8712_v36  ;;  %v3425_v36 = vld [vmem:[#allocation2 + $0xa4] sm:$0x1]  ;;  %3308 = vrot.lane.b32.xlu1 %v3185_v45, %s6969_s14  ;;  %v3295_v18 = vpop.permute.xlu0 %3294  ;;  %v3634_v8 = vpop.permute.xlu1 %3633  ;;  %v2119_v19 = vshll.u32 %v1770_v43, 16  ;;  %v4294_v4 = vrot.slane %v4292_v14, 4 }
 0x312   : > { %3902 = vst.msk [vmem:[#allocation3 + $0x40] sm:$0xf] %vm3885_vm10, %v8801_v58  ;;  %v3570_v58 = vsel %vm7348_vm12, %v6027_v5, %v3569_v33  ;;  %v4257_v31 = vrot.slane %v4255_v27, 4  ;;  %v3750_v5 = vld [vmem:[#allocation2 + $0xac] sm:$0xf]  ;;  %v4290_v33 = vrot.slane %v4288_v13, 5 }
 0x313   : > { %2277 = vst.msk [vmem:[#allocation3 + $0x44] sm:$0xf] %vm2259_vm15, %v2198_v15  ;;  %v1771_v15 = vld [vmem:[#allocation2 + $0xac] sm:$0xf]  ;;  %v4286_v45 = vrot.slane %v4285_v23, 4 }
 0x314   : > { %2617 = vst.msk [vmem:[#allocation3 + $0x44] sm:$0xf] %vm2599_vm0, %v8754_v30  ;;  %3643 = vrot.lane.b32.xlu0 %v3570_v58, %s6966_s26  ;;  %v3572_v30 = vrot.slane %v3425_v36, 5  ;;  %v2121_v36 = vrot.slane %v2119_v19, 5  ;;  %v1773_v58 = vld [vmem:[#allocation2 + $0xb4] sm:$0xf] }
 0x315   : > { %2811 = vst.msk [vmem:[#allocation3 + $0x44] sm:$0xf] %vm2793_vm1, %v8567_v25  ;;  %v3209_v25 = vsel %vm7376_vm14, %v3204_v21, %v3208_v42  ;;  %v6736_v62 = vld [vmem:[#allocation3 + $0x30] sm:$0xff]   ;;  %v4383_v12 = vpop.permute.xlu0 %4382  ;;  %v4389_v48 = vpop.permute.xlu1 %4388  ;;  %v2118_v42 = vrot.slane %v2116_v59, 4  ;;  %v3752_v27 = vld [vmem:[#allocation2 + $0xb8] sm:$0xf] }
 0x316   : > { %3373 = vst.msk [vmem:[#allocation3 + $0x48] sm:$0xf] %vm3354_vm6, %v3295_v18  ;;  %3372 = vst.msk [vmem:[#allocation3 + $0x44] sm:$0xf] %vm3354_vm6, %v8795_v17  ;;  %3312 = vrot.lane.b32.xlu1 %v3209_v25, %s6969_s14  ;;  %v6737_v17 = vld [vmem:[#allocation3 + $0x38] sm:$0xff]   ;;  %6524 = vmatprep.mubr.msk.bf16.mxu1 %vm4971_vm3, %v6736_v62  ;;  %v3573_v10 = vsel %vm7348_vm12, %v3571_v50, %v3572_v30  ;;  %v2125_v30 = vshll.u32 %v1771_v15, 16 }
 0x317   : > { %3710 = vst.msk [vmem:[#allocation3 + $0x48] sm:$0xf] %vm3691_vm9, %v3632_v55  ;;  %3709 = vst.msk [vmem:[#allocation3 + $0x44] sm:$0xf] %vm3691_vm9, %v8724_v39  ;;  %v3428_v39 = vld [vmem:[#allocation2 + $0xb0] sm:$0x1]  ;;  %6525 = vmatmul.mubr.msk.bf16.gmra.mxu1 %vm4971_vm3, %v6737_v17  ;;  %v2122_v17 = vor.u32 %v2121_v36, %v2118_v42 }
 0x318   : > { %3904 = vst.msk [vmem:[#allocation3 + $0x48] sm:$0xf] %vm3885_vm10, %v8722_v11  ;;  %3903 = vst.msk [vmem:[#allocation3 + $0x44] sm:$0xf] %vm3885_vm10, %v8811_v34  ;;  %v4260_v11 = vrot.slane %v4258_v41, 5  ;;  %3647 = vrot.lane.b32.xlu0 %v3577_v20, %s6966_s26  ;;  %v4264_v34 = vshll.u32 %v3955_v16, 16  ;;  %v4295_v41 = vor.u32 %v4294_v4, %v4290_v33  ;;  %v4291_v16 = vsel %vm7376_vm14, %v4286_v45, %v4290_v33 }
 0x319   : > { %4463 = vst.msk [vmem:[#allocation3 + $0x40] sm:$0xf] %vm4446_vm11, %v4383_v12  ;;  %v3579_v46 = vrot.slane %v3428_v39, 5  ;;  %v4387_v49 = vpop.permute.xlu0 %4386  ;;  %v3297_v29 = vpop.permute.xlu1 %3296  ;;  %v4274_v55 = vshll.u32 %v3956_v51, 16  ;;  %v4516_v21 = vld [vmem:[#allocation2 + $0xac] sm:$0xf] }
 0x31a   : > { %3645 = vrot.lane.b32.xlu1 %v3573_v10, %s6966_s26  ;;  %4465 = vst.msk [vmem:[#allocation3 + $0x48] sm:$0xf] %vm4446_vm11, %v4387_v49  ;;  %v4261_v1 = vor.u32 %v4260_v11, %v4257_v31  ;;  %v4266_v53 = vrot.slane %v4264_v34, 5  ;;  %v2129_v54 = vshrl.u32 %v1771_v15, 16  ;;  %v6043_v62 = vrot.slane %v4515_v40, 9 }
 0x31b   : > { %3374 = vst.msk [vmem:[#allocation3 + $0x4c] sm:$0xf] %vm3354_vm6, %v3297_v29  ;;  %v3580_v32 = vsel %vm7348_vm12, %v3578_v60, %v3579_v46  ;;  %v4276_v6 = vrot.slane %v4274_v55, 5  ;;  %v4661_v50 = vrot.slane %v4516_v21, 5  ;;  %v2140_v12 = vshrl.u32 %v1773_v58, 16 }
 0x31c   : > { %3837 = vrot.lane.b32.xlu0 %v3749_v44, %s6968_s28  ;;  %3711 = vst.msk [vmem:[#allocation3 + $0x4c] sm:$0xf] %vm3691_vm9, %v3634_v8  ;;  %v4262_v9 = vrot.slane %v4261_v1, 4  ;;  %v4271_v63 = vor.u32 %v4270_v2, %v4266_v53  ;;  %v4298_v8 = vshll.u32 %v3959_v47, 16  ;;  %v2143_v20 = vshll.u32 %v1773_v58, 16 }
 0x31d   : > { %v4720_v24 = vpop.permute.xlu0 %4719  ;;  %3905 = vst.msk [vmem:[#allocation3 + $0x4c] sm:$0xf] %vm3885_vm10, %v8763_v3  ;;  %v4385_v7 = vpop.permute.xlu1 %4384  ;;  %v4517_v11 = vld [vmem:[#allocation2 + $0xb0] sm:$0x1]  ;;  %v4296_v28 = vrot.slane %v4295_v41, 4  ;;  %v2131_v56 = vrot.slane %v2129_v54, 4  ;;  %v4662_v49 = vsel %vm7348_vm12, %v6043_v62, %v4661_v50 }
 0x31e   : > { %3649 = vrot.lane.b32.xlu1 %v3580_v32, %s6966_s26  ;;  %4800 = vst.msk [vmem:[#allocation3 + $0x40] sm:$0xf] %vm4783_vm13, %v4720_v24  ;;  %v4267_v38 = vsel %vm7376_vm14, %v4262_v9, %v4266_v53  ;;  %v4272_v57 = vrot.slane %v4271_v63, 4  ;;  %v4300_v22 = vrot.slane %v4298_v8, 5  ;;  %v1772_v34 = vld [vmem:[#allocation2 + $0xb0] sm:$0x1] }
 0x31f   : > { %4466 = vst.msk [vmem:[#allocation3 + $0x4c] sm:$0xf] %vm4446_vm11, %v4389_v48  ;;  %4464 = vst.msk [vmem:[#allocation3 + $0x44] sm:$0xf] %vm4446_vm11, %v4385_v7  ;;  %v2127_v48 = vrot.slane %v2125_v30, 5  ;;  %v2123_v61 = vrot.slane %v2122_v17, 4 }
 0x320   : > { %3841 = vrot.lane.b32.xlu0 %v3751_v26, %s6968_s28  ;;  %v4277_v31 = vsel %vm7376_vm14, %v4272_v57, %v4276_v6  ;;  %v4518_v60 = vld [vmem:[#allocation2 + $0xb4] sm:$0xe]  ;;  %v1774_v46 = vld [vmem:[#allocation2 + $0xb8] sm:$0xf]  ;;  %v2142_v1 = vrot.slane %v2140_v12, 4  ;;  %v2145_v37 = vrot.slane %v2143_v20, 5  ;;  %v4301_v32 = vsel %vm7376_vm14, %v4296_v28, %v4300_v22 }
 0x321   : > { %v2204_v3 = vpop.permute.xlu0 %2203  ;;  %v4722_v18 = vpop.permute.xlu1 %4721  ;;  %v4519_v44 = vld [vmem:[#allocation2 + $0xb8] sm:$0xf]  ;;  %v4663_v53 = vrot.slane %v4661_v50, 4  ;;  %v4664_v2 = vrot.slane %v4517_v11, 5  ;;  %v2135_v43 = vshll.u32 %v1772_v34, 16  ;;  %v2132_v51 = vor.u32 %v2131_v56, %v2127_v48 }
 0x322   : > { %3839 = vrot.lane.b32.xlu1 %v3750_v5, %s6968_s28  ;;  %2280 = vst.msk [vmem:[#allocation3 + $0x50] sm:$0xf] %vm2259_vm15, %v2204_v3  ;;  %v2149_v13 = vshll.u32 %v1774_v46, 16  ;;  %v2153_v14 = vshrl.u32 %v1774_v46, 16  ;;  %v2128_v26 = vsel %vm7376_vm14, %v2123_v61, %v2127_v48  ;;  %v6044_v9 = vrot.slane %v4518_v60, 9 }
 0x323   : > { %4801 = vst.msk [vmem:[#allocation3 + $0x44] sm:$0xf] %vm4783_vm13, %v4722_v18  ;;  %v4668_v23 = vrot.slane %v4519_v44, 5  ;;  %v2146_v59 = vor.u32 %v2145_v37, %v2142_v1  ;;  %v4665_v7 = vsel %vm7348_vm12, %v4663_v53, %v4664_v2  ;;  %v2133_v63 = vrot.slane %v2132_v51, 4  ;;  %v4520_v5 = vld [vmem:[#allocation2 + $0xbc] sm:$0x1] }
 0x324   : > { %4398 = vrot.lane.b32.xlu0 %v4267_v38, %s6971_s17  ;;  %v2137_v55 = vrot.slane %v2135_v43, 5  ;;  %v2151_v33 = vrot.slane %v2149_v13, 5  ;;  %v2155_v4 = vrot.slane %v2153_v14, 4  ;;  %v1775_v47 = vld [vmem:[#allocation2 + $0xbc] sm:$0x1]  ;;  %v4671_v42 = vrot.slane %v4520_v5, 5 }
 0x325   : > { %v4724_v25 = vpop.permute.xlu0 %4723  ;;  %v2206_v39 = vpop.permute.xlu1 %2205  ;;  %v4669_v40 = vsel %vm7348_vm12, %v6044_v9, %v4668_v23  ;;  %v2147_v15 = vrot.slane %v2146_v59, 4  ;;  %v2334_v38 = vld [vmem:[#allocation2 + $0xa8] sm:$0xe]  ;;  %v2335_v36 = vld [vmem:[#allocation2 + $0xac] sm:$0xf]  ;;  %v4670_v57 = vrot.slane %v4668_v23, 4 }
 0x326   : > { %3843 = vrot.lane.b32.xlu1 %v3752_v27, %s6968_s28  ;;  %4802 = vst.msk [vmem:[#allocation3 + $0x48] sm:$0xf] %vm4783_vm13, %v4724_v25  ;;  %v2138_v18 = vsel %vm7376_vm14, %v2133_v63, %v2137_v55  ;;  %v2156_v6 = vor.u32 %v2155_v4, %v2151_v33  ;;  %v2159_v58 = vshll.u32 %v1775_v47, 16  ;;  %v6013_v8 = vrot.slane %v2334_v38, 9  ;;  %v2337_v54 = vld [vmem:[#allocation2 + $0xb4] sm:$0xe] }
 0x327   : > { %2281 = vst.msk [vmem:[#allocation3 + $0x54] sm:$0xf] %vm2259_vm15, %v2206_v39  ;;  %v2152_v41 = vsel %vm7376_vm14, %v2147_v15, %v2151_v33  ;;  %v2491_v30 = vrot.slane %v2335_v36, 5  ;;  %v2338_v25 = vld [vmem:[#allocation2 + $0xb8] sm:$0xf] }
 0x328   : > { %4402 = vrot.lane.b32.xlu0 %v4291_v16, %s6971_s17  ;;  %v2868_v50 = vld [vmem:[#allocation2 + $0xb4] sm:$0xf]  ;;  %v4672_v16 = vsel %vm7348_vm12, %v4670_v57, %v4671_v42  ;;  %v2157_v17 = vrot.slane %v2156_v6, 4  ;;  %v2161_v12 = vrot.slane %v2159_v58, 5  ;;  %v2336_v39 = vld [vmem:[#allocation2 + $0xb0] sm:$0x1] }
 0x329   : > { %v2208_v10 = vpop.permute.xlu0 %2207  ;;  %v4726_v52 = vpop.permute.xlu1 %4725  ;;  %v2498_v11 = vrot.slane %v2338_v25, 5  ;;  %v2492_v28 = vsel %vm7348_vm12, %v6013_v8, %v2491_v30  ;;  %v3211_v22 = vshrl.u32 %v2868_v50, 16  ;;  %v3214_v48 = vshll.u32 %v2868_v50, 16  ;;  %v2871_v56 = vld [vmem:[#allocation2 + $0xc0] sm:$0xf] }
 0x32a   : > { %4400 = vrot.lane.b32.xlu1 %v4277_v31, %s6971_s17  ;;  %2282 = vst.msk [vmem:[#allocation3 + $0x58] sm:$0xf] %vm2259_vm15, %v2208_v10  ;;  %v6738_v29 = vld [vmem:[#allocation3 + $0x40] sm:$0xff]   ;;  %v6014_v31 = vrot.slane %v2337_v54, 9  ;;  %v2162_v10 = vsel %vm7376_vm14, %v2157_v17, %v2161_v12  ;;  %v2493_v60 = vrot.slane %v2491_v30, 4  ;;  %v2494_v46 = vrot.slane %v2336_v39, 5 }
 0x32b   : > { %4803 = vst.msk [vmem:[#allocation3 + $0x4c] sm:$0xf] %vm4783_vm13, %v4726_v52  ;;  %6528 = vmatprep.mubr.msk.bf16.mxu1 %vm4971_vm3, %v6738_v29  ;;  %v2869_v1 = vld [vmem:[#allocation2 + $0xb8] sm:$0xf]  ;;  %v3213_v37 = vrot.slane %v3211_v22, 4  ;;  %v3216_v52 = vrot.slane %v3214_v48, 5 }
 0x32c   : > { %4735 = vrot.lane.b32.xlu0 %v4662_v49, %s6970_s25  ;;  %v2339_v49 = vld [vmem:[#allocation2 + $0xbc] sm:$0x1]  ;;  %v2499_v44 = vsel %vm7348_vm12, %v6014_v31, %v2498_v11  ;;  %v3235_v29 = vshrl.u32 %v2871_v56, 16  ;;  %v3238_v53 = vshll.u32 %v2871_v56, 16  ;;  %v2500_v43 = vrot.slane %v2498_v11, 4 }
 0x32d   : > { %v2544_v24 = vpop.permute.xlu0 %2543  ;;  %v2210_v19 = vpop.permute.xlu1 %2209  ;;  %v2495_v51 = vsel %vm7348_vm12, %v2493_v60, %v2494_v46  ;;  %v3220_v13 = vshll.u32 %v2869_v1, 16  ;;  %v3224_v14 = vshrl.u32 %v2869_v1, 16  ;;  %v2661_v9 = vld [vmem:[#allocation2 + $0xb4] sm:$0xf]  ;;  %v3217_v23 = vor.u32 %v3216_v52, %v3213_v37  ;;  %v2870_v47 = vld [vmem:[#allocation2 + $0xbc] sm:$0x1] }
 0x32e   : > { %4404 = vrot.lane.b32.xlu1 %v4301_v32, %s6971_s17  ;;  %2620 = vst.msk [vmem:[#allocation3 + $0x50] sm:$0xf] %vm2599_vm0, %v2544_v24  ;;  %v2501_v32 = vrot.slane %v2339_v49, 5  ;;  %v3237_v59 = vrot.slane %v3235_v29, 4  ;;  %v3230_v36 = vshll.u32 %v2870_v47, 16 }
 0x32f   : > { %2283 = vst.msk [vmem:[#allocation3 + $0x5c] sm:$0xf] %vm2259_vm15, %v2210_v19  ;;  %v3240_v19 = vrot.slane %v3238_v53, 5  ;;  %v3222_v55 = vrot.slane %v3220_v13, 5  ;;  %v3226_v5 = vrot.slane %v3224_v14, 4  ;;  %v3218_v15 = vrot.slane %v3217_v23, 4 }
 0x330   : > { %2219 = vrot.lane.b32.xlu0 %v2128_v26, %s6967_s19  ;;  %v2872_v26 = vld [vmem:[#allocation2 + $0xc4] sm:$0xf]  ;;  %v2502_v63 = vsel %vm7348_vm12, %v2500_v43, %v2501_v32  ;;  %v2873_v58 = vld [vmem:[#allocation2 + $0xc8] sm:$0x1]  ;;  %v3429_v30 = vld [vmem:[#allocation2 + $0xb4] sm:$0xe] }
 0x331   : > { %v2548_v3 = vpop.permute.xlu0 %2547  ;;  %v2546_v45 = vpop.permute.xlu1 %2545  ;;  %v3244_v33 = vshll.u32 %v2872_v26, 16  ;;  %v3248_v4 = vshrl.u32 %v2872_v26, 16  ;;  %v3241_v38 = vor.u32 %v3240_v19, %v3237_v59  ;;  %v3227_v42 = vor.u32 %v3226_v5, %v3222_v55  ;;  %v3430_v54 = vld [vmem:[#allocation2 + $0xb8] sm:$0xf]  ;;  %v2664_v25 = vld [vmem:[#allocation2 + $0xc4] sm:$0xf] }
 0x332   : > { %4737 = vrot.lane.b32.xlu1 %v4665_v7, %s6970_s25  ;;  %2622 = vst.msk [vmem:[#allocation3 + $0x58] sm:$0xf] %vm2599_vm0, %v2548_v3  ;;  %v6739_v21 = vld [vmem:[#allocation3 + $0x48] sm:$0xff]   ;;  %2621 = vst.msk [vmem:[#allocation3 + $0x54] sm:$0xf] %vm2599_vm0, %v2546_v45  ;;  %v3232_v50 = vrot.slane %v3230_v36, 5 }
 0x333   : > { %6529 = vmatmul.mubr.msk.bf16.gmra.mxu1 %vm4971_vm3, %v6739_v21  ;;  %v2662_v21 = vld [vmem:[#allocation2 + $0xb8] sm:$0xf]  ;;  %v3250_v57 = vrot.slane %v3248_v4, 4  ;;  %v3254_v17 = vshll.u32 %v2873_v58, 16  ;;  %v6029_v39 = vrot.slane %v3429_v30, 9  ;;  %v3583_v31 = vrot.slane %v3430_v54, 5 }
 0x334   : > { %4739 = vrot.lane.b32.xlu0 %v4669_v40, %s6970_s25  ;;  %v2663_v40 = vld [vmem:[#allocation2 + $0xc0] sm:$0xf]  ;;  %v3431_v46 = vld [vmem:[#allocation2 + $0xbc] sm:$0x1]  ;;  %v3963_v29 = vld [vmem:[#allocation2 + $0xcc] sm:$0xf] }
 0x335   : > { %v2738_v27 = vpop.permute.xlu0 %2737  ;;  %v2550_v62 = vpop.permute.xlu1 %2549  ;;  %v3432_v11 = vld [vmem:[#allocation2 + $0xc0] sm:$0xe]  ;;  %v3586_v43 = vrot.slane %v3431_v46, 5  ;;  %v3434_v32 = vld [vmem:[#allocation2 + $0xc8] sm:$0x1]  ;;  %v4330_v23 = vshll.u32 %v3963_v29, 16 }
 0x336   : > { %2221 = vrot.lane.b32.xlu1 %v2138_v18, %s6967_s19  ;;  %2814 = vst.msk [vmem:[#allocation3 + $0x50] sm:$0xf] %vm2793_vm1, %v2738_v27  ;;  %v3246_v18 = vrot.slane %v3244_v33, 5  ;;  %v3223_v27 = vsel %vm7376_vm14, %v3218_v15, %v3222_v55  ;;  %v3960_v48 = vld [vmem:[#allocation2 + $0xc0] sm:$0xf]  ;;  %v6030_v49 = vrot.slane %v3432_v11, 9 }
 0x337   : > { %2623 = vst.msk [vmem:[#allocation3 + $0x5c] sm:$0xf] %vm2599_vm0, %v2550_v62  ;;  %v3228_v62 = vrot.slane %v3227_v42, 4  ;;  %v4303_v1 = vshrl.u32 %v3960_v48, 16  ;;  %v4306_v37 = vshll.u32 %v3960_v48, 16  ;;  %v4332_v15 = vrot.slane %v4330_v23, 5 }
 0x338   : > { %2223 = vrot.lane.b32.xlu0 %v2152_v41, %s6967_s19  ;;  %v3242_v41 = vrot.slane %v3241_v38, 4  ;;  %v3961_v14 = vld [vmem:[#allocation2 + $0xc4] sm:$0xf]  ;;  %v3964_v4 = vld [vmem:[#allocation2 + $0xd0] sm:$0xf] }
 0x339   : > { %v2742_v20 = vpop.permute.xlu0 %2741  ;;  %v2740_v34 = vpop.permute.xlu1 %2739  ;;  %v4308_v26 = vrot.slane %v4306_v37, 5  ;;  %v4312_v55 = vshll.u32 %v3961_v14, 16  ;;  %v4316_v5 = vshrl.u32 %v3961_v14, 16  ;;  %v4336_v36 = vshll.u32 %v3964_v4, 16  ;;  %v3962_v58 = vld [vmem:[#allocation2 + $0xc8] sm:$0x1] }
 0x33a   : > { %4741 = vrot.lane.b32.xlu1 %v4672_v16, %s6970_s25  ;;  %2816 = vst.msk [vmem:[#allocation3 + $0x58] sm:$0xf] %vm2793_vm1, %v2742_v20  ;;  %2815 = vst.msk [vmem:[#allocation3 + $0x54] sm:$0xf] %vm2793_vm1, %v2740_v34  ;;  %v3251_v16 = vor.u32 %v3250_v57, %v3246_v18  ;;  %v3247_v20 = vsel %vm7376_vm14, %v3242_v41, %v3246_v18  ;;  %v3233_v34 = vsel %vm7376_vm14, %v3228_v62, %v3232_v50  ;;  %v6744_v57 = vld [vmem:[%s9317_s7 + $0x38] sm:$0xff]   ;;  %v6745_v11 = vld [vmem:[%s9317_s7 + $0x30] sm:$0xff]  }
 0x33b   : > { %v4318_v42 = vrot.slane %v4316_v5, 4  ;;  %v4340_v18 = vshrl.u32 %v3964_v4, 16  ;;  %6544 = vmatprep.subr.bf16.mxu1 %v6744_v57  ;;  %v3754_v54 = vld [vmem:[#allocation2 + $0xc4] sm:$0xf]  ;;  %v4322_v62 = vshll.u32 %v3962_v58, 16  ;;  %v4338_v50 = vrot.slane %v4336_v36, 5 }
 0x33c   : > { %2559 = vrot.lane.b32.xlu0 %v2492_v28, %s6965_s11  ;;  %v3433_v28 = vld [vmem:[#allocation2 + $0xc4] sm:$0xf]  ;;  %v3252_v56 = vrot.slane %v3251_v16, 4  ;;  %6545 = vmatpush3.bf16.msra.mxu1 %v6744_v57  ;;  %v4521_v48 = vld [vmem:[#allocation2 + $0xc0] sm:$0xe] }
 0x33d   : > { %v3299_v61 = vpop.permute.xlu0 %3298  ;;  %v2744_v2 = vpop.permute.xlu1 %2743  ;;  %v4342_v16 = vrot.slane %v4340_v18, 4  ;;  %6546 = vmatprep.subr.bf16.mxu1 %v6745_v11  ;;  %v6747_v37 = vld [vmem:[%s9317_s7 + $0x20] sm:$0xff]   ;;  %v4526_v5 = vld [vmem:[#allocation2 + $0xd4] sm:$0x1] }
 0x33e   : > { %2225 = vrot.lane.b32.xlu1 %v2162_v10, %s6967_s19  ;;  %3375 = vst.msk [vmem:[#allocation3 + $0x50] sm:$0xf] %vm3354_vm6, %v3299_v61  ;;  %v3256_v10 = vrot.slane %v3254_v17, 5  ;;  %v3590_v61 = vrot.slane %v3433_v28, 5  ;;  %v6746_v28 = vld [vmem:[%s9317_s7 + $0x28] sm:$0xff]   ;;  %v6753_v57 = vld [vmem:[%s9317_s7] sm:$0xff]  }
 0x33f   : > { %2817 = vst.msk [vmem:[#allocation3 + $0x5c] sm:$0xf] %vm2793_vm1, %v2744_v2  ;;  %v3585_v2 = vrot.slane %v3583_v31, 4 }
 0x340   : > { %2563 = vrot.lane.b32.xlu0 %v2499_v44, %s6965_s11  ;;  %v3584_v44 = vsel %vm7348_vm12, %v6029_v39, %v3583_v31  ;;  %v3257_v53 = vsel %vm7376_vm14, %v3252_v56, %v3256_v10  ;;  %v3591_v13 = vsel %vm7348_vm12, %v6030_v49, %v3590_v61  ;;  %v3592_v19 = vrot.slane %v3590_v61, 4  ;;  %6547 = vmatpush3.bf16.msra.mxu1 %v6745_v11 }
 0x341   : > { %v3303_v24 = vpop.permute.xlu0 %3302  ;;  %v3301_v7 = vpop.permute.xlu1 %3300  ;;  %v4324_v10 = vrot.slane %v4322_v62, 5  ;;  %6548 = vmatprep.subr.bf16.mxu1 %v6746_v28 }
 0x342   : > { %2561 = vrot.lane.b32.xlu1 %v2495_v51, %s6965_s11  ;;  %3377 = vst.msk [vmem:[#allocation3 + $0x58] sm:$0xf] %vm3354_vm6, %v3303_v24  ;;  %3376 = vst.msk [vmem:[#allocation3 + $0x54] sm:$0xf] %vm3354_vm6, %v3301_v7  ;;  %v4305_v24 = vrot.slane %v4303_v1, 4  ;;  %v3593_v7 = vrot.slane %v3434_v32, 5 }
 0x344   : > { %2753 = vrot.lane.b32.xlu0 %v2661_v9, %s6964_s30  ;;  %v4327_v9 = vshrl.u32 %v3963_v29, 16  ;;  %v4309_v47 = vor.u32 %v4308_v26, %v4305_v24  ;;  %v4524_v29 = vld [vmem:[#allocation2 + $0xcc] sm:$0xe]  ;;  %6549 = vmatpush3.bf16.msra.mxu1 %v6746_v28 }
 0x345   : > { %v3636_v3 = vpop.permute.xlu0 %3635  ;;  %v6046_v24 = vrot.slane %v4524_v29, 9  ;;  %6550 = vmatprep.subr.bf16.mxu1 %v6747_v37 }
 0x346   : > { %2565 = vrot.lane.b32.xlu1 %v2502_v63, %s6965_s11  ;;  %3712 = vst.msk [vmem:[#allocation3 + $0x50] sm:$0xf] %vm3691_vm9, %v3636_v3  ;;  %v3305_v45 = vpop.permute.xlu1 %3304  ;;  %v3587_v63 = vsel %vm7348_vm12, %v3585_v2, %v3586_v43  ;;  %v3753_v3 = vld [vmem:[#allocation2 + $0xc0] sm:$0xf]  ;;  %v4310_v41 = vrot.slane %v4309_v47, 4  ;;  %s9197_s11 = scalar_lea.vmem [#allocation12], %s5931_s18 }
 0x347   : > { %3378 = vst.msk [vmem:[#allocation3 + $0x5c] sm:$0xf] %vm3354_vm6, %v3305_v45  ;;  %v3594_v45 = vsel %vm7348_vm12, %v3592_v19, %v3593_v7  ;;  %s6203_s18 = sshll.u32 %s6947_s12, 11  ;;  %s6972_s12 = smov [#allocation12]  }
 0x348   : > { %2757 = vrot.lane.b32.xlu0 %v2663_v40, %s6964_s30  ;;  %v4329_v40 = vrot.slane %v4327_v9, 4  ;;  %6551 = vmatpush3.bf16.msra.mxu1 %v6747_v37 }
 0x349   : > { %v3640_v6 = vpop.permute.xlu0 %3639 }
 0x34a   : > { %2755 = vrot.lane.b32.xlu1 %v2662_v21, %s6964_s30  ;;  %3714 = vst.msk [vmem:[#allocation3 + $0x58] sm:$0xf] %vm3691_vm9, %v3640_v6  ;;  %v3638_v8 = vpop.permute.xlu1 %3637  ;;  %v4314_v21 = vrot.slane %v4312_v55, 5 }
 0x34b   : > { %3713 = vst.msk [vmem:[#allocation3 + $0x54] sm:$0xf] %vm3691_vm9, %v3638_v8  ;;  %v4333_v8 = vor.u32 %v4332_v15, %v4329_v40  ;;  %v4685_v40 = vrot.slane %v4526_v5, 5 }
 0x34c   : > { %3314 = vrot.lane.b32.xlu0 %v3223_v27, %s6969_s14  ;;  %v3755_v27 = vld [vmem:[#allocation2 + $0xcc] sm:$0xf]  ;;  %v4315_v39 = vsel %vm7376_vm14, %v4310_v41, %v4314_v21 }
 0x34d   : > { %v3830_v12 = vpop.permute.xlu0 %3829  ;;  %v4334_v31 = vrot.slane %v4333_v8, 4 }
 0x34e   : > { %2759 = vrot.lane.b32.xlu1 %v2664_v25, %s6964_s30  ;;  %3906 = vst.msk [vmem:[#allocation3 + $0x50] sm:$0xf] %vm3885_vm10, %v3830_v12  ;;  %v3642_v22 = vpop.permute.xlu1 %3641  ;;  %v4319_v25 = vor.u32 %v4318_v42, %v4314_v21  ;;  %v3965_v12 = vld [vmem:[#allocation2 + $0xd4] sm:$0x1]  ;;  %v6752_v21 = vld [vmem:[%s9317_s7 + $0x8] sm:$0xff]  }
 0x34f   : > { %3715 = vst.msk [vmem:[#allocation3 + $0x5c] sm:$0xf] %vm3691_vm9, %v3642_v22  ;;  %v4346_v46 = vshll.u32 %v3965_v12, 16  ;;  %v4339_v61 = vsel %vm7376_vm14, %v4334_v31, %v4338_v50 }
 0x350   : > { %3318 = vrot.lane.b32.xlu0 %v3247_v20, %s6969_s14  ;;  %v3756_v20 = vld [vmem:[#allocation2 + $0xd0] sm:$0xf]  ;;  %v4320_v56 = vrot.slane %v4319_v25, 4 }
 0x351   : > { %v3834_v60 = vpop.permute.xlu0 %3833  ;;  %v4348_v32 = vrot.slane %v4346_v46, 5 }
 0x352   : > { %3316 = vrot.lane.b32.xlu1 %v3233_v34, %s6969_s14  ;;  %3908 = vst.msk [vmem:[#allocation3 + $0x58] sm:$0xf] %vm3885_vm10, %v3834_v60  ;;  %v3832_v52 = vpop.permute.xlu1 %3831  ;;  %v4522_v34 = vld [vmem:[#allocation2 + $0xc4] sm:$0xf]  ;;  %v4343_v60 = vor.u32 %v4342_v16, %v4338_v50  ;;  %v4325_v2 = vsel %vm7376_vm14, %v4320_v56, %v4324_v10 }
 0x353   : > { %3907 = vst.msk [vmem:[#allocation3 + $0x54] sm:$0xf] %vm3885_vm10, %v3832_v52  ;;  %v4675_v1 = vrot.slane %v4522_v34, 5 }
 0x354   : > { %3651 = vrot.lane.b32.xlu0 %v3584_v44, %s6966_s26  ;;  %v6045_v44 = vrot.slane %v4521_v48, 9  ;;  %v4344_v43 = vrot.slane %v4343_v60, 4 }
 0x355   : > { %v4391_v51 = vpop.permute.xlu0 %4390  ;;  %v4677_v7 = vrot.slane %v4675_v1, 4 }
 0x356   : > { %3320 = vrot.lane.b32.xlu1 %v3257_v53, %s6969_s14  ;;  %4467 = vst.msk [vmem:[#allocation3 + $0x50] sm:$0xf] %vm4446_vm11, %v4391_v51  ;;  %v3836_v59 = vpop.permute.xlu1 %3835  ;;  %v4525_v53 = vld [vmem:[#allocation2 + $0xd0] sm:$0xf]  ;;  %v4676_v14 = vsel %vm7348_vm12, %v6045_v44, %v4675_v1  ;;  %v4349_v19 = vsel %vm7376_vm14, %v4344_v43, %v4348_v32  ;;  %s9377_s14 = sld [smem:[#allocation30_spill]] }
 0x357   : > { %3909 = vst.msk [vmem:[#allocation3 + $0x5c] sm:$0xf] %vm3885_vm10, %v3836_v59  ;;  %v4682_v26 = vrot.slane %v4525_v53, 5  ;;  %v6748_v59 = vld [vmem:[%s9317_s7 + $0x18] sm:$0xff]  }
 0x358   : > { %3655 = vrot.lane.b32.xlu0 %v3591_v13, %s6966_s26  ;;  %v4523_v13 = vld [vmem:[#allocation2 + $0xc8] sm:$0x1]  ;;  %6552 = vmatprep.subr.bf16.mxu1 %v6748_v59 }
 0x359   : > { %v4395_v33 = vpop.permute.xlu0 %4394  ;;  %v4684_v47 = vrot.slane %v4682_v26, 4  ;;  %6553 = vmatpush3.bf16.msra.mxu1 %v6748_v59 }
 0x35a   : > { %3653 = vrot.lane.b32.xlu1 %v3587_v63, %s6966_s26  ;;  %4469 = vst.msk [vmem:[#allocation3 + $0x58] sm:$0xf] %vm4446_vm11, %v4395_v33  ;;  %v4393_v38 = vpop.permute.xlu1 %4392  ;;  %v4678_v63 = vrot.slane %v4523_v13, 5  ;;  %v4683_v33 = vsel %vm7348_vm12, %v6046_v24, %v4682_v26  ;;  %6554 = vmatprep.subr.bf16.mxu1 %v6750_v0 }
 0x35b   : > { %4468 = vst.msk [vmem:[#allocation3 + $0x54] sm:$0xf] %vm4446_vm11, %v4393_v38  ;;  %v4686_v42 = vsel %vm7348_vm12, %v4684_v47, %v4685_v40 }
 0x35c   : > { %3845 = vrot.lane.b32.xlu0 %v3753_v3, %s6968_s28  ;;  %v4679_v3 = vsel %vm7348_vm12, %v4677_v7, %v4678_v63  ;;  %v6514_v63 = vpop.f32.mrf.mxu0  ;;  %s9256_s24 = scalar_lea.hbm %s9377_s14, %s6203_s18 }
 0x35d   : > { %v4728_v6 = vpop.permute.xlu0 %4727  ;;  %6555 = vmatpush3.bf16.msra.mxu1 %v6750_v0 }
 0x35e   : > { %3657 = vrot.lane.b32.xlu1 %v3594_v45, %s6966_s26  ;;  %4804 = vst.msk [vmem:[#allocation3 + $0x50] sm:$0xf] %vm4783_vm13, %v4728_v6  ;;  %v4397_v30 = vpop.permute.xlu1 %4396  ;;  %6556 = vmatprep.subr.bf16.mxu1 %v6752_v21 }
 0x35f   : > { %4470 = vst.msk [vmem:[#allocation3 + $0x5c] sm:$0xf] %vm4446_vm11, %v4397_v30 }
 0x360   : > { %3849 = vrot.lane.b32.xlu0 %v3755_v27, %s6968_s28 }
 0x361   : > { %v2212_v17 = vpop.permute.xlu0 %2211  ;;  %6557 = vmatpush3.bf16.msra.mxu1 %v6752_v21 }
 0x362   : > { %3847 = vrot.lane.b32.xlu1 %v3754_v54, %s6968_s28  ;;  %2284 = vst.msk [vmem:[#allocation3 + $0x60] sm:$0xf] %vm2259_vm15, %v2212_v17  ;;  %v4730_v22 = vpop.permute.xlu1 %4729  ;;  %6558 = vmatprep.subr.bf16.mxu1 %v6753_v57 }
 0x363   : > { %4805 = vst.msk [vmem:[#allocation3 + $0x54] sm:$0xf] %vm4783_vm13, %v4730_v22 }
 0x364   : > { %4406 = vrot.lane.b32.xlu0 %v4315_v39, %s6971_s17 }
 0x365   : > { %v4732_v49 = vpop.permute.xlu0 %4731  ;;  %6559 = vmatpush3.bf16.msra.mxu1 %v6753_v57 }
 0x366   : > { %3851 = vrot.lane.b32.xlu1 %v3756_v20, %s6968_s28  ;;  %4806 = vst.msk [vmem:[#allocation3 + $0x58] sm:$0xf] %vm4783_vm13, %v4732_v49  ;;  %v2214_v52 = vpop.permute.xlu1 %2213  ;;  %s9378_s28 = smov %s9377_s14 }
 0x367   : > { %2285 = vst.msk [vmem:[#allocation3 + $0x64] sm:$0xf] %vm2259_vm15, %v2214_v52 }
 0x368   : > { %4410 = vrot.lane.b32.xlu0 %v4339_v61, %s6971_s17 }
 0x369   : > { %v2216_v51 = vpop.permute.xlu0 %2215 }
 0x36a   : > { %4408 = vrot.lane.b32.xlu1 %v4325_v2, %s6971_s17  ;;  %2286 = vst.msk [vmem:[#allocation3 + $0x68] sm:$0xf] %vm2259_vm15, %v2216_v51  ;;  %v4734_v9 = vpop.permute.xlu1 %4733  ;;  %v6740_v23 = vld [vmem:[#allocation3 + $0x50] sm:$0xff]  }
 0x36b   : > { %4807 = vst.msk [vmem:[#allocation3 + $0x5c] sm:$0xf] %vm4783_vm13, %v4734_v9  ;;  %6532 = vmatprep.mubr.msk.bf16.mxu1 %vm4971_vm3, %v6740_v23 }
 0x36c   : > { %4743 = vrot.lane.b32.xlu0 %v4676_v14, %s6970_s25 }
 0x36d   : > { %v2552_v55 = vpop.permute.xlu0 %2551 }
 0x36e   : > { %4412 = vrot.lane.b32.xlu1 %v4349_v19, %s6971_s17  ;;  %2624 = vst.msk [vmem:[#allocation3 + $0x60] sm:$0xf] %vm2599_vm0, %v2552_v55  ;;  %v2218_v4 = vpop.permute.xlu1 %2217  ;;  %s6871_s17 = sshll.u32 %s6972_s12, 4  ;;  %s6872_s17 = int_to_ptr.vmem [resolvable:$false] %s6871_s17 }
 0x36f   : > { %2287 = vst.msk [vmem:[#allocation3 + $0x6c] sm:$0xf] %vm2259_vm15, %v2218_v4  ;;  %s6873_s29 = scalar_lea.vmem %s6872_s17, 4096 }
 0x370   : > { %4747 = vrot.lane.b32.xlu0 %v4683_v33, %s6970_s25  ;;  %v5058_v33 = vpop.f32.mrf.mxu0 }
 0x371   : > { %v2556_v15 = vpop.permute.xlu0 %2555 }
 0x372   : > { %4745 = vrot.lane.b32.xlu1 %v4679_v3, %s6970_s25  ;;  %2626 = vst.msk [vmem:[#allocation3 + $0x68] sm:$0xf] %vm2599_vm0, %v2556_v15  ;;  %v2554_v38 = vpop.permute.xlu1 %2553  ;;  %v6741_v45 = vld [vmem:[#allocation3 + $0x58] sm:$0xff]   ;;  %v6515_v3 = vpop.f32.mrf.mxu0 }
 0x373   : > { %2625 = vst.msk [vmem:[#allocation3 + $0x64] sm:$0xf] %vm2599_vm0, %v2554_v38  ;;  %6533 = vmatmul.mubr.msk.bf16.gmra.mxu1 %vm4971_vm3, %v6741_v45 }
 0x374   : > { %v5061_v38 = vpop.f32.mrf.mxu0 }
 0x375   : > { %v2746_v36 = vpop.permute.xlu0 %2745 }
 0x376   : > { %4749 = vrot.lane.b32.xlu1 %v4686_v42, %s6970_s25  ;;  %2818 = vst.msk [vmem:[#allocation3 + $0x60] sm:$0xf] %vm2793_vm1, %v2746_v36  ;;  %v2558_v18 = vpop.permute.xlu1 %2557  ;;  %v6518_v21 = vpop.f32.mrf.mxu0 }
 0x377   : > { %2627 = vst.msk [vmem:[#allocation3 + $0x6c] sm:$0xf] %vm2599_vm0, %v2558_v18 }
 0x378   : > { %v5074_v57 = vpop.f32.mrf.mxu0 }
 0x379   : > { %v2750_v6 = vpop.permute.xlu0 %2749 }
 0x37a   : > { %2820 = vst.msk [vmem:[#allocation3 + $0x68] sm:$0xf] %vm2793_vm1, %v2750_v6  ;;  %v2748_v35 = vpop.permute.xlu1 %2747 }
 0x37b   : > { %2819 = vst.msk [vmem:[#allocation3 + $0x64] sm:$0xf] %vm2793_vm1, %v2748_v35  ;;  %v9143_v35 = vld [vmem:[%s9316_s6] ss:$0 sm:$0xff] }
 0x37d   : > { %v3307_v58 = vpop.permute.xlu0 %3306 }
 0x37e   : > { %3379 = vst.msk [vmem:[#allocation3 + $0x60] sm:$0xf] %vm3354_vm6, %v3307_v58  ;;  %v2752_v27 = vpop.permute.xlu1 %2751 }
 0x37f   : > { %2821 = vst.msk [vmem:[#allocation3 + $0x6c] sm:$0xf] %vm2793_vm1, %v2752_v27  ;;  %v5062_v27 = vadd.f32 %v9143_v35, %v5061_v38 }
 0x382   : > { %v3311_v41 = vpop.permute.xlu0 %3310 }
 0x383   : > { %3381 = vst.msk [vmem:[#allocation3 + $0x68] sm:$0xf] %vm3354_vm6, %v3311_v41  ;;  %v3309_v8 = vpop.permute.xlu1 %3308  ;;  %v6519_v41 = vpop.f32.mrf.mxu0 }
 0x384   : > { %3380 = vst.msk [vmem:[#allocation3 + $0x64] sm:$0xf] %vm3354_vm6, %v3309_v8 }
 0x386   : > { %v3644_v30 = vpop.permute.xlu0 %3643 }
 0x387   : > { %3716 = vst.msk [vmem:[#allocation3 + $0x60] sm:$0xf] %vm3691_vm9, %v3644_v30  ;;  %v5059_v30 = vadd.f32 %v9143_v35, %v5058_v33 }
 0x388   : > { %v3313_v54 = vpop.permute.xlu1 %3312 }
 0x389   : > { %3382 = vst.msk [vmem:[#allocation3 + $0x6c] sm:$0xf] %vm3354_vm6, %v3313_v54 }
 0x38a   : > { %v3648_v25 = vpop.permute.xlu0 %3647 }
 0x38b   : > { %3718 = vst.msk [vmem:[#allocation3 + $0x68] sm:$0xf] %vm3691_vm9, %v3648_v25 }
 0x38c   : > { %v3646_v62 = vpop.permute.xlu1 %3645 }
 0x38d   : > { %3717 = vst.msk [vmem:[#allocation3 + $0x64] sm:$0xf] %vm3691_vm9, %v3646_v62  ;;  %v5186_v62 = vmax.f32 %v5062_v27, 0.0 }
 0x38e   : > { %v3838_v50 = vpop.permute.xlu0 %3837 }
 0x38f   : > { %3910 = vst.msk [vmem:[#allocation3 + $0x60] sm:$0xf] %vm3885_vm10, %v3838_v50  ;;  %v5077_v50 = vpop.f32.mrf.mxu0 }
 0x390   : > { %v3650_v16 = vpop.permute.xlu1 %3649 }
 0x391   : > { %3719 = vst.msk [vmem:[#allocation3 + $0x6c] sm:$0xf] %vm3691_vm9, %v3650_v16  ;;  %v5185_v16 = vmax.f32 %v5059_v30, 0.0 }
 0x392   : > { %v3842_v17 = vpop.permute.xlu0 %3841 }
 0x393   : > { %3912 = vst.msk [vmem:[#allocation3 + $0x68] sm:$0xf] %vm3885_vm10, %v3842_v17  ;;  %v5070_v17 = vadd.f32 %v6515_v3, %v9143_v35 }
 0x394   : > { %v3840_v12 = vpop.permute.xlu1 %3839 }
 0x395   : > { %3911 = vst.msk [vmem:[#allocation3 + $0x64] sm:$0xf] %vm3885_vm10, %v3840_v12 }
 0x396   : > { %v4399_v20 = vpop.permute.xlu0 %4398 }
 0x397   : > { %4471 = vst.msk [vmem:[#allocation3 + $0x60] sm:$0xf] %vm4446_vm11, %v4399_v20 }
 0x398   : > { %v3844_v39 = vpop.permute.xlu1 %3843 }
 0x399   : > { %3913 = vst.msk [vmem:[#allocation3 + $0x6c] sm:$0xf] %vm3885_vm10, %v3844_v39  ;;  %v5217_v39 = vpack.c.bf16 %v5186_v62, %v5185_v16 }
 0x39a   : > { %v4403_v31 = vpop.permute.xlu0 %4402  ;;  %v6522_v40 = vpop.f32.mrf.mxu1 }
 0x39b   : > { %4473 = vst.msk [vmem:[#allocation3 + $0x68] sm:$0xf] %vm4446_vm11, %v4403_v31  ;;  %v5078_v31 = vadd.f32 %v9143_v35, %v5077_v50 }
 0x39c   : > { %v4401_v11 = vpop.permute.xlu1 %4400  ;;  %v5090_v42 = vpop.f32.mrf.mxu1 }
 0x39d   : > { %4472 = vst.msk [vmem:[#allocation3 + $0x64] sm:$0xf] %vm4446_vm11, %v4401_v11  ;;  %v5067_v11 = vadd.f32 %v6514_v63, %v9143_v35 }
 0x39e   : > { %v4736_v28 = vpop.permute.xlu0 %4735  ;;  %v6523_v6 = vpop.f32.mrf.mxu1 }
 0x39f   : > { %4808 = vst.msk [vmem:[#allocation3 + $0x60] sm:$0xf] %vm4783_vm13, %v4736_v28  ;;  %v5075_v28 = vadd.f32 %v9143_v35, %v5074_v57 }
 0x3a0   : > { %v4405_v22 = vpop.permute.xlu1 %4404  ;;  %v5093_v8 = vpop.f32.mrf.mxu1 }
 0x3a1   : > { %4474 = vst.msk [vmem:[#allocation3 + $0x6c] sm:$0xf] %vm4446_vm11, %v4405_v22  ;;  %v5188_v22 = vmax.f32 %v5070_v17, 0.0 }
 0x3a2   : > { %v2220_v48 = vpop.permute.xlu0 %2219 }
 0x3a3   : > { %2288 = vst.msk [vmem:[#allocation3 + $0x70] sm:$0xf] %vm2259_vm15, %v2220_v48 }
 0x3a4   : > { %v4738_v34 = vpop.permute.xlu1 %4737 }
 0x3a5   : > { %4809 = vst.msk [vmem:[#allocation3 + $0x64] sm:$0xf] %vm4783_vm13, %v4738_v34  ;;  %v5190_v34 = vmax.f32 %v5078_v31, 0.0 }
 0x3a6   : > { %v4740_v56 = vpop.permute.xlu0 %4739 }
 0x3a7   : > { %4810 = vst.msk [vmem:[#allocation3 + $0x68] sm:$0xf] %vm4783_vm13, %v4740_v56  ;;  %v5187_v56 = vmax.f32 %v5067_v11, 0.0 }
 0x3a8   : > { %v2222_v10 = vpop.permute.xlu1 %2221 }
 0x3a9   : > { %2289 = vst.msk [vmem:[#allocation3 + $0x74] sm:$0xf] %vm2259_vm15, %v2222_v10  ;;  %v5189_v10 = vmax.f32 %v5075_v28, 0.0 }
 0x3aa   : > { %v2224_v60 = vpop.permute.xlu0 %2223 }
 0x3ab   : > { %2290 = vst.msk [vmem:[#allocation3 + $0x78] sm:$0xf] %vm2259_vm15, %v2224_v60  ;;  %v5218_v60 = vpack.c.bf16 %v5188_v22, %v5187_v56 }
 0x3ac   : > { %v4742_v46 = vpop.permute.xlu1 %4741  ;;  %v6742_v49 = vld [vmem:[#allocation3 + $0x60] sm:$0xff]  }
 0x3ad   : > { %4811 = vst.msk [vmem:[#allocation3 + $0x6c] sm:$0xf] %vm4783_vm13, %v4742_v46  ;;  %6536 = vmatprep.mubr.msk.bf16.mxu1 %vm4971_vm3, %v6742_v49  ;;  %v5086_v46 = vadd.f32 %v6519_v41, %v9143_v35 }
 0x3ae   : > { %v2560_v61 = vpop.permute.xlu0 %2559 }
 0x3af   : > { %2628 = vst.msk [vmem:[#allocation3 + $0x70] sm:$0xf] %vm2599_vm0, %v2560_v61  ;;  %v5219_v61 = vpack.c.bf16 %v5190_v34, %v5189_v10 }
 0x3b0   : > { %v2226_v44 = vpop.permute.xlu1 %2225 }
 0x3b1   : > { %2291 = vst.msk [vmem:[#allocation3 + $0x7c] sm:$0xf] %vm2259_vm15, %v2226_v44  ;;  %v5094_v44 = vadd.f32 %v9143_v35, %v5093_v8 }
 0x3b2   : > { %v2564_v1 = vpop.permute.xlu0 %2563 }
 0x3b3   : > { %2630 = vst.msk [vmem:[#allocation3 + $0x78] sm:$0xf] %vm2599_vm0, %v2564_v1  ;;  %v5083_v1 = vadd.f32 %v6518_v21, %v9143_v35 }
 0x3b4   : > { %v2562_v37 = vpop.permute.xlu1 %2561  ;;  %v6743_v52 = vld [vmem:[#allocation3 + $0x68] sm:$0xff]  }
 0x3b5   : > { %2629 = vst.msk [vmem:[#allocation3 + $0x74] sm:$0xf] %vm2599_vm0, %v2562_v37  ;;  %6537 = vmatmul.mubr.msk.bf16.gmra.mxu1 %vm4971_vm3, %v6743_v52  ;;  %v5091_v52 = vadd.f32 %v9143_v35, %v5090_v42 }
 0x3b6   : > { %v2754_v29 = vpop.permute.xlu0 %2753 }
 0x3b7   : > { %2822 = vst.msk [vmem:[#allocation3 + $0x70] sm:$0xf] %vm2793_vm1, %v2754_v29  ;;  %v5192_v29 = vmax.f32 %v5086_v46, 0.0 }
 0x3b8   : > { %v2566_v53 = vpop.permute.xlu1 %2565 }
 0x3b9   : > { %2631 = vst.msk [vmem:[#allocation3 + $0x7c] sm:$0xf] %vm2599_vm0, %v2566_v53  ;;  %v5194_v53 = vmax.f32 %v5094_v44, 0.0 }
 0x3ba   : > { %v2758_v2 = vpop.permute.xlu0 %2757 }
 0x3bb   : > { %2824 = vst.msk [vmem:[#allocation3 + $0x78] sm:$0xf] %vm2793_vm1, %v2758_v2  ;;  %v5191_v2 = vmax.f32 %v5083_v1, 0.0 }
 0x3bc   : > { %v2756_v43 = vpop.permute.xlu1 %2755 }
 0x3bd   : > { %2823 = vst.msk [vmem:[#allocation3 + $0x74] sm:$0xf] %vm2793_vm1, %v2756_v43 }
 0x3be   : > { %v3315_v32 = vpop.permute.xlu0 %3314 }
 0x3bf   : > { %3383 = vst.msk [vmem:[#allocation3 + $0x70] sm:$0xf] %vm3354_vm6, %v3315_v32  ;;  %v5193_v32 = vmax.f32 %v5091_v52, 0.0 }
 0x3c0   : > { %v2760_v51 = vpop.permute.xlu1 %2759 }
 0x3c1   : > { %2825 = vst.msk [vmem:[#allocation3 + $0x7c] sm:$0xf] %vm2793_vm1, %v2760_v51  ;;  %v5220_v51 = vpack.c.bf16 %v5192_v29, %v5191_v2 }
 0x3c2   : > { %v3319_v13 = vpop.permute.xlu0 %3318 }
 0x3c3   : > { %3385 = vst.msk [vmem:[#allocation3 + $0x78] sm:$0xf] %vm3354_vm6, %v3319_v13  ;;  %v5102_v13 = vadd.f32 %v6523_v6, %v9143_v35 }
 0x3c4   : > { %v3317_v14 = vpop.permute.xlu1 %3316 }
 0x3c5   : > { %3384 = vst.msk [vmem:[#allocation3 + $0x74] sm:$0xf] %vm3354_vm6, %v3317_v14  ;;  %v5221_v14 = vpack.c.bf16 %v5194_v53, %v5193_v32 }
 0x3c6   : > { %v3652_v24 = vpop.permute.xlu0 %3651 }
 0x3c7   : > { %3720 = vst.msk [vmem:[#allocation3 + $0x70] sm:$0xf] %vm3691_vm9, %v3652_v24 }
 0x3c8   : > { %v3321_v26 = vpop.permute.xlu1 %3320 }
 0x3c9   : > { %3386 = vst.msk [vmem:[#allocation3 + $0x7c] sm:$0xf] %vm3354_vm6, %v3321_v26  ;;  %v5099_v26 = vadd.f32 %v6522_v40, %v9143_v35 }
 0x3ca   : > { %v3656_v9 = vpop.permute.xlu0 %3655 }
 0x3cb   : > { %3722 = vst.msk [vmem:[#allocation3 + $0x78] sm:$0xf] %vm3691_vm9, %v3656_v9 }
 0x3cc   : > { %v3654_v23 = vpop.permute.xlu1 %3653 }
 0x3cd   : > { %3721 = vst.msk [vmem:[#allocation3 + $0x74] sm:$0xf] %vm3691_vm9, %v3654_v23 }
 0x3ce   : > { %v3846_v59 = vpop.permute.xlu0 %3845 }
 0x3cf   : > { %3914 = vst.msk [vmem:[#allocation3 + $0x70] sm:$0xf] %vm3885_vm10, %v3846_v59  ;;  %v5196_v59 = vmax.f32 %v5102_v13, 0.0  ;;  %v9182_v13 = vld [vmem:[%s9318_s8] ss:$0 sm:$0xff] }
 0x3d0   : > { %v3658_v19 = vpop.permute.xlu1 %3657 }
 0x3d1   : > { %3723 = vst.msk [vmem:[#allocation3 + $0x7c] sm:$0xf] %vm3691_vm9, %v3658_v19 }
 0x3d2   : > { %v3850_v7 = vpop.permute.xlu0 %3849 }
 0x3d3   : > { %3916 = vst.msk [vmem:[#allocation3 + $0x78] sm:$0xf] %vm3885_vm10, %v3850_v7  ;;  %v5195_v7 = vmax.f32 %v5099_v26, 0.0 }
 0x3d4   : > { %v3848_v55 = vpop.permute.xlu1 %3847 }
 0x3d5   : > { %3915 = vst.msk [vmem:[#allocation3 + $0x74] sm:$0xf] %vm3885_vm10, %v3848_v55 }
 0x3d6   : > { %v4407_v5 = vpop.permute.xlu0 %4406 }
 0x3d7   : > { %4475 = vst.msk [vmem:[#allocation3 + $0x70] sm:$0xf] %vm4446_vm11, %v4407_v5  ;;  %v6526_v54 = vpop.f32.mrf.mxu1  ;;  %v5222_v5 = vpack.c.bf16 %v5196_v59, %v5195_v7 }
 0x3d8   : > { %v3852_v4 = vpop.permute.xlu1 %3851  ;;  %v5115_v3 = vadd.f32 %v6526_v54, %v9143_v35 }
 0x3d9   : > { %3917 = vst.msk [vmem:[#allocation3 + $0x7c] sm:$0xf] %vm3885_vm10, %v3852_v4  ;;  %v5106_v12 = vpop.f32.mrf.mxu1 }
 0x3da   : > { %v4411_v0 = vpop.permute.xlu0 %4410  ;;  %v5107_v23 = vadd.f32 %v9143_v35, %v5106_v12  ;;  %v5199_v38 = vmax.f32 %v5115_v3, 0.0 }
 0x3db   : > { %4477 = vst.msk [vmem:[#allocation3 + $0x78] sm:$0xf] %vm4446_vm11, %v4411_v0  ;;  %v6527_v48 = vpop.f32.mrf.mxu1 }
 0x3dc   : > { %v4409_v47 = vpop.permute.xlu1 %4408  ;;  %v5197_v55 = vmax.f32 %v5107_v23, 0.0  ;;  %v5118_v33 = vadd.f32 %v6527_v48, %v9143_v35  ;;  %v6205_v23 = vld [vmem:[%s7198_s21] sm:$0xff]  }
 0x3dd   : > { %4476 = vst.msk [vmem:[#allocation3 + $0x74] sm:$0xf] %vm4446_vm11, %v4409_v47  ;;  %v5109_v49 = vpop.f32.mrf.mxu1 }
 0x3de   : > { %v4744_v15 = vpop.permute.xlu0 %4743  ;;  %v5110_v24 = vadd.f32 %v9143_v35, %v5109_v49  ;;  %v5200_v40 = vmax.f32 %v5118_v33, 0.0 }
 0x3df   : > { %4812 = vst.msk [vmem:[#allocation3 + $0x70] sm:$0xf] %vm4783_vm13, %v4744_v15 }
 0x3e0   : > { %v4413_v45 = vpop.permute.xlu1 %4412  ;;  %v5198_v19 = vmax.f32 %v5110_v24, 0.0  ;;  %v5224_v21 = vpack.c.bf16 %v5200_v40, %v5199_v38  ;;  %v6207_v38 = vunpack.c.h.bf16 %v6205_v23 }
 0x3e1   : > { %4478 = vst.msk [vmem:[#allocation3 + $0x7c] sm:$0xf] %vm4446_vm11, %v4413_v45 }
 0x3e2   : > { %v4748_v36 = vpop.permute.xlu0 %4747  ;;  %v5223_v4 = vpack.c.bf16 %v5198_v19, %v5197_v55 }
 0x3e3   : > { %4814 = vst.msk [vmem:[#allocation3 + $0x78] sm:$0xf] %vm4783_vm13, %v4748_v36 }
 0x3e4   : > { %v4746_v18 = vpop.permute.xlu1 %4745 }
 0x3e5   : > { %4813 = vst.msk [vmem:[#allocation3 + $0x74] sm:$0xf] %vm4783_vm13, %v4746_v18 }
 0x3e8   : > { %v4750_v58 = vpop.permute.xlu1 %4749 }
 0x3e9   : > { %4815 = vst.msk [vmem:[#allocation3 + $0x7c] sm:$0xf] %vm4783_vm13, %v4750_v58 }
 0x3ec   : > { %v6749_v25 = vld [vmem:[#allocation3 + $0x70] sm:$0xff]  }
 0x3ed   : > { %6540 = vmatprep.mubr.msk.bf16.mxu1 %vm4971_vm3, %v6749_v25 }
 0x3f0   : > { %v6751_v20 = vld [vmem:[#allocation3 + $0x78] sm:$0xff]  }
 0x3f1   : > { %6541 = vmatmul.mubr.msk.bf16.gmra.mxu1 %vm4971_vm3, %v6751_v20 }
 0x3f2   : > { %6560 = vmatprep.mubr.bf16.mxu1 %v5217_v39 }
 0x3f3   : > { %v6530_v37 = vpop.f32.mrf.mxu1 }
 0x3f4   : > { %v5131_v18 = vadd.f32 %v6530_v37, %v9143_v35 }
 0x3f5   : > { %v5122_v43 = vpop.f32.mrf.mxu1 }
 0x3f6   : > { %v5123_v47 = vadd.f32 %v9143_v35, %v5122_v43  ;;  %v5203_v6 = vmax.f32 %v5131_v18, 0.0 }
 0x3f7   : > { %v6531_v9 = vpop.f32.mrf.mxu1 }
 0x3f8   : > { %v5201_v45 = vmax.f32 %v5123_v47, 0.0  ;;  %v5134_v42 = vadd.f32 %v6531_v9, %v9143_v35 }
 0x3f9   : > { %6561 = vmatmul.mubr.bf16.vlgmr.msra.gmra.mxu1 %v5218_v60  ;;  %v5125_v63 = vpop.f32.mrf.mxu1 }
 0x3fa   : > { %6564 = vmatprep.mubr.bf16.mxu1 %v5219_v61  ;;  %v5126_v0 = vadd.f32 %v9143_v35, %v5125_v63  ;;  %v5204_v57 = vmax.f32 %v5134_v42, 0.0 }
 0x3fc   : > { %v5202_v15 = vmax.f32 %v5126_v0, 0.0  ;;  %v5226_v58 = vpack.c.bf16 %v5204_v57, %v5203_v6  ;;  %v6206_v0 = vunpack.c.l.bf16 %v6205_v23  ;;  %v6350_v57 = vld [vmem:[%s7198_s21 + $0x10] sm:$0xff]  }
 0x3fe   : > { %v5225_v36 = vpack.c.bf16 %v5202_v15, %v5201_v45  ;;  %v6351_v45 = vld [vmem:[%s7198_s21 + $0x18] sm:$0xff]  }
 0x401   : > { %6565 = vmatmul.mubr.bf16.gmra.mxu1 %v5220_v51 }
 0x402   : > { %6568 = vmatprep.mubr.bf16.mxu1 %v5221_v14  ;;  %v6349_v14 = vld [vmem:[%s7198_s21 + $0x8] sm:$0xff]  }
 0x403   : > { %v6210_v63 = vunpack.c.l.bf16 %v6349_v14  ;;  %v6211_v3 = vunpack.c.h.bf16 %v6349_v14 }
 0x409   : > { %6569 = vmatmul.mubr.bf16.gmra.mxu1 %v5222_v5 }
 0x40a   : > { %6572 = vmatprep.mubr.bf16.mxu1 %v5223_v4 }
 0x411   : > { %6573 = vmatmul.mubr.bf16.gmra.mxu1 %v5224_v21 }
 0x412   : > { %6576 = vmatprep.mubr.bf16.mxu1 %v5225_v36 }
 0x419   : > { %6577 = vmatmul.mubr.bf16.gmra.mxu1 %v5226_v58  ;;  %v6218_v58 = vunpack.c.l.bf16 %v6351_v45 }
 0x433   : > { %v6534_v27 = vpop.f32.mrf.mxu1 }
 0x434   : > { %v5147_v25 = vadd.f32 %v6534_v27, %v9143_v35 }
 0x435   : > { %v5138_v41 = vpop.f32.mrf.mxu1 }
 0x436   : > { %v5139_v30 = vadd.f32 %v9143_v35, %v5138_v41  ;;  %v5207_v20 = vmax.f32 %v5147_v25, 0.0  ;;  %v6214_v25 = vunpack.c.l.bf16 %v6350_v57 }
 0x437   : > { %v6535_v8 = vpop.f32.mrf.mxu1 }
 0x438   : > { %v5150_v54 = vadd.f32 %v6535_v8, %v9143_v35  ;;  %v5205_v17 = vmax.f32 %v5139_v30, 0.0 }
 0x439   : > { %v5141_v62 = vpop.f32.mrf.mxu1 }
 0x43a   : > { %v5142_v50 = vadd.f32 %v9143_v35, %v5141_v62  ;;  %v5208_v16 = vmax.f32 %v5150_v54, 0.0  ;;  %v6219_v62 = vunpack.c.h.bf16 %v6351_v45 }
 0x43c   : > { %v5206_v12 = vmax.f32 %v5142_v50, 0.0  ;;  %v5228_v31 = vpack.c.bf16 %v5208_v16, %v5207_v20 }
 0x43e   : > { %v5227_v39 = vpack.c.bf16 %v5206_v12, %v5205_v17 }
 0x440   : > { %6580 = vmatprep.mubr.bf16.mxu1 %v5227_v39 }
 0x441   : > { %6581 = vmatmul.mubr.bf16.gmra.mxu1 %v5228_v31 }
 0x475   : > { %v6538_v11 = vpop.f32.mrf.mxu1 }
 0x476   : > { %v5163_v56 = vadd.f32 %v6538_v11, %v9143_v35 }
 0x477   : > { %v5154_v28 = vpop.f32.mrf.mxu1 }
 0x478   : > { %v5155_v48 = vadd.f32 %v9143_v35, %v5154_v28  ;;  %v5211_v44 = vmax.f32 %v5163_v56, 0.0  ;;  %v6215_v28 = vunpack.c.h.bf16 %v6350_v57 }
 0x479   : > { %v6539_v22 = vpop.f32.mrf.mxu1 }
 0x47a   : > { %v5166_v34 = vadd.f32 %v6539_v22, %v9143_v35  ;;  %v5209_v49 = vmax.f32 %v5155_v48, 0.0  ;;  %v6353_v22 = vld [vmem:[%s7198_s21 + $0x28] sm:$0xff]  }
 0x47b   : > { %v5157_v10 = vpop.f32.mrf.mxu1 }
 0x47c   : > { %v5158_v60 = vadd.f32 %v9143_v35, %v5157_v10  ;;  %v5212_v46 = vmax.f32 %v5166_v34, 0.0 }
 0x47e   : > { %v5210_v61 = vmax.f32 %v5158_v60, 0.0  ;;  %v5230_v37 = vpack.c.bf16 %v5212_v46, %v5211_v44  ;;  %v6352_v60 = vld [vmem:[%s7198_s21 + $0x20] sm:$0xff]  }
 0x47f   : > { %v6223_v23 = vunpack.c.h.bf16 %v6352_v60 }
 0x480   : > { %v5229_v1 = vpack.c.bf16 %v5210_v61, %v5209_v49  ;;  %v6226_v49 = vunpack.c.l.bf16 %v6353_v22 }
 0x482   : > { %6584 = vmatprep.mubr.bf16.mxu1 %v5229_v1 }
 0x483   : > { %6585 = vmatmul.mubr.bf16.gmra.mxu1 %v5230_v37 }
 0x4b1   : > { %v6542_v52 = vpop.f32.mrf.mxu1 }
 0x4b2   : > { %v5179_v32 = vadd.f32 %v6542_v52, %v9143_v35 }
 0x4b3   : > { %v5170_v29 = vpop.f32.mrf.mxu1 }
 0x4b4   : > { %v5171_v2 = vadd.f32 %v9143_v35, %v5170_v29  ;;  %v5215_v55 = vmax.f32 %v5179_v32, 0.0  ;;  %v6222_v29 = vunpack.c.l.bf16 %v6352_v60 }
 0x4b5   : > { %v6543_v53 = vpop.f32.mrf.mxu1 }
 0x4b6   : > { %v5182_v43 = vadd.f32 %v6543_v53, %v9143_v35  ;;  %v5213_v59 = vmax.f32 %v5171_v2, 0.0  ;;  %v6227_v53 = vunpack.c.h.bf16 %v6353_v22 }
 0x4b7   : > { %v5173_v51 = vpop.f32.mrf.mxu1 }
 0x4b8   : > { %v5174_v24 = vadd.f32 %v9143_v35, %v5173_v51  ;;  %v5216_v26 = vmax.f32 %v5182_v43, 0.0 }
 0x4b9   : > { %v6562_v9 = vpop.f32.mrf.mxu1 }
 0x4ba   : > { %v5214_v19 = vmax.f32 %v5174_v24, 0.0  ;;  %v5347_v7 = vadd.f32 %v6562_v9, %v9182_v13  ;;  %v5232_v47 = vpack.c.bf16 %v5216_v26, %v5215_v55 }
 0x4bb   : > { %v5338_v5 = vpop.f32.mrf.mxu1 }
 0x4bc   : > { %v5231_v33 = vpack.c.bf16 %v5214_v19, %v5213_v59  ;;  %v5339_v4 = vadd.f32 %v9182_v13, %v5338_v5  ;;  %v5531_v35 = vadd.f32 %v6210_v63, %v5347_v7  ;;  %v6355_v59 = vld [vmem:[%s7198_s21 + $0x38] sm:$0xff]   ;;  %v6354_v5 = vld [vmem:[%s7198_s21 + $0x30] sm:$0xff]  }
 0x4bd   : > { %v6563_v40 = vpop.f32.mrf.mxu1 }
 0x4be   : > { %v5350_v15 = vadd.f32 %v6563_v40, %v9182_v13  ;;  %6588 = vmatprep.mubr.bf16.mxu1 %v5231_v33  ;;  %v5529_v42 = vadd.f32 %v6206_v0, %v5339_v4  ;;  %v5563_v27 = vmax.f32 %v5531_v35, 0.0  ;;  %v6234_v4 = vunpack.c.l.bf16 %v6355_v59 }
 0x4bf   : > { %v5341_v21 = vpop.f32.mrf.mxu1  ;;  %6589 = vmatmul.mubr.bf16.gmra.mxu1 %v5232_v47 }
 0x4c0   : > { %v5532_v36 = vadd.f32 %v6211_v3, %v5350_v15  ;;  %v5342_v18 = vadd.f32 %v9182_v13, %v5341_v21  ;;  %v5561_v50 = vmax.f32 %v5529_v42, 0.0  ;;  %v6230_v15 = vunpack.c.l.bf16 %v6354_v5 }
 0x4c1   : > { %v6566_v6 = vpop.f32.mrf.mxu1 }
 0x4c2   : > { %v5564_v41 = vmax.f32 %v5532_v36, 0.0  ;;  %v5530_v8 = vadd.f32 %v6207_v38, %v5342_v18  ;;  %v5363_v30 = vadd.f32 %v6566_v6, %v9182_v13  ;;  %v6235_v38 = vunpack.c.h.bf16 %v6355_v59 }
 0x4c3   : > { %v5354_v54 = vpop.f32.mrf.mxu1 }
 0x4c4   : > { %v6276_v16 = vpack.c.bf16 %v5564_v41, %v5563_v27  ;;  %v5562_v17 = vmax.f32 %v5530_v8, 0.0  ;;  %v5355_v12 = vadd.f32 %v9182_v13, %v5354_v54  ;;  %v5535_v31 = vadd.f32 %v6218_v58, %v5363_v30  ;;  %v6357_v41 = vld [vmem:[%s7198_s21 + $0x48] sm:$0xff]  }
 0x4c5   : > { %v6567_v20 = vpop.f32.mrf.mxu1  ;;  %v6231_v27 = vunpack.c.h.bf16 %v6354_v5 }
 0x4c6   : > { %6364 = vst [vmem:[%s9197_s11 + $0x8] sm:$0xff] %v6276_v16   ;;  %v6271_v39 = vpack.c.bf16 %v5562_v17, %v5561_v50  ;;  %v5366_v11 = vadd.f32 %v6567_v20, %v9182_v13  ;;  %v5533_v34 = vadd.f32 %v6214_v25, %v5355_v12  ;;  %v5567_v61 = vmax.f32 %v5535_v31, 0.0 }
 0x4c7   : > { %v5357_v48 = vpop.f32.mrf.mxu1  ;;  %v6242_v16 = vunpack.c.l.bf16 %v6357_v41 }
 0x4c8   : > { %6272 = vst [vmem:[%s9197_s11] sm:$0xff] %v6271_v39   ;;  %v5536_v56 = vadd.f32 %v6219_v62, %v5366_v11  ;;  %v5358_v10 = vadd.f32 %v9182_v13, %v5357_v48  ;;  %v5565_v2 = vmax.f32 %v5533_v34, 0.0  ;;  %v6356_v62 = vld [vmem:[%s7198_s21 + $0x40] sm:$0xff]  }
 0x4c9   : > { %v6570_v46 = vpop.f32.mrf.mxu1  ;;  %v6238_v11 = vunpack.c.l.bf16 %v6356_v62 }
 0x4ca   : > { %v5568_v44 = vmax.f32 %v5536_v56, 0.0  ;;  %v5534_v1 = vadd.f32 %v6215_v28, %v5358_v10  ;;  %v5379_v37 = vadd.f32 %v6570_v46, %v9182_v13  ;;  %v6243_v28 = vunpack.c.h.bf16 %v6357_v41 }
 0x4cb   : > { %v5370_v52 = vpop.f32.mrf.mxu1 }
 0x4cc   : > { %v6286_v43 = vpack.c.bf16 %v5568_v44, %v5567_v61  ;;  %v5566_v32 = vmax.f32 %v5534_v1, 0.0  ;;  %v5371_v51 = vadd.f32 %v9182_v13, %v5370_v52  ;;  %v5539_v26 = vadd.f32 %v6226_v49, %v5379_v37 }
 0x4cd   : > { %v6571_v14 = vpop.f32.mrf.mxu1  ;;  %v6239_v61 = vunpack.c.h.bf16 %v6356_v62 }
 0x4ce   : > { %6366 = vst [vmem:[%s9197_s11 + $0x18] sm:$0xff] %v6286_v43   ;;  %v6281_v24 = vpack.c.bf16 %v5566_v32, %v5565_v2  ;;  %v5382_v9 = vadd.f32 %v6571_v14, %v9182_v13  ;;  %v5537_v7 = vadd.f32 %v6222_v29, %v5371_v51  ;;  %v5571_v0 = vmax.f32 %v5539_v26, 0.0 }
 0x4cf   : > { %v5373_v19 = vpop.f32.mrf.mxu1 }
 0x4d0   : > { %6365 = vst [vmem:[%s9197_s11 + $0x10] sm:$0xff] %v6281_v24   ;;  %v5540_v63 = vadd.f32 %v6227_v53, %v5382_v9  ;;  %v5374_v55 = vadd.f32 %v9182_v13, %v5373_v19  ;;  %v5569_v45 = vmax.f32 %v5537_v7, 0.0  ;;  %v6359_v24 = vld [vmem:[%s7198_s21 + $0x58] sm:$0xff]   ;;  %v6358_v9 = vld [vmem:[%s7198_s21 + $0x50] sm:$0xff]  }
 0x4d1   : > { %v6574_v33 = vpop.f32.mrf.mxu1  ;;  %v6250_v59 = vunpack.c.l.bf16 %v6359_v24 }
 0x4d2   : > { %v5572_v3 = vmax.f32 %v5540_v63, 0.0  ;;  %v5538_v47 = vadd.f32 %v6223_v23, %v5374_v55  ;;  %v5395_v40 = vadd.f32 %v6574_v33, %v9182_v13  ;;  %v6246_v63 = vunpack.c.l.bf16 %v6358_v9 }
 0x4d3   : > { %v5386_v35 = vpop.f32.mrf.mxu1  ;;  %v6251_v55 = vunpack.c.h.bf16 %v6359_v24 }
 0x4d4   : > { %v6296_v21 = vpack.c.bf16 %v5572_v3, %v5571_v0  ;;  %v5570_v42 = vmax.f32 %v5538_v47, 0.0  ;;  %v5387_v36 = vadd.f32 %v9182_v13, %v5386_v35  ;;  %v5543_v6 = vadd.f32 %v6234_v4, %v5395_v40 }
 0x4d5   : > { %v6575_v18 = vpop.f32.mrf.mxu1  ;;  %v6247_v0 = vunpack.c.h.bf16 %v6358_v9 }
 0x4d6   : > { %6368 = vst [vmem:[%s9197_s11 + $0x28] sm:$0xff] %v6296_v21   ;;  %v6291_v57 = vpack.c.bf16 %v5570_v42, %v5569_v45  ;;  %v5398_v58 = vadd.f32 %v6575_v18, %v9182_v13  ;;  %v5541_v30 = vadd.f32 %v6230_v15, %v5387_v36  ;;  %v5575_v17 = vmax.f32 %v5543_v6, 0.0 }
 0x4d7   : > { %v5389_v8 = vpop.f32.mrf.mxu1 }
 0x4d8   : > { %6367 = vst [vmem:[%s9197_s11 + $0x20] sm:$0xff] %v6291_v57   ;;  %v5544_v54 = vadd.f32 %v6235_v38, %v5398_v58  ;;  %v5390_v25 = vadd.f32 %v9182_v13, %v5389_v8  ;;  %v5573_v22 = vmax.f32 %v5541_v30, 0.0  ;;  %v6361_v57 = vld [vmem:[%s7198_s21 + $0x68] sm:$0xff]   ;;  %v6360_v58 = vld [vmem:[%s7198_s21 + $0x60] sm:$0xff]  }
 0x4d9   : > { %v6578_v50 = vpop.f32.mrf.mxu1  ;;  %v6258_v41 = vunpack.c.l.bf16 %v6361_v57 }
 0x4da   : > { %v5576_v12 = vmax.f32 %v5544_v54, 0.0  ;;  %v5542_v20 = vadd.f32 %v6231_v27, %v5390_v25  ;;  %v5411_v39 = vadd.f32 %v6578_v50, %v9182_v13  ;;  %v6254_v54 = vunpack.c.l.bf16 %v6360_v58 }
 0x4db   : > { %v5402_v31 = vpop.f32.mrf.mxu1  ;;  %v6259_v25 = vunpack.c.h.bf16 %v6361_v57 }
 0x4dc   : > { %v6306_v48 = vpack.c.bf16 %v5576_v12, %v5575_v17  ;;  %v5574_v34 = vmax.f32 %v5542_v20, 0.0  ;;  %v5403_v56 = vadd.f32 %v9182_v13, %v5402_v31  ;;  %v5547_v46 = vadd.f32 %v6242_v16, %v5411_v39 }
 0x4dd   : > { %v6579_v10 = vpop.f32.mrf.mxu1  ;;  %v6255_v17 = vunpack.c.h.bf16 %v6360_v58 }
 0x4de   : > { %6370 = vst [vmem:[%s9197_s11 + $0x38] sm:$0xff] %v6306_v48   ;;  %v6301_v60 = vpack.c.bf16 %v5574_v34, %v5573_v22  ;;  %v5414_v49 = vadd.f32 %v6579_v10, %v9182_v13  ;;  %v5545_v1 = vadd.f32 %v6238_v11, %v5403_v56  ;;  %v5579_v29 = vmax.f32 %v5547_v46, 0.0 }
 0x4df   : > { %v5405_v44 = vpop.f32.mrf.mxu1 }
 0x4e0   : > { %6369 = vst [vmem:[%s9197_s11 + $0x30] sm:$0xff] %v6301_v60   ;;  %v5548_v37 = vadd.f32 %v6243_v28, %v5414_v49  ;;  %v5406_v52 = vadd.f32 %v9182_v13, %v5405_v44  ;;  %v5577_v43 = vmax.f32 %v5545_v1, 0.0  ;;  %v6363_v60 = vld [vmem:[%s7198_s21 + $0x78] sm:$0xff]   ;;  %v6362_v49 = vld [vmem:[%s7198_s21 + $0x70] sm:$0xff]   ;;  %s5770_s21 = sshll.u32 %s9197_s11, 4  ;;  %s9259_s21 = int_to_ptr.vmem [resolvable:$true] %s5770_s21 }
 0x4e1   : > { %v6266_v44 = vunpack.c.l.bf16 %v6363_v60  ;;  %s6867_s22 = scalar_lea.vmem %s9259_s21, 2048  ;;  %p6874_p2 = scmp.lt.s32.totalorder %s9259_s21, %s6872_s17 }
 0x4e2   : > { %v5580_v53 = vmax.f32 %v5548_v37, 0.0  ;;  %v5546_v2 = vadd.f32 %v6239_v61, %v5406_v52  ;;  %v6262_v52 = vunpack.c.l.bf16 %v6362_v49  ;;  %p6868_p7 = scmp.ne.s32.totalorder %s9259_s21, %s6867_s22  ;;  %p6875_p3 = scmp.lt.s32.totalorder %s6873_s29, %s6867_s22 }
 0x4e4   : > { %v6316_v32 = vpack.c.bf16 %v5580_v53, %v5579_v29  ;;  %v5578_v51 = vmax.f32 %v5546_v2, 0.0  ;;  %v6267_v29 = vunpack.c.h.bf16 %v6363_v60  ;;  %p6869_p5 = pnand %p6868_p7, %p9379_p8  ;;  %p6876_p0 = por %p6875_p3, %p6874_p2 }
 0x4e6   : > { %6372 = vst [vmem:[%s9197_s11 + $0x48] sm:$0xff] %v6316_v32   ;;  %v6311_v14 = vpack.c.bf16 %v5578_v51, %v5577_v43  ;;  %v6263_v32 = vunpack.c.h.bf16 %v6362_v49  ;;  %p6870_p10 = pneg %p6869_p5 }
 0x4e8   : > { %6371 = vst [vmem:[%s9197_s11 + $0x40] sm:$0xff] %v6311_v14   ;;  %p6877_p1 = pnand %p6876_p0, %p6870_p10 }
 0x501   : > { %v6582_v26 = vpop.f32.mrf.mxu1 }
 0x502   : > { %v5427_v23 = vadd.f32 %v6582_v26, %v9182_v13 }
 0x503   : > { %v5418_v19 = vpop.f32.mrf.mxu1 }
 0x504   : > { %v5419_v7 = vadd.f32 %v9182_v13, %v5418_v19  ;;  %v5551_v33 = vadd.f32 %v6250_v59, %v5427_v23 }
 0x505   : > { %v6583_v5 = vpop.f32.mrf.mxu1 }
 0x506   : > { %v5430_v4 = vadd.f32 %v6583_v5, %v9182_v13  ;;  %v5549_v47 = vadd.f32 %v6246_v63, %v5419_v7  ;;  %v5583_v15 = vmax.f32 %v5551_v33, 0.0 }
 0x507   : > { %v5421_v3 = vpop.f32.mrf.mxu1 }
 0x508   : > { %v5552_v40 = vadd.f32 %v6251_v55, %v5430_v4  ;;  %v5422_v35 = vadd.f32 %v9182_v13, %v5421_v3  ;;  %v5581_v21 = vmax.f32 %v5549_v47, 0.0 }
 0x50a   : > { %v5584_v38 = vmax.f32 %v5552_v40, 0.0  ;;  %v5550_v45 = vadd.f32 %v6247_v0, %v5422_v35 }
 0x50c   : > { %v6326_v42 = vpack.c.bf16 %v5584_v38, %v5583_v15  ;;  %v5582_v36 = vmax.f32 %v5550_v45, 0.0 }
 0x50e   : > { %6374 = vst [vmem:[%s9197_s11 + $0x58] sm:$0xff] %v6326_v42   ;;  %v6321_v18 = vpack.c.bf16 %v5582_v36, %v5581_v21 }
 0x510   : > { %6373 = vst [vmem:[%s9197_s11 + $0x50] sm:$0xff] %v6321_v18  }
 0x543   : > { %v6586_v6 = vpop.f32.mrf.mxu1 }
 0x544   : > { %v5443_v27 = vadd.f32 %v6586_v6, %v9182_v13 }
 0x545   : > { %v5434_v8 = vpop.f32.mrf.mxu1 }
 0x546   : > { %v5435_v30 = vadd.f32 %v9182_v13, %v5434_v8  ;;  %v5555_v50 = vadd.f32 %v6258_v41, %v5443_v27 }
 0x547   : > { %v6587_v62 = vpop.f32.mrf.mxu1 }
 0x548   : > { %v5446_v16 = vadd.f32 %v6587_v62, %v9182_v13  ;;  %v5553_v20 = vadd.f32 %v6254_v54, %v5435_v30  ;;  %v5587_v11 = vmax.f32 %v5555_v50, 0.0 }
 0x549   : > { %v5437_v12 = vpop.f32.mrf.mxu1 }
 0x54a   : > { %v5556_v39 = vadd.f32 %v6259_v25, %v5446_v16  ;;  %v5438_v31 = vadd.f32 %v9182_v13, %v5437_v12  ;;  %v5585_v48 = vmax.f32 %v5553_v20, 0.0 }
 0x54c   : > { %v5588_v28 = vmax.f32 %v5556_v39, 0.0  ;;  %v5554_v22 = vadd.f32 %v6255_v17, %v5438_v31 }
 0x54e   : > { %v6336_v34 = vpack.c.bf16 %v5588_v28, %v5587_v11  ;;  %v5586_v56 = vmax.f32 %v5554_v22, 0.0 }
 0x550   : > { %6376 = vst [vmem:[%s9197_s11 + $0x68] sm:$0xff] %v6336_v34   ;;  %v6331_v10 = vpack.c.bf16 %v5586_v56, %v5585_v48 }
 0x552   : > { %6375 = vst [vmem:[%s9197_s11 + $0x60] sm:$0xff] %v6331_v10  }
 0x57f   : > { %v6590_v46 = vpop.f32.mrf.mxu1 }
 0x580   : > { %v5459_v61 = vadd.f32 %v6590_v46, %v9182_v13 }
 0x581   : > { %v5450_v1 = vpop.f32.mrf.mxu1 }
 0x582   : > { %v5451_v37 = vadd.f32 %v9182_v13, %v5450_v1  ;;  %v5559_v2 = vadd.f32 %v6266_v44, %v5459_v61 }
 0x583   : > { %v6591_v53 = vpop.f32.mrf.mxu1 }
 0x584   : > { %v5462_v43 = vadd.f32 %v6591_v53, %v9182_v13  ;;  %v5557_v14 = vadd.f32 %v6262_v52, %v5451_v37  ;;  %v5591_v9 = vmax.f32 %v5559_v2, 0.0 }
 0x585   : > { %v5453_v51 = vpop.f32.mrf.mxu1 }
 0x586   : > { %v5560_v24 = vadd.f32 %v6267_v29, %v5462_v43  ;;  %v5454_v26 = vadd.f32 %v9182_v13, %v5453_v51  ;;  %v5589_v19 = vmax.f32 %v5557_v14, 0.0 }
 0x588   : > { %v5592_v23 = vmax.f32 %v5560_v24, 0.0  ;;  %v5558_v59 = vadd.f32 %v6263_v32, %v5454_v26 }
 0x58a   : > { %v6346_v7 = vpack.c.bf16 %v5592_v23, %v5591_v9  ;;  %v5590_v63 = vmax.f32 %v5558_v59, 0.0 }
 0x58c   : > { %6378 = vst [vmem:[%s9197_s11 + $0x78] sm:$0xff] %v6346_v7   ;;  %v6341_v55 = vpack.c.bf16 %v5590_v63, %v5589_v19 }
 0x58e   : > { %6377 = vst [vmem:[%s9197_s11 + $0x70] sm:$0xff] %v6341_v55  }
 0x58f   : > { %6880 = shalt.err (!%p6877_p1)
}
 0x590   : > { %s6881_s15 = scalar_lea.hbm %s9256_s24, 2048  ;;  %s6885_s1 = scalar_lea.hbm %s9378_s28, 4096 }
 0x591   : > { %p6882_p6 = scmp.ne.s32.totalorder %s9256_s24, %s6881_s15  ;;  %p6886_p12 = scmp.lt.s32.totalorder %s9256_s24, %s9378_s28 }
 0x592   : > { %p6887_p13 = scmp.lt.s32.totalorder %s6885_s1, %s6881_s15 }
 0x593   : > { %p6883_p9 = pnand %p6882_p6, %p9379_p8 }
 0x594   : > { %p6888_p11 = por %p6887_p13, %p6886_p12 }
 0x595   : > { %p6884_p4 = pneg %p6883_p9 }
 0x597   : > { %p6889_p7 = pnand %p6888_p11, %p6884_p4 }
 0x599   : > { %6892 = shalt.err (!%p6889_p7)
}
 0x59a   : > { %s6973_s11 = smov 4  }
 0x59b   : > { %6614 = dma.vmem_to_hbm [thread:$0]  (%p9379_p8), %s9259_s21, 2048, %s9256_s24, %s5754_s27, %s6970_s25, %s6970_s25, %s6973_s11  }
 0x59c PF: > { %s9380_s18 = sld [smem:[#allocation17_spill]] }
 0x59d   : > { %s9381_s26 = sld [smem:[#allocation23_spill]] }
 0x59e   : > { %s9382_s19 = sld [smem:[#allocation20_spill]] }
 0x5a2   : > { %s5785_s14 = sand.u32 1, %s9380_s18  }
 0x5a3   : > { %p9383_p5 = scmp.ne.s32.totalorder %s9381_s26, 0  ;;  %s5786_s22 = scalar_lea.sflag [#allocation6], %s5785_s14 }
 0x5a4   : > { %p9384_p10 = scmp.ge.s32.totalorder %s9382_s19, 2 }
 0x5a6   : > { %p6631_p2 = pnand %p9384_p10, %p9383_p5 }
 0x5a8   : > { %p6632_p3 = pneg %p6631_p2 }
 0x5aa   : > { %6930 = dma.done.wait (%p6632_p3), %s5786_s22, 2048  }
 0x5ab   : > { %6932 = vsyncadd (%p6632_p3), %s5786_s22, 4294965248  ;;  %s29_s14 = sadd.s32 1, %s9382_s19   ;;  %s9385_s23 = sld [smem:[#allocation18_spill]] }
 0x5ac   : > { %p26_p0 = scmp.ge.s32.totalorder %s29_s14, 4   ;;  %s9386_s11 = sld [smem:[#allocation22_spill]] }
 0x5ad   : > { %s9387_s12 = sld [smem:[#allocation19_spill]]  ;;  %s9389_s30 = smov %s6939_s10 }
 0x5ae   : > { %s9388_s13 = sld [smem:[#allocation21_spill]]  ;;  %28 = sbr.rel (!%p26_p0) target bundleno = 12 (0xc), region = 136 }
 0x5b1   : > { %s9390_s10 = smov %s9385_s23 }
 0x5b3   :  { %5791 = vsyncpa [#allocation5], 1 }
 0x5b4   :  { %5793 = vsyncpa [#allocation5 + $0x1], 1 }
 0x5b5   :  { %5794 = vsyncpa [#allocation8], 1 }
 0x5b6   :  { %5796 = vsyncpa [#allocation8 + $0x1], 1 }
 0x5b7   :  { %5797 = vsyncpa [#allocation11], 1 }
 0x5b8   :  { %5798 = vsyncpa [#allocation6], 1 }
 0x5b9   :  { %5800 = vsyncpa [#allocation6 + $0x1], 1 }

</bundles_post_ra>
